<compile_context>
chip_gen: v7x
topology: tpu7x:2x2x1
jax: 0.10.0
libtpu: 0.0.40
codegen_flags: <defaults>
</compile_context>

<pallas_src>
import functools

import jax
import jax.numpy as jnp
from jax.experimental import pallas as pl
from jax.experimental.pallas import tpu as pltpu


# ----------------------------------------------------------------------------
# Plain-JAX glue: bilinear upsample (align_corners=True), weight standardization
# ----------------------------------------------------------------------------
def _src_coords(out_size, in_size):
    if out_size == 1:
        src = jnp.zeros((1,), jnp.float32)
    else:
        src = jnp.arange(out_size, dtype=jnp.float32) * ((in_size - 1) / (out_size - 1))
    lo = jnp.clip(jnp.floor(src).astype(jnp.int32), 0, in_size - 1)
    hi = jnp.minimum(lo + 1, in_size - 1)
    frac = src - lo.astype(jnp.float32)
    return lo, hi, frac


# TODO(synk): bilinear interpolation is gather-heavy; kept as plain-JAX glue.
def bilinear_align_corners(x, Ho, Wo):
    # x: NCHW
    y0, y1, fy = _src_coords(Ho, x.shape[2])
    x0, x1, fx = _src_coords(Wo, x.shape[3])
    r0 = x[:, :, y0, :]
    r1 = x[:, :, y1, :]
    a = r0[:, :, :, x0]
    b = r0[:, :, :, x1]
    c = r1[:, :, :, x0]
    d = r1[:, :, :, x1]
    wy = fy[None, None, :, None]
    wx = fx[None, None, None, :]
    return a * (1 - wy) * (1 - wx) + b * (1 - wy) * wx + c * wy * (1 - wx) + d * wy * wx


def _ws_standardize(w_oihw):
    # Matches the overridden Conv2d.forward: subtract full per-out-channel mean,
    # divide by unbiased std (+1e-5).
    cout = w_oihw.shape[0]
    w = w_oihw.astype(jnp.float32)
    w = w - jnp.mean(w, axis=(1, 2, 3), keepdims=True)
    std = jnp.std(w.reshape(cout, -1), axis=1, ddof=1).reshape(cout, 1, 1, 1) + 1e-5
    return w / std


def _repack(w_oihw_f32, dtype):
    # (O, Cin, 3, 3) -> (9*Cin, O) with row index = (ky*3 + kx)*Cin + c.
    cout, cin = w_oihw_f32.shape[0], w_oihw_f32.shape[1]
    return jnp.transpose(w_oihw_f32, (2, 3, 1, 0)).reshape(9 * cin, cout).astype(dtype)


def _pack_weights(w_oihw, dtype):
    return _repack(_ws_standardize(w_oihw), dtype)


def _pack_weights_split(w_oihw, ca, dtype):
    # Standardize over the FULL weight, then split the in-channel dim so the
    # channel concat can be fused as two partial matmuls.
    w = _ws_standardize(w_oihw)
    return _repack(w[:, :ca], dtype), _repack(w[:, ca:], dtype)


# ----------------------------------------------------------------------------
# Row-tiling helpers (wrapper side, all tiny)
# ----------------------------------------------------------------------------
def _pick_rows(H, W, max_pixels, align):
    # Largest row count d dividing H with (d*W) % align == 0 and d*W <= max_pixels.
    for a in (align, 8):
        best = None
        for d in range(1, H + 1):
            if H % d == 0 and (d * W) % a == 0 and d * W <= max_pixels:
                best = d
        if best is not None:
            return best
    return H


def _pick_rows_lane_dense(H, max_rows):
    best = None
    for d in range(1, H + 1):
        if H % d == 0 and d % 8 == 0 and d <= max_rows:
            best = d
    return best if best is not None else H


def _row_halos(x_nhwc, TR):
    # (N, H, W, C) -> (N, T, 2*W, C): rows directly above/below each row tile,
    # zeros at the image top/bottom. Only 2 rows per tile -> negligible HBM.
    N, H, W, C = x_nhwc.shape
    T = H // TR
    zero = jnp.zeros((N, 1, W, C), x_nhwc.dtype)
    above = jnp.concatenate([zero, x_nhwc[:, TR - 1:H - 1:TR]], axis=1)   # (N, T, W, C)
    below = jnp.concatenate([x_nhwc[:, TR:H:TR], zero], axis=1)           # (N, T, W, C)
    return jnp.stack([above, below], axis=2).reshape(N, T, 2 * W, C)


def _edge_mask(P, W, dtype):
    # (P, 2): column 0 = 1 unless pixel is at w==0 (left tap invalid),
    #         column 1 = 1 unless pixel is at w==W-1 (right tap invalid).
    # 0/1 values -> exact in any dtype; kept in the matmul dtype.
    wcol = jnp.arange(P, dtype=jnp.int32) % W
    return jnp.stack([(wcol != 0), (wcol != W - 1)], axis=1).astype(dtype)


def _gn_scale_shift(stats, bias, gamma, beta, npix, groups, eps):
    # stats: (N, T, 2, C) per-tile [sum, sumsq] of the RAW conv output.
    # Folds bias, group mean/var, gamma, beta into per-(N, C) scale/shift so
    # normalization is a pure affine per channel: out = conv*scale + shift.
    s = jnp.sum(stats[:, :, 0, :], axis=1)                     # (N, C)
    q = jnp.sum(stats[:, :, 1, :], axis=1)                     # (N, C)
    b = bias.astype(jnp.float32)[None, :]
    g = gamma.astype(jnp.float32)[None, :]
    be = beta.astype(jnp.float32)[None, :]
    s_b = s + npix * b
    q_b = q + 2.0 * b * s + npix * (b * b)
    n, c = s.shape
    cg = c // groups
    gs = s_b.reshape(n, groups, cg).sum(axis=-1)
    gq = q_b.reshape(n, groups, cg).sum(axis=-1)
    n_el = float(npix * cg)
    mean = gs / n_el
    var = jnp.maximum(gq / n_el - mean * mean, 0.0)            # clamp: no rsqrt NaN
    inv = jax.lax.rsqrt(var + eps)
    mean_c = jnp.repeat(mean, cg, axis=1)                      # (N, C)
    inv_c = jnp.repeat(inv, cg, axis=1)
    scale = g * inv_c
    shift = (b - mean_c) * scale + be
    return scale, shift                                        # (N, C) each


# ----------------------------------------------------------------------------
# In-kernel helpers
# ----------------------------------------------------------------------------
def _row_extend(tile, top, bot):
    # tile: (P, C) pixel-major row tile; top/bot: (W, C) halo rows.
    # Returns (P + 2W + 2, C): [zero_px, top, tile, bot, zero_px].
    z = jnp.zeros((1, tile.shape[-1]), tile.dtype)
    return jnp.concatenate([z, top, tile, bot, z], axis=0)


def _im2col_dot(ext, w, left_ok, right_ok, W, P):
    # Single im2col matmul: patch (P, 9*C) @ w (9*C, Cout), f32 accumulate.
    # Tap (dy, dx) slab for output pixel p is ext[p + dy*W + dx]; W-edge taps
    # are zeroed with the precomputed masks. Everything (slice / mask / concat)
    # runs in the MXU dtype so only one cast per tile happens.
    ext = ext.astype(w.dtype)
    slabs = []
    for dy in range(3):
        for dx in range(3):
            s = ext[dy * W + dx: dy * W + dx + P, :]
            if dx == 0:
                s = s * left_ok
            elif dx == 2:
                s = s * right_ok
            slabs.append(s)
    patch = jnp.concatenate(slabs, axis=1)                     # (P, 9*C)
    return jnp.dot(patch, w, preferred_element_type=jnp.float32)


def _tile_stats(acc):
    # (2, Cout): per-tile channel sum and sum-of-squares (cross-sublane -> XLU).
    return jnp.concatenate(
        [jnp.sum(acc, axis=0, keepdims=True),
         jnp.sum(acc * acc, axis=0, keepdims=True)], axis=0)


# ----------------------------------------------------------------------------
# Kernels
# ----------------------------------------------------------------------------
def _concat_conv_stats_kernel(edge_ref, xa_ref, ha_ref, xb_ref, hb_ref, wa_ref, wb_ref,
                              conv_ref, stats_ref, *, W, P):
    # Fused channel-concat + WS-conv3x3: two partial im2col matmuls.
    left = edge_ref[:, 0:1]
    right = edge_ref[:, 1:2]
    ext_a = _row_extend(xa_ref[0], ha_ref[0, 0, :W, :], ha_ref[0, 0, W:, :])
    ext_b = _row_extend(xb_ref[0], hb_ref[0, 0, :W, :], hb_ref[0, 0, W:, :])
    acc = _im2col_dot(ext_a, wa_ref[...], left, right, W, P)
    acc = acc + _im2col_dot(ext_b, wb_ref[...], left, right, W, P)
    conv_ref[0] = acc.astype(conv_ref.dtype)                   # raw conv (no bias)
    stats_ref[0, 0] = _tile_stats(acc)


def _act_conv_stats_kernel(edge_ref, x_ref, h_ref, sc_ref, sh_ref, w_ref,
                           conv_ref, stats_ref, *, W, P, slope):
    # GroupNorm1 + LeakyReLU applied on the fly (tile + halo rows), then conv2.
    t = pl.program_id(1)
    num_t = pl.num_programs(1)
    sc = sc_ref[0]                                             # (1, Cin) f32
    sh = sh_ref[0]

    def act(v):
        y = v.astype(jnp.float32) * sc + sh
        return jnp.where(y > 0, y, slope * y)

    h_tile = act(x_ref[0])                                     # (P, Cin) f32
    h_halo = act(h_ref[0, 0])                                  # (2W, Cin) f32
    # Rows outside the image must be zero AFTER the activation (zero padding of h).
    top = h_halo[:W, :] * (t > 0).astype(jnp.float32)
    bot = h_halo[W:, :] * (t < num_t - 1).astype(jnp.float32)
    ext = _row_extend(h_tile, top, bot)
    acc = _im2col_dot(ext, w_ref[...], edge_ref[:, 0:1], edge_ref[:, 1:2], W, P)
    conv_ref[0] = acc.astype(conv_ref.dtype)
    stats_ref[0, 0] = _tile_stats(acc)


def _norm_act_kernel(x_ref, sc_ref, sh_ref, o_ref, *, slope):
    # Final GroupNorm + LeakyReLU; lane-dense (rows, W*Cout) layout.
    y = x_ref[0] * sc_ref[0] + sh_ref[0]
    o_ref[0] = jnp.where(y > 0, y, slope * y)


# ----------------------------------------------------------------------------
# pallas_call wrappers
# ----------------------------------------------------------------------------
def _conv_concat_block(xa_nhwc, xb_nhwc, w_oihw, TR, mm_dtype, vmem_limit):
    N, H, W, Ca = xa_nhwc.shape
    Cb = xb_nhwc.shape[3]
    Cout = w_oihw.shape[0]
    T = H // TR
    P = TR * W
    wa, wb = _pack_weights_split(w_oihw, Ca, mm_dtype)
    edge = _edge_mask(P, W, mm_dtype)
    xa_p = xa_nhwc.reshape(N, H * W, Ca)                       # pixel-major (free reshape)
    xb_p = xb_nhwc.reshape(N, H * W, Cb)
    ha = _row_halos(xa_nhwc, TR)
    hb = _row_halos(xb_nhwc, TR)
    kernel = functools.partial(_concat_conv_stats_kernel, W=W, P=P)
    return pl.pallas_call(
        kernel,
        out_shape=(jax.ShapeDtypeStruct((N, H * W, Cout), jnp.float32),
                   jax.ShapeDtypeStruct((N, T, 2, Cout), jnp.float32)),
        grid_spec=pltpu.PrefetchScalarGridSpec(
            num_scalar_prefetch=0,
            grid=(N, T),
            in_specs=[
                pl.BlockSpec((P, 2), lambda n, t: (0, 0)),
                pl.BlockSpec((1, P, Ca), lambda n, t: (n, t, 0)),
                pl.BlockSpec((1, 1, 2 * W, Ca), lambda n, t: (n, t, 0, 0)),
                pl.BlockSpec((1, P, Cb), lambda n, t: (n, t, 0)),
                pl.BlockSpec((1, 1, 2 * W, Cb), lambda n, t: (n, t, 0, 0)),
                pl.BlockSpec((9 * Ca, Cout), lambda n, t: (0, 0)),
                pl.BlockSpec((9 * Cb, Cout), lambda n, t: (0, 0)),
            ],
            out_specs=(
                pl.BlockSpec((1, P, Cout), lambda n, t: (n, t, 0)),
                pl.BlockSpec((1, 1, 2, Cout), lambda n, t: (n, t, 0, 0)),
            ),
        ),
        compiler_params=pltpu.CompilerParams(
            dimension_semantics=("parallel", "parallel"),
            vmem_limit_bytes=vmem_limit),
    )(edge, xa_p, ha, xb_p, hb, wa, wb)


def _act_conv_block(conv_pix, scale, shift, w_oihw, H, W, TR, slope, mm_dtype, vmem_limit):
    N, HW, Cin = conv_pix.shape
    Cout = w_oihw.shape[0]
    T = H // TR
    P = TR * W
    w = _pack_weights(w_oihw, mm_dtype)
    edge = _edge_mask(P, W, mm_dtype)
    halos = _row_halos(conv_pix.reshape(N, H, W, Cin), TR)
    kernel = functools.partial(_act_conv_stats_kernel, W=W, P=P, slope=slope)
    return pl.pallas_call(
        kernel,
        out_shape=(jax.ShapeDtypeStruct((N, H * W, Cout), jnp.float32),
                   jax.ShapeDtypeStruct((N, T, 2, Cout), jnp.float32)),
        grid_spec=pltpu.PrefetchScalarGridSpec(
            num_scalar_prefetch=0,
            grid=(N, T),
            in_specs=[
                pl.BlockSpec((P, 2), lambda n, t: (0, 0)),
                pl.BlockSpec((1, P, Cin), lambda n, t: (n, t, 0)),
                pl.BlockSpec((1, 1, 2 * W, Cin), lambda n, t: (n, t, 0, 0)),
                pl.BlockSpec((1, 1, Cin), lambda n, t: (n, 0, 0)),
                pl.BlockSpec((1, 1, Cin), lambda n, t: (n, 0, 0)),
                pl.BlockSpec((9 * Cin, Cout), lambda n, t: (0, 0)),
            ],
            out_specs=(
                pl.BlockSpec((1, P, Cout), lambda n, t: (n, t, 0)),
                pl.BlockSpec((1, 1, 2, Cout), lambda n, t: (n, t, 0, 0)),
            ),
        ),
        compiler_params=pltpu.CompilerParams(
            dimension_semantics=("parallel", "parallel"),
            vmem_limit_bytes=vmem_limit),
    )(edge, conv_pix, halos, scale.reshape(N, 1, Cin), shift.reshape(N, 1, Cin), w)


def _norm_act(conv_pix, scale, shift, H, W, slope, max_rows, vmem_limit):
    N, HW, C = conv_pix.shape
    TR = _pick_rows_lane_dense(H, max_rows)
    T = H // TR
    x3 = conv_pix.reshape(N, H, W * C)                         # lane-dense view (free)
    sc = jnp.tile(scale, (1, W)).reshape(N, 1, W * C)
    sh = jnp.tile(shift, (1, W)).reshape(N, 1, W * C)
    return pl.pallas_call(
        functools.partial(_norm_act_kernel, slope=slope),
        out_shape=jax.ShapeDtypeStruct((N, H, W * C), jnp.float32),
        grid_spec=pltpu.PrefetchScalarGridSpec(
            num_scalar_prefetch=0,
            grid=(N, T),
            in_specs=[
                pl.BlockSpec((1, TR, W * C), lambda n, t: (n, t, 0)),
                pl.BlockSpec((1, 1, W * C), lambda n, t: (n, 0, 0)),
                pl.BlockSpec((1, 1, W * C), lambda n, t: (n, 0, 0)),
            ],
            out_specs=pl.BlockSpec((1, TR, W * C), lambda n, t: (n, t, 0)),
        ),
        compiler_params=pltpu.CompilerParams(
            dimension_semantics=("parallel", "parallel"),
            vmem_limit_bytes=vmem_limit),
    )(x3, sc, sh)


# ----------------------------------------------------------------------------
# UpSampleGN forward
# ----------------------------------------------------------------------------
def upsample_gn_forward(x, concat_with, params, *, groups=8, eps=1e-5, slope=0.01,
                        max_tile_pixels=4096, matmul_dtype=jnp.bfloat16,
                        vmem_limit_bytes=48 * 1024 * 1024):
    # x, concat_with: NCHW. Transposes only at the API boundary; internally the
    # kernels use pixel-major / lane-dense channels-last layouts.
    N = x.shape[0]
    H, W = concat_with.shape[2], concat_with.shape[3]
    Cout = params["w1"].shape[0]

    up = bilinear_align_corners(x.astype(jnp.float32), H, W)              # NCHW
    # Conv1 inputs are cast to the MXU dtype up front (the kernel would cast
    # them anyway) -> halves HBM/VMEM traffic for K1 without changing numerics.
    xa = jnp.transpose(up, (0, 2, 3, 1)).astype(matmul_dtype)             # (N,H,W,Ca)
    xb = jnp.transpose(concat_with, (0, 2, 3, 1)).astype(matmul_dtype)    # (N,H,W,Cb)

    align = max(8, 32 // jnp.dtype(matmul_dtype).itemsize)                # bf16 -> 16
    TR = _pick_rows(H, W, max_tile_pixels, align)

    # Block 1: concat-fused WS-conv1 + GN stats.
    conv1, stats1 = _conv_concat_block(xa, xb, params["w1"], TR, matmul_dtype,
                                       vmem_limit_bytes)
    scale1, shift1 = _gn_scale_shift(stats1, params["b1"], params["g1"], params["be1"],
                                     H * W, groups, eps)

    # Block 2: (GN1 + LeakyReLU fused in) WS-conv2 + GN stats.
    conv2, stats2 = _act_conv_block(conv1, scale1, shift1, params["w2"], H, W, TR,
                                    slope, matmul_dtype, vmem_limit_bytes)
    scale2, shift2 = _gn_scale_shift(stats2, params["b2"], params["g2"], params["be2"],
                                     H * W, groups, eps)

    # Final GN2 + LeakyReLU (lane-dense elementwise kernel).
    max_rows = max(8, max_tile_pixels // max(W, 1))
    out3 = _norm_act(conv2, scale2, shift2, H, W, slope, max_rows, vmem_limit_bytes)
    return jnp.transpose(out3.reshape(N, H, W, Cout), (0, 3, 1, 2))        # -> NCHW


# ----------------------------------------------------------------------------
# Pure-JAX reference (same semantics as the PyTorch module) for validation
# ----------------------------------------------------------------------------
def _ref_block(x_nhwc, w_oihw, bias, gamma, beta, groups=8, eps=1e-5, slope=0.01):
    w = _ws_standardize(w_oihw)
    w_hwio = jnp.transpose(w, (2, 3, 1, 0))
    y = jax.lax.conv_general_dilated(
        x_nhwc.astype(jnp.float32), w_hwio, (1, 1), ((1, 1), (1, 1)),
        dimension_numbers=("NHWC", "HWIO", "NHWC"))
    y = y + bias[None, None, None, :]
    N, H, W, C = y.shape
    cg = C // groups
    yr = y.reshape(N, H, W, groups, cg)
    mean = jnp.mean(yr, axis=(1, 2, 4), keepdims=True)
    var = jnp.var(yr, axis=(1, 2, 4), keepdims=True)
    yn = (yr - mean) / jnp.sqrt(var + eps)
    yn = yn.reshape(N, H, W, C) * gamma[None, None, None, :] + beta[None, None, None, :]
    return jnp.where(yn > 0, yn, slope * yn)


def reference_forward(x, concat_with, params):
    Ho, Wo = concat_with.shape[2], concat_with.shape[3]
    up_x = bilinear_align_corners(x, Ho, Wo)
    f = jnp.transpose(jnp.concatenate([up_x, concat_with], axis=1), (0, 2, 3, 1))
    h = _ref_block(f, params["w1"], params["b1"], params["g1"], params["be1"])
    h = _ref_block(h, params["w2"], params["b2"], params["g2"], params["be2"])
    return jnp.transpose(h, (0, 3, 1, 2))


# ----------------------------------------------------------------------------
# Deterministic parameter init (shapes from UpSampleGN.__init__)
# ----------------------------------------------------------------------------
def init_params(key, skip_input, output_features):
    ks = jax.random.split(key, 8)
    s1 = 1.0 / (skip_input * 9) ** 0.5
    s2 = 1.0 / (output_features * 9) ** 0.5
    return {
        "w1": s1 * jax.random.normal(ks[0], (output_features, skip_input, 3, 3), jnp.float32),
        "b1": 0.1 * jax.random.normal(ks[1], (output_features,), jnp.float32),
        "g1": 1.0 + 0.1 * jax.random.normal(ks[2], (output_features,), jnp.float32),
        "be1": 0.1 * jax.random.normal(ks[3], (output_features,), jnp.float32),
        "w2": s2 * jax.random.normal(ks[4], (output_features, output_features, 3, 3), jnp.float32),
        "b2": 0.1 * jax.random.normal(ks[5], (output_features,), jnp.float32),
        "g2": 1.0 + 0.1 * jax.random.normal(ks[6], (output_features,), jnp.float32),
        "be2": 0.1 * jax.random.normal(ks[7], (output_features,), jnp.float32),
    }


if __name__ == "__main__":
    key = jax.random.PRNGKey(0)
    kx, kc, kp = jax.random.split(key, 3)

    # x: low-res features; concat_with: full-res skip connection (NCHW).
    x = jax.random.normal(kx, (2, 4, 8, 8), jnp.float32)
    concat_with = jax.random.normal(kc, (2, 12, 16, 16), jnp.float32)
    skip_input = x.shape[1] + concat_with.shape[1]            # 16
    output_features = 16                                      # divisible by 8 groups

    params = init_params(kp, skip_input, output_features)
    ref = reference_forward(x, concat_with, params)

    # 1) Row-tiled path (4 tiles/image -> exercises halos + cross-tile GN stats),
    #    f32 matmul operands: tight tolerance.
    f_tiled_f32 = jax.jit(functools.partial(
        upsample_gn_forward, max_tile_pixels=64, matmul_dtype=jnp.float32))
    out = jax.block_until_ready(f_tiled_f32(x, concat_with, params))
    assert out.shape == (2, output_features, 16, 16), out.shape
    err = float(jnp.max(jnp.abs(out - ref)))
    assert err < 2e-3, f"tiled f32 path: max abs err {err}"

    # 2) Row-tiled path with bf16 MXU operands (perf default): looser tolerance.
    f_tiled_bf16 = jax.jit(functools.partial(upsample_gn_forward, max_tile_pixels=64))
    out_bf = jax.block_until_ready(f_tiled_bf16(x, concat_with, params))
    err_bf = float(jnp.max(jnp.abs(out_bf - ref)))
    assert err_bf < 5e-2, f"tiled bf16 path: max abs err {err_bf}"

    # 3) Default tiling (whole image fits one tile), bf16 operands.
    out_d = jax.block_until_ready(jax.jit(upsample_gn_forward)(x, concat_with, params))
    err_d = float(jnp.max(jnp.abs(out_d - ref)))
    assert err_d < 5e-2, f"default path: max abs err {err_d}"

    print("KERNEL_OK")
</pallas_src>

<mosaic_0001>
module attributes {stable_mosaic.version = 11 : i64} {
  func.func @_concat_conv_stats_kernel(%arg0: i32, %arg1: i32, %arg2: memref<64x2xf32, #tpu.memory_space<vmem>>, %arg3: memref<1x64x4xf32, #tpu.memory_space<vmem>>, %arg4: memref<1x1x32x4xf32, #tpu.memory_space<vmem>>, %arg5: memref<1x64x12xf32, #tpu.memory_space<vmem>>, %arg6: memref<1x1x32x12xf32, #tpu.memory_space<vmem>>, %arg7: memref<36x16xf32, #tpu.memory_space<vmem>>, %arg8: memref<108x16xf32, #tpu.memory_space<vmem>>, %arg9: memref<1x64x16xf32, #tpu.memory_space<vmem>>, %arg10: memref<1x1x2x16xf32, #tpu.memory_space<vmem>>) attributes {dimension_semantics = [#tpu.dimension_semantics<parallel>, #tpu.dimension_semantics<parallel>], iteration_bounds = array<i64: 2, 4>, scalar_prefetch = 0 : i64, scratch_operands = 0 : i64, tpu.core_type = #tpu.core_type<tc>, window_params = [{pipeline_mode = #tpu.pipeline_mode<synchronous>, transform_indices = @transform_0, window_bounds = array<i64: 64, 2>}, {transform_indices = @transform_1, window_bounds = array<i64: 1, 64, 4>}, {transform_indices = @transform_2, window_bounds = array<i64: 1, 1, 32, 4>}, {transform_indices = @transform_3, window_bounds = array<i64: 1, 64, 12>}, {transform_indices = @transform_4, window_bounds = array<i64: 1, 1, 32, 12>}, {pipeline_mode = #tpu.pipeline_mode<synchronous>, transform_indices = @transform_5, window_bounds = array<i64: 36, 16>}, {pipeline_mode = #tpu.pipeline_mode<synchronous>, transform_indices = @transform_6, window_bounds = array<i64: 108, 16>}, {transform_indices = @transform_7, window_bounds = array<i64: 1, 64, 16>}, {transform_indices = @transform_8, window_bounds = array<i64: 1, 1, 2, 16>}]} {
    %c0 = arith.constant 0 : index
    %c0_0 = arith.constant 0 : index
    %0 = vector.load %arg2[%c0, %c0_0] : memref<64x2xf32, #tpu.memory_space<vmem>>, vector<64x1xf32>
    %c0_1 = arith.constant 0 : index
    %c1 = arith.constant 1 : index
    %1 = vector.load %arg2[%c0_1, %c1] : memref<64x2xf32, #tpu.memory_space<vmem>>, vector<64x1xf32>
    %c0_2 = arith.constant 0 : index
    %c0_3 = arith.constant 0 : index
    %c0_4 = arith.constant 0 : index
    %2 = vector.load %arg3[%c0_2, %c0_3, %c0_4] : memref<1x64x4xf32, #tpu.memory_space<vmem>>, vector<1x64x4xf32>
    %3 = vector.shape_cast %2 : vector<1x64x4xf32> to vector<64x4xf32>
    %c0_5 = arith.constant 0 : index
    %c0_6 = arith.constant 0 : index
    %c0_7 = arith.constant 0 : index
    %c0_8 = arith.constant 0 : index
    %4 = vector.load %arg4[%c0_5, %c0_6, %c0_7, %c0_8] : memref<1x1x32x4xf32, #tpu.memory_space<vmem>>, vector<1x1x16x4xf32>
    %5 = vector.shape_cast %4 : vector<1x1x16x4xf32> to vector<16x4xf32>
    %c0_9 = arith.constant 0 : index
    %c0_10 = arith.constant 0 : index
    %c16 = arith.constant 16 : index
    %c0_11 = arith.constant 0 : index
    %6 = vector.load %arg4[%c0_9, %c0_10, %c16, %c0_11] : memref<1x1x32x4xf32, #tpu.memory_space<vmem>>, vector<1x1x16x4xf32>
    %7 = vector.shape_cast %6 : vector<1x1x16x4xf32> to vector<16x4xf32>
    %cst = arith.constant 0.000000e+00 : f32
    %8 = vector.broadcast %cst : f32 to vector<1x4xf32>
    %9 = tpu.concatenate %8, %5, %3, %7, %8 in 0 : vector<1x4xf32>, vector<16x4xf32>, vector<64x4xf32>, vector<16x4xf32>, vector<1x4xf32> -> vector<98x4xf32>
    %c0_12 = arith.constant 0 : index
    %c0_13 = arith.constant 0 : index
    %c0_14 = arith.constant 0 : index
    %10 = vector.load %arg5[%c0_12, %c0_13, %c0_14] : memref<1x64x12xf32, #tpu.memory_space<vmem>>, vector<1x64x12xf32>
    %11 = vector.shape_cast %10 : vector<1x64x12xf32> to vector<64x12xf32>
    %c0_15 = arith.constant 0 : index
    %c0_16 = arith.constant 0 : index
    %c0_17 = arith.constant 0 : index
    %c0_18 = arith.constant 0 : index
    %12 = vector.load %arg6[%c0_15, %c0_16, %c0_17, %c0_18] : memref<1x1x32x12xf32, #tpu.memory_space<vmem>>, vector<1x1x16x12xf32>
    %13 = vector.shape_cast %12 : vector<1x1x16x12xf32> to vector<16x12xf32>
    %c0_19 = arith.constant 0 : index
    %c0_20 = arith.constant 0 : index
    %c16_21 = arith.constant 16 : index
    %c0_22 = arith.constant 0 : index
    %14 = vector.load %arg6[%c0_19, %c0_20, %c16_21, %c0_22] : memref<1x1x32x12xf32, #tpu.memory_space<vmem>>, vector<1x1x16x12xf32>
    %15 = vector.shape_cast %14 : vector<1x1x16x12xf32> to vector<16x12xf32>
    %cst_23 = arith.constant 0.000000e+00 : f32
    %16 = vector.broadcast %cst_23 : f32 to vector<1x12xf32>
    %17 = tpu.concatenate %16, %13, %11, %15, %16 in 0 : vector<1x12xf32>, vector<16x12xf32>, vector<64x12xf32>, vector<16x12xf32>, vector<1x12xf32> -> vector<98x12xf32>
    %c0_24 = arith.constant 0 : index
    %c0_25 = arith.constant 0 : index
    %18 = vector.load %arg7[%c0_24, %c0_25] : memref<36x16xf32, #tpu.memory_space<vmem>>, vector<36x16xf32>
    %19 = vector.extract_strided_slice %9 {offsets = [0, 0], sizes = [64, 4], strides = [1, 1]} : vector<98x4xf32> to vector<64x4xf32>
    %20 = vector.broadcast %0 : vector<64x1xf32> to vector<64x4xf32>
    %21 = arith.mulf %19, %20 : vector<64x4xf32>
    %22 = vector.extract_strided_slice %9 {offsets = [1, 0], sizes = [64, 4], strides = [1, 1]} : vector<98x4xf32> to vector<64x4xf32>
    %23 = vector.extract_strided_slice %9 {offsets = [2, 0], sizes = [64, 4], strides = [1, 1]} : vector<98x4xf32> to vector<64x4xf32>
    %24 = vector.broadcast %1 : vector<64x1xf32> to vector<64x4xf32>
    %25 = arith.mulf %23, %24 : vector<64x4xf32>
    %26 = vector.extract_strided_slice %9 {offsets = [16, 0], sizes = [64, 4], strides = [1, 1]} : vector<98x4xf32> to vector<64x4xf32>
    %27 = vector.broadcast %0 : vector<64x1xf32> to vector<64x4xf32>
    %28 = arith.mulf %26, %27 : vector<64x4xf32>
    %29 = vector.extract_strided_slice %9 {offsets = [17, 0], sizes = [64, 4], strides = [1, 1]} : vector<98x4xf32> to vector<64x4xf32>
    %30 = vector.extract_strided_slice %9 {offsets = [18, 0], sizes = [64, 4], strides = [1, 1]} : vector<98x4xf32> to vector<64x4xf32>
    %31 = vector.broadcast %1 : vector<64x1xf32> to vector<64x4xf32>
    %32 = arith.mulf %30, %31 : vector<64x4xf32>
    %33 = vector.extract_strided_slice %9 {offsets = [32, 0], sizes = [64, 4], strides = [1, 1]} : vector<98x4xf32> to vector<64x4xf32>
    %34 = vector.broadcast %0 : vector<64x1xf32> to vector<64x4xf32>
    %35 = arith.mulf %33, %34 : vector<64x4xf32>
    %36 = vector.extract_strided_slice %9 {offsets = [33, 0], sizes = [64, 4], strides = [1, 1]} : vector<98x4xf32> to vector<64x4xf32>
    %37 = vector.extract_strided_slice %9 {offsets = [34, 0], sizes = [64, 4], strides = [1, 1]} : vector<98x4xf32> to vector<64x4xf32>
    %38 = vector.broadcast %1 : vector<64x1xf32> to vector<64x4xf32>
    %39 = arith.mulf %37, %38 : vector<64x4xf32>
    %40 = tpu.concatenate %21, %22, %25, %28, %29, %32, %35, %36, %39 in 1 : vector<64x4xf32>, vector<64x4xf32>, vector<64x4xf32>, vector<64x4xf32>, vector<64x4xf32>, vector<64x4xf32>, vector<64x4xf32>, vector<64x4xf32>, vector<64x4xf32> -> vector<64x36xf32>
    %cst_26 = arith.constant dense<0.000000e+00> : vector<64x16xf32>
    %41 = tpu.matmul %40, %18, %cst_26 {dimension_numbers = #tpu.dot_dimension_numbers<[1], [0], [0], [1], [0, 0, 1, 1], [], []>} : vector<64x36xf32>, vector<36x16xf32>, vector<64x16xf32> -> vector<64x16xf32>
    %c0_27 = arith.constant 0 : index
    %c0_28 = arith.constant 0 : index
    %42 = vector.load %arg8[%c0_27, %c0_28] : memref<108x16xf32, #tpu.memory_space<vmem>>, vector<108x16xf32>
    %43 = vector.extract_strided_slice %17 {offsets = [0, 0], sizes = [64, 12], strides = [1, 1]} : vector<98x12xf32> to vector<64x12xf32>
    %44 = vector.broadcast %0 : vector<64x1xf32> to vector<64x12xf32>
    %45 = arith.mulf %43, %44 : vector<64x12xf32>
    %46 = vector.extract_strided_slice %17 {offsets = [1, 0], sizes = [64, 12], strides = [1, 1]} : vector<98x12xf32> to vector<64x12xf32>
    %47 = vector.extract_strided_slice %17 {offsets = [2, 0], sizes = [64, 12], strides = [1, 1]} : vector<98x12xf32> to vector<64x12xf32>
    %48 = vector.broadcast %1 : vector<64x1xf32> to vector<64x12xf32>
    %49 = arith.mulf %47, %48 : vector<64x12xf32>
    %50 = vector.extract_strided_slice %17 {offsets = [16, 0], sizes = [64, 12], strides = [1, 1]} : vector<98x12xf32> to vector<64x12xf32>
    %51 = vector.broadcast %0 : vector<64x1xf32> to vector<64x12xf32>
    %52 = arith.mulf %50, %51 : vector<64x12xf32>
    %53 = vector.extract_strided_slice %17 {offsets = [17, 0], sizes = [64, 12], strides = [1, 1]} : vector<98x12xf32> to vector<64x12xf32>
    %54 = vector.extract_strided_slice %17 {offsets = [18, 0], sizes = [64, 12], strides = [1, 1]} : vector<98x12xf32> to vector<64x12xf32>
    %55 = vector.broadcast %1 : vector<64x1xf32> to vector<64x12xf32>
    %56 = arith.mulf %54, %55 : vector<64x12xf32>
    %57 = vector.extract_strided_slice %17 {offsets = [32, 0], sizes = [64, 12], strides = [1, 1]} : vector<98x12xf32> to vector<64x12xf32>
    %58 = vector.broadcast %0 : vector<64x1xf32> to vector<64x12xf32>
    %59 = arith.mulf %57, %58 : vector<64x12xf32>
    %60 = vector.extract_strided_slice %17 {offsets = [33, 0], sizes = [64, 12], strides = [1, 1]} : vector<98x12xf32> to vector<64x12xf32>
    %61 = vector.extract_strided_slice %17 {offsets = [34, 0], sizes = [64, 12], strides = [1, 1]} : vector<98x12xf32> to vector<64x12xf32>
    %62 = vector.broadcast %1 : vector<64x1xf32> to vector<64x12xf32>
    %63 = arith.mulf %61, %62 : vector<64x12xf32>
    %64 = tpu.concatenate %45, %46, %49, %52, %53, %56, %59, %60, %63 in 1 : vector<64x12xf32>, vector<64x12xf32>, vector<64x12xf32>, vector<64x12xf32>, vector<64x12xf32>, vector<64x12xf32>, vector<64x12xf32>, vector<64x12xf32>, vector<64x12xf32> -> vector<64x108xf32>
    %cst_29 = arith.constant dense<0.000000e+00> : vector<64x16xf32>
    %65 = tpu.matmul %64, %42, %cst_29 {dimension_numbers = #tpu.dot_dimension_numbers<[1], [0], [0], [1], [0, 0, 1, 1], [], []>} : vector<64x108xf32>, vector<108x16xf32>, vector<64x16xf32> -> vector<64x16xf32>
    %66 = arith.addf %41, %65 : vector<64x16xf32>
    %c0_30 = arith.constant 0 : index
    %c0_31 = arith.constant 0 : index
    %c0_32 = arith.constant 0 : index
    %67 = vector.load %arg9[%c0_30, %c0_31, %c0_32] : memref<1x64x16xf32, #tpu.memory_space<vmem>>, vector<1x64x16xf32>
    %68 = vector.shape_cast %67 : vector<1x64x16xf32> to vector<64x16xf32>
    %69 = vector.shape_cast %66 : vector<64x16xf32> to vector<1x64x16xf32>
    tpu.vector_store %arg9[%c0_30, %c0_31, %c0_32], %69 {strides = array<i32>} : memref<1x64x16xf32, #tpu.memory_space<vmem>>, vector<1x64x16xf32>,
    %cst_33 = arith.constant dense<0.000000e+00> : vector<16xf32>
    %70 = vector.multi_reduction <add>, %66, %cst_33 [0] : vector<64x16xf32> to vector<16xf32>
    %71 = vector.shape_cast %70 : vector<16xf32> to vector<1x16xf32>
    %72 = arith.mulf %66, %66 : vector<64x16xf32>
    %cst_34 = arith.constant dense<0.000000e+00> : vector<16xf32>
    %73 = vector.multi_reduction <add>, %72, %cst_34 [0] : vector<64x16xf32> to vector<16xf32>
    %74 = vector.shape_cast %73 : vector<16xf32> to vector<1x16xf32>
    %75 = tpu.concatenate %71, %74 in 0 : vector<1x16xf32>, vector<1x16xf32> -> vector<2x16xf32>
    %c0_35 = arith.constant 0 : index
    %c0_36 = arith.constant 0 : index
    %c0_37 = arith.constant 0 : index
    %c0_38 = arith.constant 0 : index
    %76 = vector.load %arg10[%c0_35, %c0_36, %c0_37, %c0_38] : memref<1x1x2x16xf32, #tpu.memory_space<vmem>>, vector<1x1x2x16xf32>
    %77 = vector.shape_cast %76 : vector<1x1x2x16xf32> to vector<2x16xf32>
    %78 = vector.shape_cast %75 : vector<2x16xf32> to vector<1x1x2x16xf32>
    tpu.vector_store %arg10[%c0_35, %c0_36, %c0_37, %c0_38], %78 {strides = array<i32>} : memref<1x1x2x16xf32, #tpu.memory_space<vmem>>, vector<1x1x2x16xf32>,
    return
  }
  func.func @transform_0(%arg0: i32, %arg1: i32) -> (i32, i32) {
    %c0_i32 = arith.constant 0 : i32
    %c0_i32_0 = arith.constant 0 : i32
    %c0_i32_1 = arith.constant 0 : i32
    return %c0_i32, %c0_i32_0 : i32, i32
  }
  func.func @transform_1(%arg0: i32, %arg1: i32) -> (i32, i32, i32) {
    %c0_i32 = arith.constant 0 : i32
    %c0_i32_0 = arith.constant 0 : i32
    return %arg0, %arg1, %c0_i32 : i32, i32, i32
  }
  func.func @transform_2(%arg0: i32, %arg1: i32) -> (i32, i32, i32, i32) {
    %c0_i32 = arith.constant 0 : i32
    %c0_i32_0 = arith.constant 0 : i32
    %c0_i32_1 = arith.constant 0 : i32
    return %arg0, %arg1, %c0_i32, %c0_i32_0 : i32, i32, i32, i32
  }
  func.func @transform_3(%arg0: i32, %arg1: i32) -> (i32, i32, i32) {
    %c0_i32 = arith.constant 0 : i32
    %c0_i32_0 = arith.constant 0 : i32
    return %arg0, %arg1, %c0_i32 : i32, i32, i32
  }
  func.func @transform_4(%arg0: i32, %arg1: i32) -> (i32, i32, i32, i32) {
    %c0_i32 = arith.constant 0 : i32
    %c0_i32_0 = arith.constant 0 : i32
    %c0_i32_1 = arith.constant 0 : i32
    return %arg0, %arg1, %c0_i32, %c0_i32_0 : i32, i32, i32, i32
  }
  func.func @transform_5(%arg0: i32, %arg1: i32) -> (i32, i32) {
    %c0_i32 = arith.constant 0 : i32
    %c0_i32_0 = arith.constant 0 : i32
    %c0_i32_1 = arith.constant 0 : i32
    return %c0_i32, %c0_i32_0 : i32, i32
  }
  func.func @transform_6(%arg0: i32, %arg1: i32) -> (i32, i32) {
    %c0_i32 = arith.constant 0 : i32
    %c0_i32_0 = arith.constant 0 : i32
    %c0_i32_1 = arith.constant 0 : i32
    return %c0_i32, %c0_i32_0 : i32, i32
  }
  func.func @transform_7(%arg0: i32, %arg1: i32) -> (i32, i32, i32) {
    %c0_i32 = arith.constant 0 : i32
    %c0_i32_0 = arith.constant 0 : i32
    return %arg0, %arg1, %c0_i32 : i32, i32, i32
  }
  func.func @transform_8(%arg0: i32, %arg1: i32) -> (i32, i32, i32, i32) {
    %c0_i32 = arith.constant 0 : i32
    %c0_i32_0 = arith.constant 0 : i32
    %c0_i32_1 = arith.constant 0 : i32
    return %arg0, %arg1, %c0_i32, %c0_i32_0 : i32, i32, i32, i32
  }
}

module attributes {stable_mosaic.version = 11 : i64} {
  func.func @_act_conv_stats_kernel(%arg0: i32, %arg1: i32, %arg2: memref<64x2xf32, #tpu.memory_space<vmem>>, %arg3: memref<1x64x16xf32, #tpu.memory_space<vmem>>, %arg4: memref<1x1x32x16xf32, #tpu.memory_space<vmem>>, %arg5: memref<1x1x16xf32, #tpu.memory_space<vmem>>, %arg6: memref<1x1x16xf32, #tpu.memory_space<vmem>>, %arg7: memref<144x16xf32, #tpu.memory_space<vmem>>, %arg8: memref<1x64x16xf32, #tpu.memory_space<vmem>>, %arg9: memref<1x1x2x16xf32, #tpu.memory_space<vmem>>) attributes {dimension_semantics = [#tpu.dimension_semantics<parallel>, #tpu.dimension_semantics<parallel>], iteration_bounds = array<i64: 2, 4>, scalar_prefetch = 0 : i64, scratch_operands = 0 : i64, tpu.core_type = #tpu.core_type<tc>, window_params = [{pipeline_mode = #tpu.pipeline_mode<synchronous>, transform_indices = @transform_0, window_bounds = array<i64: 64, 2>}, {transform_indices = @transform_1, window_bounds = array<i64: 1, 64, 16>}, {transform_indices = @transform_2, window_bounds = array<i64: 1, 1, 32, 16>}, {transform_indices = @transform_3, window_bounds = array<i64: 1, 1, 16>}, {transform_indices = @transform_4, window_bounds = array<i64: 1, 1, 16>}, {pipeline_mode = #tpu.pipeline_mode<synchronous>, transform_indices = @transform_5, window_bounds = array<i64: 144, 16>}, {transform_indices = @transform_6, window_bounds = array<i64: 1, 64, 16>}, {transform_indices = @transform_7, window_bounds = array<i64: 1, 1, 2, 16>}]} {
    %c0 = arith.constant 0 : index
    %c0_0 = arith.constant 0 : index
    %c0_1 = arith.constant 0 : index
    %0 = vector.load %arg5[%c0, %c0_0, %c0_1] : memref<1x1x16xf32, #tpu.memory_space<vmem>>, vector<1x1x16xf32>
    %1 = vector.shape_cast %0 : vector<1x1x16xf32> to vector<1x16xf32>
    %c0_2 = arith.constant 0 : index
    %c0_3 = arith.constant 0 : index
    %c0_4 = arith.constant 0 : index
    %2 = vector.load %arg6[%c0_2, %c0_3, %c0_4] : memref<1x1x16xf32, #tpu.memory_space<vmem>>, vector<1x1x16xf32>
    %3 = vector.shape_cast %2 : vector<1x1x16xf32> to vector<1x16xf32>
    %c0_5 = arith.constant 0 : index
    %c0_6 = arith.constant 0 : index
    %c0_7 = arith.constant 0 : index
    %4 = vector.load %arg3[%c0_5, %c0_6, %c0_7] : memref<1x64x16xf32, #tpu.memory_space<vmem>>, vector<1x64x16xf32>
    %5 = vector.shape_cast %4 : vector<1x64x16xf32> to vector<64x16xf32>
    %6 = vector.broadcast %1 : vector<1x16xf32> to vector<64x16xf32>
    %7 = arith.mulf %5, %6 : vector<64x16xf32>
    %8 = vector.broadcast %3 : vector<1x16xf32> to vector<64x16xf32>
    %9 = arith.addf %7, %8 : vector<64x16xf32>
    %cst = arith.constant 0.000000e+00 : f32
    %10 = vector.broadcast %cst : f32 to vector<64x16xf32>
    %11 = arith.cmpf ogt, %9, %10 : vector<64x16xf32>
    %cst_8 = arith.constant 0.00999999977 : f32
    %12 = vector.broadcast %cst_8 : f32 to vector<64x16xf32>
    %13 = arith.mulf %12, %9 : vector<64x16xf32>
    %14 = arith.select %11, %9, %13 : vector<64x16xi1>, vector<64x16xf32>
    %c0_9 = arith.constant 0 : index
    %c0_10 = arith.constant 0 : index
    %c0_11 = arith.constant 0 : index
    %c0_12 = arith.constant 0 : index
    %15 = vector.load %arg4[%c0_9, %c0_10, %c0_11, %c0_12] : memref<1x1x32x16xf32, #tpu.memory_space<vmem>>, vector<1x1x32x16xf32>
    %16 = vector.shape_cast %15 : vector<1x1x32x16xf32> to vector<32x16xf32>
    %17 = vector.broadcast %1 : vector<1x16xf32> to vector<32x16xf32>
    %18 = arith.mulf %16, %17 : vector<32x16xf32>
    %19 = vector.broadcast %3 : vector<1x16xf32> to vector<32x16xf32>
    %20 = arith.addf %18, %19 : vector<32x16xf32>
    %cst_13 = arith.constant 0.000000e+00 : f32
    %21 = vector.broadcast %cst_13 : f32 to vector<32x16xf32>
    %22 = arith.cmpf ogt, %20, %21 : vector<32x16xf32>
    %cst_14 = arith.constant 0.00999999977 : f32
    %23 = vector.broadcast %cst_14 : f32 to vector<32x16xf32>
    %24 = arith.mulf %23, %20 : vector<32x16xf32>
    %25 = arith.select %22, %20, %24 : vector<32x16xi1>, vector<32x16xf32>
    %26 = vector.extract_strided_slice %25 {offsets = [0, 0], sizes = [16, 16], strides = [1, 1]} : vector<32x16xf32> to vector<16x16xf32>
    %c0_i32 = arith.constant 0 : i32
    %27 = arith.cmpi sgt, %arg1, %c0_i32 : i32
    %28 = arith.extui %27 : i1 to i32
    %29 = arith.sitofp %28 : i32 to f32
    %30 = vector.broadcast %29 : f32 to vector<16x16xf32>
    %31 = arith.mulf %26, %30 : vector<16x16xf32>
    %32 = vector.extract_strided_slice %25 {offsets = [16, 0], sizes = [16, 16], strides = [1, 1]} : vector<32x16xf32> to vector<16x16xf32>
    %c3_i32 = arith.constant 3 : i32
    %33 = arith.cmpi slt, %arg1, %c3_i32 : i32
    %34 = arith.extui %33 : i1 to i32
    %35 = arith.sitofp %34 : i32 to f32
    %36 = vector.broadcast %35 : f32 to vector<16x16xf32>
    %37 = arith.mulf %32, %36 : vector<16x16xf32>
    %cst_15 = arith.constant 0.000000e+00 : f32
    %38 = vector.broadcast %cst_15 : f32 to vector<1x16xf32>
    %39 = tpu.concatenate %38, %31, %14, %37, %38 in 0 : vector<1x16xf32>, vector<16x16xf32>, vector<64x16xf32>, vector<16x16xf32>, vector<1x16xf32> -> vector<98x16xf32>
    %c0_16 = arith.constant 0 : index
    %c0_17 = arith.constant 0 : index
    %40 = vector.load %arg7[%c0_16, %c0_17] : memref<144x16xf32, #tpu.memory_space<vmem>>, vector<144x16xf32>
    %c0_18 = arith.constant 0 : index
    %c0_19 = arith.constant 0 : index
    %41 = vector.load %arg2[%c0_18, %c0_19] : memref<64x2xf32, #tpu.memory_space<vmem>>, vector<64x1xf32>
    %c0_20 = arith.constant 0 : index
    %c1 = arith.constant 1 : index
    %42 = vector.load %arg2[%c0_20, %c1] : memref<64x2xf32, #tpu.memory_space<vmem>>, vector<64x1xf32>
    %43 = vector.extract_strided_slice %39 {offsets = [0, 0], sizes = [64, 16], strides = [1, 1]} : vector<98x16xf32> to vector<64x16xf32>
    %44 = vector.broadcast %41 : vector<64x1xf32> to vector<64x16xf32>
    %45 = arith.mulf %43, %44 : vector<64x16xf32>
    %46 = vector.extract_strided_slice %39 {offsets = [1, 0], sizes = [64, 16], strides = [1, 1]} : vector<98x16xf32> to vector<64x16xf32>
    %47 = vector.extract_strided_slice %39 {offsets = [2, 0], sizes = [64, 16], strides = [1, 1]} : vector<98x16xf32> to vector<64x16xf32>
    %48 = vector.broadcast %42 : vector<64x1xf32> to vector<64x16xf32>
    %49 = arith.mulf %47, %48 : vector<64x16xf32>
    %50 = vector.extract_strided_slice %39 {offsets = [16, 0], sizes = [64, 16], strides = [1, 1]} : vector<98x16xf32> to vector<64x16xf32>
    %51 = vector.broadcast %41 : vector<64x1xf32> to vector<64x16xf32>
    %52 = arith.mulf %50, %51 : vector<64x16xf32>
    %53 = vector.extract_strided_slice %39 {offsets = [17, 0], sizes = [64, 16], strides = [1, 1]} : vector<98x16xf32> to vector<64x16xf32>
    %54 = vector.extract_strided_slice %39 {offsets = [18, 0], sizes = [64, 16], strides = [1, 1]} : vector<98x16xf32> to vector<64x16xf32>
    %55 = vector.broadcast %42 : vector<64x1xf32> to vector<64x16xf32>
    %56 = arith.mulf %54, %55 : vector<64x16xf32>
    %57 = vector.extract_strided_slice %39 {offsets = [32, 0], sizes = [64, 16], strides = [1, 1]} : vector<98x16xf32> to vector<64x16xf32>
    %58 = vector.broadcast %41 : vector<64x1xf32> to vector<64x16xf32>
    %59 = arith.mulf %57, %58 : vector<64x16xf32>
    %60 = vector.extract_strided_slice %39 {offsets = [33, 0], sizes = [64, 16], strides = [1, 1]} : vector<98x16xf32> to vector<64x16xf32>
    %61 = vector.extract_strided_slice %39 {offsets = [34, 0], sizes = [64, 16], strides = [1, 1]} : vector<98x16xf32> to vector<64x16xf32>
    %62 = vector.broadcast %42 : vector<64x1xf32> to vector<64x16xf32>
    %63 = arith.mulf %61, %62 : vector<64x16xf32>
    %64 = tpu.concatenate %45, %46, %49, %52, %53, %56, %59, %60, %63 in 1 : vector<64x16xf32>, vector<64x16xf32>, vector<64x16xf32>, vector<64x16xf32>, vector<64x16xf32>, vector<64x16xf32>, vector<64x16xf32>, vector<64x16xf32>, vector<64x16xf32> -> vector<64x144xf32>
    %cst_21 = arith.constant dense<0.000000e+00> : vector<64x16xf32>
    %65 = tpu.matmul %64, %40, %cst_21 {dimension_numbers = #tpu.dot_dimension_numbers<[1], [0], [0], [1], [0, 0, 1, 1], [], []>} : vector<64x144xf32>, vector<144x16xf32>, vector<64x16xf32> -> vector<64x16xf32>
    %c0_22 = arith.constant 0 : index
    %c0_23 = arith.constant 0 : index
    %c0_24 = arith.constant 0 : index
    %66 = vector.load %arg8[%c0_22, %c0_23, %c0_24] : memref<1x64x16xf32, #tpu.memory_space<vmem>>, vector<1x64x16xf32>
    %67 = vector.shape_cast %66 : vector<1x64x16xf32> to vector<64x16xf32>
    %68 = vector.shape_cast %65 : vector<64x16xf32> to vector<1x64x16xf32>
    tpu.vector_store %arg8[%c0_22, %c0_23, %c0_24], %68 {strides = array<i32>} : memref<1x64x16xf32, #tpu.memory_space<vmem>>, vector<1x64x16xf32>,
    %cst_25 = arith.constant dense<0.000000e+00> : vector<16xf32>
    %69 = vector.multi_reduction <add>, %65, %cst_25 [0] : vector<64x16xf32> to vector<16xf32>
    %70 = vector.shape_cast %69 : vector<16xf32> to vector<1x16xf32>
    %71 = arith.mulf %65, %65 : vector<64x16xf32>
    %cst_26 = arith.constant dense<0.000000e+00> : vector<16xf32>
    %72 = vector.multi_reduction <add>, %71, %cst_26 [0] : vector<64x16xf32> to vector<16xf32>
    %73 = vector.shape_cast %72 : vector<16xf32> to vector<1x16xf32>
    %74 = tpu.concatenate %70, %73 in 0 : vector<1x16xf32>, vector<1x16xf32> -> vector<2x16xf32>
    %c0_27 = arith.constant 0 : index
    %c0_28 = arith.constant 0 : index
    %c0_29 = arith.constant 0 : index
    %c0_30 = arith.constant 0 : index
    %75 = vector.load %arg9[%c0_27, %c0_28, %c0_29, %c0_30] : memref<1x1x2x16xf32, #tpu.memory_space<vmem>>, vector<1x1x2x16xf32>
    %76 = vector.shape_cast %75 : vector<1x1x2x16xf32> to vector<2x16xf32>
    %77 = vector.shape_cast %74 : vector<2x16xf32> to vector<1x1x2x16xf32>
    tpu.vector_store %arg9[%c0_27, %c0_28, %c0_29, %c0_30], %77 {strides = array<i32>} : memref<1x1x2x16xf32, #tpu.memory_space<vmem>>, vector<1x1x2x16xf32>,
    return
  }
  func.func @transform_0(%arg0: i32, %arg1: i32) -> (i32, i32) {
    %c0_i32 = arith.constant 0 : i32
    %c0_i32_0 = arith.constant 0 : i32
    %c0_i32_1 = arith.constant 0 : i32
    return %c0_i32, %c0_i32_0 : i32, i32
  }
  func.func @transform_1(%arg0: i32, %arg1: i32) -> (i32, i32, i32) {
    %c0_i32 = arith.constant 0 : i32
    %c0_i32_0 = arith.constant 0 : i32
    return %arg0, %arg1, %c0_i32 : i32, i32, i32
  }
  func.func @transform_2(%arg0: i32, %arg1: i32) -> (i32, i32, i32, i32) {
    %c0_i32 = arith.constant 0 : i32
    %c0_i32_0 = arith.constant 0 : i32
    %c0_i32_1 = arith.constant 0 : i32
    return %arg0, %arg1, %c0_i32, %c0_i32_0 : i32, i32, i32, i32
  }
  func.func @transform_3(%arg0: i32, %arg1: i32) -> (i32, i32, i32) {
    %c0_i32 = arith.constant 0 : i32
    %c0_i32_0 = arith.constant 0 : i32
    %c0_i32_1 = arith.constant 0 : i32
    return %arg0, %c0_i32, %c0_i32_0 : i32, i32, i32
  }
  func.func @transform_4(%arg0: i32, %arg1: i32) -> (i32, i32, i32) {
    %c0_i32 = arith.constant 0 : i32
    %c0_i32_0 = arith.constant 0 : i32
    %c0_i32_1 = arith.constant 0 : i32
    return %arg0, %c0_i32, %c0_i32_0 : i32, i32, i32
  }
  func.func @transform_5(%arg0: i32, %arg1: i32) -> (i32, i32) {
    %c0_i32 = arith.constant 0 : i32
    %c0_i32_0 = arith.constant 0 : i32
    %c0_i32_1 = arith.constant 0 : i32
    return %c0_i32, %c0_i32_0 : i32, i32
  }
  func.func @transform_6(%arg0: i32, %arg1: i32) -> (i32, i32, i32) {
    %c0_i32 = arith.constant 0 : i32
    %c0_i32_0 = arith.constant 0 : i32
    return %arg0, %arg1, %c0_i32 : i32, i32, i32
  }
  func.func @transform_7(%arg0: i32, %arg1: i32) -> (i32, i32, i32, i32) {
    %c0_i32 = arith.constant 0 : i32
    %c0_i32_0 = arith.constant 0 : i32
    %c0_i32_1 = arith.constant 0 : i32
    return %arg0, %arg1, %c0_i32, %c0_i32_0 : i32, i32, i32, i32
  }
}

module attributes {stable_mosaic.version = 11 : i64} {
  func.func @_norm_act_kernel(%arg0: i32, %arg1: i32, %arg2: memref<1x8x256xf32, #tpu.memory_space<vmem>>, %arg3: memref<1x1x256xf32, #tpu.memory_space<vmem>>, %arg4: memref<1x1x256xf32, #tpu.memory_space<vmem>>, %arg5: memref<1x8x256xf32, #tpu.memory_space<vmem>>) attributes {dimension_semantics = [#tpu.dimension_semantics<parallel>, #tpu.dimension_semantics<parallel>], iteration_bounds = array<i64: 2, 2>, scalar_prefetch = 0 : i64, scratch_operands = 0 : i64, tpu.core_type = #tpu.core_type<tc>, window_params = [{transform_indices = @transform_0, window_bounds = array<i64: 1, 8, 256>}, {transform_indices = @transform_1, window_bounds = array<i64: 1, 1, 256>}, {transform_indices = @transform_2, window_bounds = array<i64: 1, 1, 256>}, {transform_indices = @transform_3, window_bounds = array<i64: 1, 8, 256>}]} {
    %c0 = arith.constant 0 : index
    %c0_0 = arith.constant 0 : index
    %c0_1 = arith.constant 0 : index
    %0 = vector.load %arg2[%c0, %c0_0, %c0_1] : memref<1x8x256xf32, #tpu.memory_space<vmem>>, vector<1x8x256xf32>
    %1 = vector.shape_cast %0 : vector<1x8x256xf32> to vector<8x256xf32>
    %c0_2 = arith.constant 0 : index
    %c0_3 = arith.constant 0 : index
    %c0_4 = arith.constant 0 : index
    %2 = vector.load %arg3[%c0_2, %c0_3, %c0_4] : memref<1x1x256xf32, #tpu.memory_space<vmem>>, vector<1x1x256xf32>
    %3 = vector.shape_cast %2 : vector<1x1x256xf32> to vector<1x256xf32>
    %4 = vector.broadcast %3 : vector<1x256xf32> to vector<8x256xf32>
    %5 = arith.mulf %1, %4 : vector<8x256xf32>
    %c0_5 = arith.constant 0 : index
    %c0_6 = arith.constant 0 : index
    %c0_7 = arith.constant 0 : index
    %6 = vector.load %arg4[%c0_5, %c0_6, %c0_7] : memref<1x1x256xf32, #tpu.memory_space<vmem>>, vector<1x1x256xf32>
    %7 = vector.shape_cast %6 : vector<1x1x256xf32> to vector<1x256xf32>
    %8 = vector.broadcast %7 : vector<1x256xf32> to vector<8x256xf32>
    %9 = arith.addf %5, %8 : vector<8x256xf32>
    %cst = arith.constant 0.000000e+00 : f32
    %10 = vector.broadcast %cst : f32 to vector<8x256xf32>
    %11 = arith.cmpf ogt, %9, %10 : vector<8x256xf32>
    %cst_8 = arith.constant 0.00999999977 : f32
    %12 = vector.broadcast %cst_8 : f32 to vector<8x256xf32>
    %13 = arith.mulf %12, %9 : vector<8x256xf32>
    %14 = arith.select %11, %9, %13 : vector<8x256xi1>, vector<8x256xf32>
    %c0_9 = arith.constant 0 : index
    %c0_10 = arith.constant 0 : index
    %c0_11 = arith.constant 0 : index
    %15 = vector.load %arg5[%c0_9, %c0_10, %c0_11] : memref<1x8x256xf32, #tpu.memory_space<vmem>>, vector<1x8x256xf32>
    %16 = vector.shape_cast %15 : vector<1x8x256xf32> to vector<8x256xf32>
    %17 = vector.shape_cast %14 : vector<8x256xf32> to vector<1x8x256xf32>
    tpu.vector_store %arg5[%c0_9, %c0_10, %c0_11], %17 {strides = array<i32>} : memref<1x8x256xf32, #tpu.memory_space<vmem>>, vector<1x8x256xf32>,
    return
  }
  func.func @transform_0(%arg0: i32, %arg1: i32) -> (i32, i32, i32) {
    %c0_i32 = arith.constant 0 : i32
    %c0_i32_0 = arith.constant 0 : i32
    return %arg0, %arg1, %c0_i32 : i32, i32, i32
  }
  func.func @transform_1(%arg0: i32, %arg1: i32) -> (i32, i32, i32) {
    %c0_i32 = arith.constant 0 : i32
    %c0_i32_0 = arith.constant 0 : i32
    %c0_i32_1 = arith.constant 0 : i32
    return %arg0, %c0_i32, %c0_i32_0 : i32, i32, i32
  }
  func.func @transform_2(%arg0: i32, %arg1: i32) -> (i32, i32, i32) {
    %c0_i32 = arith.constant 0 : i32
    %c0_i32_0 = arith.constant 0 : i32
    %c0_i32_1 = arith.constant 0 : i32
    return %arg0, %c0_i32, %c0_i32_0 : i32, i32, i32
  }
  func.func @transform_3(%arg0: i32, %arg1: i32) -> (i32, i32, i32) {
    %c0_i32 = arith.constant 0 : i32
    %c0_i32_0 = arith.constant 0 : i32
    return %arg0, %arg1, %c0_i32 : i32, i32, i32
  }
}

</mosaic_0001>

<bundles_post_ra>
// kernel: upsample_gn_forward.5
= control target key start
LH: loop header
LB: loop body
LE: loop exit
PB: predicated region body
PF: predicated region fallthrough
CT: control target
= control target key end

     0   :  { %s513_s12 = smov 0   ;;  %s515_s13 = smov 0   ;;  %s570_s0 = inlined_call_operand.vmem [shape: f32[2,16,256], index: 0, kind: input, shape index: {}]   ;;  %s571_s1 = inlined_call_operand.vmem [shape: f32[2,1,256], index: 1, kind: input, shape index: {}]   ;;  %s572_s2 = inlined_call_operand.vmem [shape: f32[2,1,256], index: 2, kind: input, shape index: {}]   ;;  %s573_s3 = inlined_call_operand.vmem [shape: f32[2,16,256], index: 3, kind: output, shape index: {}]  }
   0x1   :  { %s517_s14 = smov 0   ;;  %s519_s15 = smov 0  }
   0x2   :  { %s521_s16 = smov 0  }
   0x3 LB: > { %s22_s17 = sadd.s32 1, %s483_s14  ;;  %s25_s18 = sadd.s32 1, %s487_s15  ;;  %s491_s16 = sphi %s521_s16, %s13_s16   ;;  %s487_s15 = sphi %s519_s15, %s577_s15   ;;  %s483_s14 = sphi %s517_s14, %s576_s14   ;;  %s479_s13 = sphi %s515_s13, %s575_s13   ;;  %s475_s12 = sphi %s513_s12, %s574_s12  }
   0x4   : > { %p23_p0 = scmp.ge.s32.totalorder %s22_s17, 2  ;;  %p402_p1 = scmp.ge.s32.totalorder %s491_s16, 1 }
   0x5   : > { %p175_p2 = scmp.lt.s32.totalorder %s491_s16, 5 }
   0x6   : > { %s579_s17 = smov (%p23_p0, %s22_s17), 0  ;;  %s581_s18 = smov (!%p23_p0, %s25_s18), %s487_s15 }
   0x7   : > { %p176_p3 = pnand %p402_p1, %p175_p2  ;;  %p27_p4 = scmp.ge.s32.totalorder %s581_s18, 2 }
   0x8   : > { %p215_p5 = scmp.lt.s32.totalorder (!%p176_p3), %s479_s13, 1  ;;  %p217_p6 = scmp.lt.s32.totalorder (!%p176_p3), %s475_s12, 1  ;;  %v245_v0 = vlaneseq (!%p176_p3) }
   0x9   : > { %s583_s18 = smov (%p27_p4, %s581_s18), 0  ;;  %179 = sbr.rel (%p176_p3) target bundleno = 31 (0x1f), region = 32 }
   0xa   : > { %v246_v1 = vshrl.u32 (!%p176_p3), %v245_v0, 7 }
   0xc   : > { %v247_v2 = vsub.s32 (!%p176_p3), 0, %v246_v1  ;;  %v251_v3 = vsub.s32 (!%p176_p3), 1, %v246_v1 }
  0x10   : > { %s585_s13 = smov (!%p215_p5, %s479_s13), 1  ;;  %s587_s12 = smov (!%p217_p6, %s475_s12), 1 }
  0x11   : > { %s404_s19 = sshll.u32 %s585_s13, 2  ;;  %s406_s20 = sshll.u32 %s585_s13, 1 }
  0x12   : > { %s403_s21 = sshll.u32 %s587_s12, 1  ;;  %s227_s24 = scalar_lea.vmem %s571_s1, %s406_s20 }
  0x13   : > { %s221_s25 = sadd.s32 %s404_s19, %s403_s21  ;;  %s231_s28 = scalar_lea.vmem %s572_s2, %s406_s20  ;;  %v243_v4 = vld [vmem:[%s227_s24] sm:$0x3] }
  0x14   : > { %s405_s29 = sshll.u32 %s221_s25, 3  ;;  %v248_v5 = vrot.slane %v243_v4, %v247_v2  ;;  %v252_v6 = vrot.slane %v243_v4, %v251_v3  ;;  %v257_v7 = vld [vmem:[%s231_s28] sm:$0x3] }
  0x15   : > { %s223_s5 = scalar_lea.vmem %s570_s0, %s405_s29  ;;  %v262_v8 = vrot.slane %v257_v7, %v247_v2  ;;  %v266_v9 = vrot.slane %v257_v7, %v251_v3  ;;  %s240_s8 = scalar_lea.vmem %s573_s3, %s405_s29 }
  0x16   : > { %v241_v10 = vld [vmem:[%s223_s5] sm:$0xff]  ;;  %v242_v11 = vld [vmem:[%s223_s5 + $0x8] sm:$0xff] }
  0x17   : > { %v255_v12 = vmul.f32 %v248_v5, %v241_v10  ;;  %v256_v13 = vmul.f32 %v252_v6, %v242_v11 }
  0x19   : > { %v269_v14 = vadd.f32 %v262_v8, %v255_v12  ;;  %v270_v15 = vadd.f32 %v266_v9, %v256_v13 }
  0x1b   : > { %vm271_vm0 = vcmp.gt.f32.partialorder %v269_v14, 0.0  ;;  %v273_v16 = vmul.f32 0.01, %v269_v14  ;;  %vm272_vm1 = vcmp.gt.f32.partialorder %v270_v15, 0.0  ;;  %v274_v17 = vmul.f32 0.01, %v270_v15 }
  0x1d   : > { %v275_v18 = vsel %vm271_vm0, %v269_v14, %v273_v16  ;;  %v276_v19 = vsel %vm272_vm1, %v270_v15, %v274_v17 }
  0x1e   : > { %277 = vst [vmem:[%s240_s8] sm:$0xff] %v275_v18  ;;  %278 = vst [vmem:[%s240_s8 + $0x8] sm:$0xff] %v276_v19 }
  0x1f PF: > { %s13_s16 = sadd.s32 1, %s491_s16   ;;  %s574_s12 = smov %s483_s14 }
  0x20   : > { %p10_p7 = scmp.ge.s32.totalorder %s13_s16, 6   ;;  %s575_s13 = smov %s487_s15 }
  0x21   : > { %s576_s14 = smov %s579_s17  ;;  %s577_s15 = smov %s583_s18 }
  0x22   :  { %12 = sbr.rel (!%p10_p7) target bundleno = 3 (0x3), region = 68 }

// kernel: upsample_gn_forward.3
= control target key start
LH: loop header
LB: loop body
LE: loop exit
PB: predicated region body
PF: predicated region fallthrough
CT: control target
= control target key end

     0   :  { %s2466_s27 = smov 0   ;;  %s2468_s28 = smov 0   ;;  %s3981_s0 = inlined_call_operand.vmem [shape: f32[64,2], index: 0, kind: input, shape index: {}]   ;;  %s3982_s1 = inlined_call_operand.vmem [shape: f32[2,256,4], index: 1, kind: input, shape index: {}]   ;;  %s3983_s2 = inlined_call_operand.vmem [shape: f32[2,4,32,4], index: 2, kind: input, shape index: {}]   ;;  %s3984_s3 = inlined_call_operand.vmem [shape: f32[2,256,12], index: 3, kind: input, shape index: {}]   ;;  %s3985_s4 = inlined_call_operand.vmem [shape: f32[2,4,32,12], index: 4, kind: input, shape index: {}]   ;;  %s3986_s5 = inlined_call_operand.vmem [shape: f32[36,16], index: 5, kind: input, shape index: {}]   ;;  %s3987_s6 = inlined_call_operand.vmem [shape: f32[108,16], index: 6, kind: input, shape index: {}]   ;;  %s3988_s7 = inlined_call_operand.vmem [shape: f32[2,256,16], index: 7, kind: output, shape index: {0}]   ;;  %s3989_s8 = inlined_call_operand.vmem [shape: f32[2,4,2,16], index: 8, kind: output, shape index: {1}]  }
   0x1   :  { %s2470_s29 = smov 0   ;;  %s2472_s30 = smov 0  }
   0x2   :  { %s2474_s9 = smov 0  }
   0x3 LB: > { %s28_s10 = sadd.s32 1, %s2394_s29  ;;  %s31_s11 = sadd.s32 1, %s2398_s30  ;;  %s2402_s9 = sphi %s2474_s9, %s19_s9   ;;  %s2398_s30 = sphi %s2472_s30, %s4228_s30   ;;  %s2394_s29 = sphi %s2470_s29, %s4227_s29   ;;  %s2390_s28 = sphi %s2468_s28, %s4226_s28   ;;  %s2386_s27 = sphi %s2466_s27, %s4225_s27  }
   0x4   : > { %p29_p0 = scmp.ge.s32.totalorder %s28_s10, 4  ;;  %p2119_p1 = scmp.ge.s32.totalorder %s2402_s9, 1 }
   0x5   : > { %p337_p2 = scmp.lt.s32.totalorder %s2402_s9, 9 }
   0x6   : > { %s4230_s10 = smov (%p29_p0, %s28_s10), 0  ;;  %s4232_s11 = smov (!%p29_p0, %s31_s11), %s2398_s30 }
   0x7   : > { %p338_p3 = pnand %p2119_p1, %p337_p2  ;;  %p33_p4 = scmp.ge.s32.totalorder %s4232_s11, 2 }
   0x9   : > { %s4234_s11 = smov (%p33_p4, %s4232_s11), 0  ;;  %341 = sbr.rel (%p338_p3) target bundleno = 728 (0x2d8), region = 48 }
  0x10   : > { %v472_v0 = vld [vmem:[%s3981_s0 + $0x10] sm:$0xff]  ;;  %v470_v1 = vld [vmem:[%s3981_s0] sm:$0xff]  ;;  %p415_p5 = scmp.lt.s32.totalorder %s2390_s28, 1  ;;  %v2404_v2 = vmov 1   ;;  %p426_p6 = scmp.lt.s32.totalorder %s2386_s27, 3  ;;  %v473_v3 = vld [vmem:[%s3981_s0 + $0x18] sm:$0xff] }
  0x11   : > { %2358 = vset.pattern.permute.xlu1 %v2404_v2  ;;  %2357 = vset.pattern.permute.xlu0 %v2404_v2  ;;  %v471_v4 = vld [vmem:[%s3981_s0 + $0x8] sm:$0xff]  ;;  %v2519_v5 = vld [vmem:[%s3981_s0 + $0x20] sm:$0xff]  ;;  %s2120_s14 = sshll.u32 %s2386_s27, 3  ;;  %v2405_v6 = vmov 0   ;;  %v2531_v7 = vld [vmem:[%s3981_s0 + $0x38] sm:$0xff]  ;;  %vm4053_vm0 = vcmask 1040384  }
  0x12   : > { %667 = vperm.xlu1 %2358, %v472_v0   ;;  %661 = vperm.xlu0 %2357, %v470_v1   ;;  %s4236_s28 = smov (!%p415_p5, %s2390_s28), 1  ;;  %p417_p7 = scmp.lt.s32.totalorder %s2120_s14, 31  ;;  %v2536_v8 = vld [vmem:[%s3981_s0 + $0x28] sm:$0xff]  ;;  %v476_v13 = vld [vmem:[%s3981_s0 + $0x30] sm:$0xff]  ;;  %vm754_vm1 = vcmask 1046528   ;;  %vm684_vm2 = vcmask 1041408  }
  0x13   : > { %s427_s20 = scalar_select %p426_p6, %s2386_s27, 3  ;;  %vm805_vm3 = vcmask 1045504   ;;  %vm1616_vm4 = vcmask 1043456   ;;  %vm2420_vm5 = vmmov 1   ;;  %vm1087_vm7 = vcmask 97280  }
  0x14   : > { %s2124_s21 = sshll.u32 %s4236_s28, 4  ;;  %s2135_s22 = sshll.u32 %s4236_s28, 2  ;;  %vm3320_vm6 = vmpackc.low %vm1616_vm4, %vm2420_vm5  ;;  %vm1069_vm8 = vcmask 31744   ;;  %vm1114_vm9 = vcmask 195584   ;;  %vm1078_vm10 = vcmask 64512   ;;  %vm1537_vm11 = vcmask 293888  }
  0x15   : > { %s2123_s23 = sshll.u32 %s427_s20, 2  ;;  %s2514_s24 = sadd.s32 %s2135_s22, %s427_s20  ;;  %vm1546_vm12 = vcmask 392192   ;;  %vm1096_vm13 = vcmask 130048   ;;  %vm1105_vm14 = vcmask 162816   ;;  %vm1555_vm15 = vcmask 490496  }
  0x16   : > { %670 = vperm.xlu1 %2358, %v473_v3   ;;  %664 = vperm.xlu0 %2357, %v471_v4   ;;  %s430_s25 = sadd.s32 %s2124_s21, %s2123_s23  ;;  %s2121_s20 = sshll.u32 %s4236_s28, 5  ;;  %vm1573_vm5 = vcmask 687104  }
  0x17   : > { %s2125_s13 = sshll.u32 %s430_s25, 3  ;;  %s4238_s14 = smov (!%p417_p7, %s2120_s14), 31 }
  0x18   : > { %s2526_s17 = scalar_lea.vmem %s3985_s4, %s2125_s13  ;;  %s420_s22 = sadd.s32 %s2121_s20, %s4238_s14 }
  0x19   : > { %v551_v9 = vld [vmem:[%s2526_s17] sm:$0xff]  ;;  %v552_v10 = vld [vmem:[%s2526_s17 + $0x8] sm:$0xff]  ;;  %s2542_s23 = sshll.u32 %s420_s22, 3  ;;  %s2547_s28 = scalar_lea.vmem %s3983_s2, %s2125_s13 }
  0x1a   : > { %2359 = vset.pattern.permute.xlu1 %v2405_v6  ;;  %673 = vperm.xlu0 %2357, %v2519_v5   ;;  %v557_v11 = vrot.slane %v551_v9, 7  ;;  %v558_v12 = vrot.slane %v552_v10, 7  ;;  %s2554_s14 = scalar_lea.vmem %s3982_s1, %s2542_s23  ;;  %v487_v16 = vld [vmem:[%s2547_s28 + $0x8] sm:$0xff]  ;;  %s2566_s20 = scalar_lea.vmem %s3984_s3, %s2542_s23  ;;  %v486_v27 = vld [vmem:[%s2547_s28] sm:$0xff]  ;;  %v2676_v9 = vld [vmem:[%s2547_s28 + $0x10] sm:$0xff] }
  0x1b   : > { %614 = vperm.xlu1 %2359, %v470_v1   ;;  %v478_v14 = vld [vmem:[%s2554_s14] sm:$0xff]  ;;  %v479_v15 = vld [vmem:[%s2554_s14 + $0x8] sm:$0xff]  ;;  %v494_v19 = vrot.slane %v487_v16, 7  ;;  %v480_v35 = vld [vmem:[%s2554_s14 + $0x10] sm:$0xff]  ;;  %v493_v38 = vrot.slane %v486_v27, 7  ;;  %s2406_s27 = smov 12  }
  0x1c   : > { %v2569_v17 = vsel %vm4053_vm0, %v557_v11, %v558_v12  ;;  %v2572_v18 = vsel %vm4053_vm0, 0.0, %v557_v11  ;;  %v507_v20 = vrot.slane %v478_v14, 7  ;;  %v508_v21 = vrot.slane %v479_v15, 7  ;;  %v543_v22 = vld [vmem:[%s2566_s20] sm:$0xff]  ;;  %v2576_v23 = vld [vmem:[%s2566_s20 + $0x8] sm:$0xff]  ;;  %s4022_s21 = smov 16  }
  0x1d   : > { %4054 = vst [vmem:[#allocation2_spill] sm:$0xff] %v2569_v17  ;;  %4055 = vst [vmem:[#allocation3_spill] sm:$0xff] %v2572_v18  ;;  %v2579_v24 = vld [vmem:[%s2554_s14 + $0x20] sm:$0xff]  ;;  %v1208_v25 = vrot.slane %v2572_v18, 1  ;;  %v1209_v26 = vrot.slane %v2569_v17, 1  ;;  %v571_v31 = vrot.slane %v543_v22, 7  ;;  %v2633_v49 = vsel %vm4053_vm0, %v493_v38, %v494_v19 }
  0x1e   : > { %682 = vperm.xlu0 %2357, %v2531_v7   ;;  %v2585_v28 = vld [vmem:[%s2566_s20 + $0x20] sm:$0xff]  ;;  %v2588_v29 = vsel %vm4053_vm0, %v507_v20, %v508_v21  ;;  %v2591_v30 = vsel %vm4053_vm0, %v494_v19, %v507_v20  ;;  %v572_v32 = vrot.slane %v2576_v23, 7  ;;  %v2595_v33 = vld [vmem:[%s2554_s14 + $0x28] sm:$0xff]  ;;  %v514_v36 = vrot.slane %v2579_v24, 7  ;;  %4062 = vst [vmem:[#allocation10_spill] sm:$0xff] %v2633_v49  ;;  %v481_v60 = vld [vmem:[%s2554_s14 + $0x18] sm:$0xff] }
  0x1f   : > { %2360 = vset.pattern.permute.xlu1 %v2404_v2  ;;  %4056 = vst [vmem:[#allocation4_spill] sm:$0xff] %v2588_v29  ;;  %4057 = vst [vmem:[#allocation5_spill] sm:$0xff] %v2591_v30  ;;  %v2598_v34 = vld [vmem:[%s2566_s20 + $0x28] sm:$0xff]  ;;  %v516_v37 = vrot.slane %v2595_v33, 7  ;;  %v578_v39 = vrot.slane %v2585_v28, 7  ;;  %v1210_v41 = vsel %vm754_vm1, %v1208_v25, %v1209_v26  ;;  %v758_v42 = vrot.slane %v2591_v30, 1 }
  0x20   : > { %676 = vperm.xlu1 %2360, %v2536_v8   ;;  %v580_v40 = vrot.slane %v2598_v34, 7  ;;  %v760_v43 = vrot.slane %v2588_v29, 1  ;;  %v2619_v45 = vsel %vm4053_vm0, %v571_v31, %v572_v32  ;;  %v2622_v46 = vsel %vm4053_vm0, %v558_v12, %v571_v31  ;;  %s4020_s22 = smov 48   ;;  %v545_v62 = vld [vmem:[%s2566_s20 + $0x10] sm:$0xff]  ;;  %s2409_s25 = smov 4   ;;  %v546_v1 = vld [vmem:[%s2566_s20 + $0x18] sm:$0xff] }
  0x21   : > { %v2615_v44 = vsel %vm4053_vm0, %v514_v36, %v516_v37  ;;  %4059 = vst [vmem:[#allocation7_spill] sm:$0xff] %v2619_v45  ;;  %4060 = vst [vmem:[#allocation8_spill] sm:$0xff] %v2622_v46  ;;  %v510_v47 = vrot.slane %v480_v35, 7  ;;  %v2636_v50 = vsel %vm4053_vm0, 0.0, %v493_v38  ;;  %v1211_v52 = vrot.slane %v2622_v46, 1  ;;  %v2697_v16 = vld [vmem:[%s2526_s17 + $0x10] sm:$0xff] }
  0x22   : > { %2362 = vset.pattern.permute.xlu0 %v2405_v6  ;;  %4058 = vst [vmem:[#allocation6_spill] sm:$0xff] %v2615_v44  ;;  %v2629_v48 = vsel %vm4053_vm0, %v578_v39, %v580_v40  ;;  %4063 = vst [vmem:[#allocation11_spill] sm:$0xff] %v2636_v50  ;;  %v761_v51 = vsel %vm754_vm1, %v758_v42, %v760_v43  ;;  %v1213_v53 = vrot.slane %v2619_v45, 1  ;;  %v755_v55 = vrot.slane %v2636_v50, 1  ;;  %s2410_s26 = smov 28   ;;  %s4024_s12 = smov 84  }
  0x23   : > { %619 = vperm.xlu0 %2362, %v471_v4   ;;  %4061 = vst [vmem:[#allocation9_spill] sm:$0xff] %v2629_v48  ;;  %v2644_v54 = vsel %vm4053_vm0, %v508_v21, %v510_v47  ;;  %v756_v56 = vrot.slane %v2633_v49, 1  ;;  %v512_v63 = vrot.slane %v481_v60, 7  ;;  %v533_v11 = vrot.slane %v2676_v9, 7  ;;  %s2412_s15 = smov 36   ;;  %v2776_v60 = vld [vmem:[%s2526_s17 + $0x18] sm:$0xff] }
  0x24   : > { %679 = vperm.xlu1 %2360, %v476_v13   ;;  %4064 = vst [vmem:[#allocation12_spill] sm:$0xff] %v2644_v54  ;;  %v1214_v57 = vsel %vm754_vm1, %v1211_v52, %v1213_v53  ;;  %v762_v58 = vrot.slane %v2644_v54, 1  ;;  %v3992_v21 = vrot.slane %v2697_v16, 7  ;;  %s2413_s16 = smov 24   ;;  %s2414_s17 = smov 72  }
  0x25   : > { %v757_v59 = vsel %vm754_vm1, %v755_v55, %v756_v56  ;;  %v2666_v4 = vsel %vm4053_vm0, %v510_v47, %v512_v63  ;;  %v2719_v27 = vsel %vm4053_vm0, %v512_v63, %v514_v36  ;;  %v484_v55 = vld [vmem:[%s2554_s14 + $0x30] sm:$0xff]  ;;  %s2416_s19 = smov 60   ;;  %s4163_s18 = smov 48  }
  0x26   : > { %v763_v61 = vsel %vm754_vm1, %v760_v43, %v762_v58  ;;  %4065 = vst [vmem:[#allocation13_spill] sm:$0xff] %v2666_v4  ;;  %v764_v12 = vrot.slane %v2666_v4, 1  ;;  %4068 = vst [vmem:[#allocation16_spill] sm:$0xff] %v2719_v27  ;;  %v3991_v31 = vrot.slane %v2719_v27, 1  ;;  %v518_v63 = vrot.slane %v484_v55, 7 }
  0x27   : > { %624 = vperm.xlu0 %2362, %v472_v0   ;;  %v759_v0 = vsel %vm754_vm1, %v756_v56, %v758_v42  ;;  %v549_v56 = vld [vmem:[%s2566_s20 + $0x30] sm:$0xff] }
  0x28   : > { %2361 = vset.pattern.permute.xlu1 %v2405_v6  ;;  %v765_v20 = vsel %vm754_vm1, %v762_v58, %v764_v12  ;;  %v2734_v24 = vsel %vm754_vm1, %v764_v12, %v3991_v31 }
  0x29   : > { %629 = vperm.xlu1 %2361, %v473_v3   ;;  %v574_v3 = vrot.slane %v545_v62, 7 }
  0x2b   : > { %644 = vperm.xlu0 %2362, %v476_v13   ;;  %v2680_v10 = vsel %vm4053_vm0, %v572_v32, %v574_v3 }
  0x2c   : > { %4066 = vst [vmem:[#allocation14_spill] sm:$0xff] %v2680_v10  ;;  %v1215_v19 = vrot.slane %v2680_v10, 1 }
  0x2d   : > { %634 = vperm.xlu1 %2361, %v2519_v5   ;;  %v576_v5 = vrot.slane %v546_v1, 7 }
  0x2e   : > { %v1216_v25 = vsel %vm754_vm1, %v1213_v53, %v1215_v19 }
  0x2f   : > { %1225 = vrot.lane.b32.xlu0 %v1210_v41, %s2406_s27  ;;  %v2687_v14 = vsel %vm4053_vm0, %v574_v3, %v576_v5  ;;  %v2727_v32 = vsel %vm4053_vm0, %v576_v5, %v578_v39  ;;  %v3993_v5 = vrot.slane %v2776_v60, 7 }
  0x30   : > { %2363 = vset.pattern.permute.xlu0 %v2404_v2  ;;  %v2661_v2 = vld [vmem:[%s2554_s14 + $0x38] sm:$0xff]  ;;  %4067 = vst [vmem:[#allocation15_spill] sm:$0xff] %v2687_v14  ;;  %v1217_v22 = vrot.slane %v2687_v14, 1  ;;  %4069 = vst [vmem:[#allocation17_spill] sm:$0xff] %v2727_v32  ;;  %v3990_v35 = vrot.slane %v2727_v32, 1  ;;  %s4156_s14 = smov 16  }
  0x31   : > { %639 = vperm.xlu1 %2361, %v2536_v8   ;;  %v520_v6 = vrot.slane %v2661_v2, 7  ;;  %v1212_v8 = vsel %vm754_vm1, %v1209_v26, %v1211_v52 }
  0x32   : > { %v1218_v26 = vsel %vm754_vm1, %v1215_v19, %v1217_v22  ;;  %v2744_v28 = vsel %vm754_vm1, %v1217_v22, %v3990_v35 }
  0x33   : > { %884 = vrot.lane.b32.xlu0 %v761_v51, %s4022_s21  ;;  %v2694_v15 = vsel %vm4053_vm0, %v520_v6, %v533_v11  ;;  %4070 = vst [vmem:[#allocation18_spill] sm:$0xff] %v2744_v28 }
  0x35   : > { %649 = vperm.xlu1 %2361, %v2531_v7   ;;  %v2670_v7 = vld [vmem:[%s2566_s20 + $0x38] sm:$0xff]  ;;  %s2419_s20 = smov 96  }
  0x36   : > { %v584_v13 = vrot.slane %v2670_v7, 7 }
  0x37   : > { %1336 = vrot.lane.b32.xlu0 %v1214_v57, %s4020_s22 }
  0x38   : > { %v2709_v23 = vsel %vm4053_vm0, %v584_v13, %v3992_v21 }
  0x39   : > { %772 = vrot.lane.b32.xlu1 %v757_v59, %s2409_s25  ;;  %v489_v59 = vld [vmem:[%s2547_s28 + $0x18] sm:$0xff]  ;;  %s2415_s28 = smov 8  }
  0x3a   : > { %v534_v3 = vrot.slane %v489_v59, 7 }
  0x3b   : > { %886 = vrot.lane.b32.xlu0 %v763_v61, %s4022_s21 }
  0x3c   : > { %v2819_v34 = vsel %vm4053_vm0, %v533_v11, %v534_v3 }
  0x3d   : > { %774 = vrot.lane.b32.xlu1 %v759_v0, %s2409_s25  ;;  %v582_v0 = vrot.slane %v549_v56, 7 }
  0x3f   : > { %1229 = vrot.lane.b32.xlu0 %v1214_v57, %s2406_s27 }
  0x41   : > { %1227 = vrot.lane.b32.xlu1 %v1212_v8, %s2406_s27 }
  0x43   : > { %995 = vrot.lane.b32.xlu0 %v765_v20, %s2410_s26 }
  0x45   : > { %776 = vrot.lane.b32.xlu1 %v761_v51, %s2409_s25 }
  0x47   : > { %1447 = vrot.lane.b32.xlu0 %v1218_v26, %s4024_s12 }
  0x49   : > { %1338 = vrot.lane.b32.xlu1 %v1216_v25, %s4020_s22 }
  0x4b   : > { %888 = vrot.lane.b32.xlu0 %v765_v20, %s4022_s21 }
  0x4d   : > { %778 = vrot.lane.b32.xlu1 %v763_v61, %s2409_s25 }
  0x4f   : > { %1340 = vrot.lane.b32.xlu0 %v1218_v26, %s4020_s22 }
  0x51   : > { %1231 = vrot.lane.b32.xlu1 %v1216_v25, %s2406_s27 }
  0x53   : > { %890 = vrot.lane.b32.xlu0 %v2734_v24, %s4022_s21  ;;  %s2417_s21 = smov 20  }
  0x55   : > { %997 = vrot.lane.b32.xlu1 %v2734_v24, %s2410_s26 }
  0x57   : > { %1342 = vrot.lane.b32.xlu0 %v2744_v28, %s4020_s22  ;;  %s2418_s22 = smov 32  }
  0x59   : > { %1449 = vrot.lane.b32.xlu1 %v2744_v28, %s4024_s12  ;;  %s4152_s12 = smov 84  }
  0x5d   : > { %780 = vrot.lane.b32.xlu1 %v765_v20, %s2409_s25 }
  0x61   : > { %1233 = vrot.lane.b32.xlu1 %v1218_v26, %s2406_s27 }
  0x91   : > { %v668_v36 = vpop.permute.xlu1 %667  ;;  %v662_v38 = vpop.permute.xlu0 %661 }
  0x92   : > { %v685_v1 = vrot.slane %v662_v38, 6  ;;  %v688_v8 = vrot.slane %v668_v36, 6  ;;  %v2796_v38 = vsel %vm4053_vm0, %v516_v37, %v518_v63  ;;  %v2801_v36 = vsel %vm4053_vm0, %v580_v40, %v582_v0 }
  0x93   : > { %4073 = vst [vmem:[#allocation21_spill] sm:$0xff] %v2796_v38  ;;  %4074 = vst [vmem:[#allocation22_spill] sm:$0xff] %v2801_v36  ;;  %v2822_v37 = vsel %vm4053_vm0, %v534_v3, 0.0  ;;  %v2827_v40 = vsel %vm4053_vm0, %v3993_v5, 0.0 }
  0x94   : > { %v709_v33 = vmul.f32 %v685_v1, %v2636_v50  ;;  %4075 = vst [vmem:[#allocation23_spill] sm:$0xff] %v2822_v37  ;;  %4076 = vst [vmem:[#allocation24_spill] sm:$0xff] %v2827_v40  ;;  %v1163_v9 = vmul.f32 %v685_v1, %v2572_v18  ;;  %v2852_v55 = vmul.f32 %v685_v1, %v2591_v30 }
  0x95   : > { %v2752_v39 = vpop.permute.xlu1 %670  ;;  %v665_v41 = vpop.permute.xlu0 %664  ;;  %v2855_v56 = vmul.f32 %v685_v1, %v2644_v54  ;;  %v2858_v59 = vmul.f32 %v685_v1, %v2680_v10 }
  0x96   : > { %v686_v61 = vrot.slane %v665_v41, 6  ;;  %v690_v12 = vrot.slane %v2752_v39, 6  ;;  %v2806_v39 = vsel %vm4053_vm0, %v518_v63, %v520_v6  ;;  %v2811_v41 = vsel %vm4053_vm0, %v582_v0, %v584_v13 }
  0x97   : > { %v806_v63 = vrot.slane %v709_v33, 2 }
  0x98   : > { %v2785_v19 = vsel %vm684_vm2, %v685_v1, %v686_v61  ;;  %v2830_v2 = vsel %vm684_vm2, %v688_v8, %v690_v12  ;;  %v2833_v6 = vsel %vm684_vm2, %v686_v61, %v688_v8 }
  0x99   : > { %v2754_v42 = vpop.permute.xlu0 %673  ;;  %v2837_v7 = vmul.f32 %v2785_v19, %v2633_v49  ;;  %v2866_v0 = vmul.f32 %v2785_v19, %v2619_v45  ;;  %v2871_v8 = vmul.f32 %v2833_v6, %v2591_v30  ;;  %v2895_v31 = vmul.f32 %v2833_v6, %v2727_v32 }
  0x9a   : > { %v2756_v43 = vpop.permute.xlu1 %614  ;;  %v692_v61 = vrot.slane %v2754_v42, 6  ;;  %v2875_v42 = vmul.f32 %v2833_v6, %v2622_v46 }
  0x9b   : > { %4071 = vst [vmem:[#allocation19_spill] sm:$0xff] %v2756_v43  ;;  %v718_v47 = vmul.f32 %v2756_v43, %v2591_v30  ;;  %v1172_v52 = vmul.f32 %v2756_v43, %v2622_v46  ;;  %v735_v53 = vmul.f32 %v2756_v43, %v2644_v54  ;;  %v1189_v20 = vmul.f32 %v2756_v43, %v2680_v10 }
  0x9c   : > { %v3997_v3 = vrot.slane %v2837_v7, 2  ;;  %v2898_v21 = vsel %vm684_vm2, %v690_v12, %v692_v61 }
  0x9d   : > { %v2760_v51 = vpop.permute.xlu0 %682  ;;  %855 = vrot.lane.b32.xlu0 %v718_v47, %s2406_s27 }
  0x9e   : > { %v2910_v35 = vrot.slane %v2760_v51, 6  ;;  %v2927_v51 = vmul.f32 %v2830_v2, %v2615_v44 }
  0x9f   : > { %v2770_v57 = vpop.permute.xlu1 %676 }
  0xa0   : > { %4080 = vst [vmem:[#allocation27_spill] sm:$0xff] %v2927_v51  ;;  %v4087_v50 = vrot.slane %v2927_v51, 2 }
  0xa1   : > { %1307 = vrot.lane.b32.xlu0 %v1172_v52, %s2412_s15  ;;  %v2846_v52 = vmul.f32 %v2785_v19, %v2569_v17  ;;  %v2971_v17 = vmul.f32 %v2830_v2, %v2619_v45 }
  0xa2   : > { %v2772_v58 = vpop.permute.xlu0 %619 }
  0xa3   : > { %4072 = vst [vmem:[#allocation20_spill] sm:$0xff] %v2772_v58  ;;  %v719_v62 = vmul.f32 %v2772_v58, %v2588_v29  ;;  %v1173_v22 = vmul.f32 %v2772_v58, %v2619_v45  ;;  %v680_v25 = vpop.permute.xlu1 %679  ;;  %v736_v47 = vmul.f32 %v2772_v58, %v2666_v4 }
  0xa4   : > { %v696_v11 = vrot.slane %v680_v25, 6 }
  0xa5   : > { %966 = vrot.lane.b32.xlu0 %v735_v53, %s2413_s16  ;;  %857 = vrot.lane.b32.xlu1 %v719_v62, %s2406_s27  ;;  %v2849_v53 = vmul.f32 %v685_v1, %v2622_v46  ;;  %v694_v62 = vrot.slane %v2770_v57, 6  ;;  %v2879_v57 = vmul.f32 %v2830_v2, %v2588_v29  ;;  %v2959_v46 = vmul.f32 %v2898_v21, %v2801_v36 }
  0xa6   : > { %v2791_v26 = vpop.permute.xlu0 %624  ;;  %v2934_v25 = vsel %vm684_vm2, %v696_v11, %v2910_v35 }
  0xa7   : > { %v720_v13 = vmul.f32 %v2791_v26, %v2644_v54  ;;  %v2882_v1 = vsel %vm684_vm2, %v694_v62, %v696_v11  ;;  %v2930_v12 = vsel %vm684_vm2, %v692_v61, %v694_v62  ;;  %v2946_v62 = vmul.f32 %v2898_v21, %v2727_v32 }
  0xa8   : > { %v2889_v33 = vpop.permute.xlu1 %629  ;;  %v2950_v11 = vmul.f32 %v2898_v21, %v2796_v38  ;;  %v2965_v30 = vmul.f32 %v2934_v25, %v2615_v44  ;;  %v2980_v61 = vmul.f32 %v2930_v12, %v2615_v44  ;;  %v4089_v49 = vrot.slane %v2959_v46, 2 }
  0xa9   : > { %1418 = vrot.lane.b32.xlu0 %v1189_v20, %s2414_s17  ;;  %1309 = vrot.lane.b32.xlu1 %v1173_v22, %s2412_s15  ;;  %v1174_v20 = vmul.f32 %v2791_v26, %v2680_v10  ;;  %v1190_v22 = vmul.f32 %v2772_v58, %v2687_v14  ;;  %4077 = vst [vmem:[#allocation25_spill] sm:$0xff] %v2889_v33  ;;  %4081 = vst [vmem:[#allocation28_spill] sm:$0xff] %v2946_v62  ;;  %vm1123_vm2 = vcmask 228352  }
  0xaa   : > { %v721_v5 = vmul.f32 %v2889_v33, %v2666_v4  ;;  %4085 = vst [vmem:[#allocation31_spill] sm:$0xff] %v2980_v61  ;;  %v4086_v45 = vrot.slane %v2950_v11, 2 }
  0xac   : > { %v2991_v43 = vsel %vm805_vm3, %v4087_v50, %v4086_v45  ;;  %v3008_v45 = vmul.f32 %v2934_v25, %v2629_v48  ;;  %v3012_v50 = vmul.f32 %v2882_v1, %v2796_v38 }
  0xad   : > { %859 = vrot.lane.b32.xlu0 %v720_v13, %s2406_s27  ;;  %968 = vrot.lane.b32.xlu1 %v736_v47, %s2413_s16  ;;  %v1258_v13 = vrot.slane %v1163_v9, 2  ;;  %v1369_v47 = vrot.slane %v2849_v53, 2  ;;  %v2907_v53 = vmul.f32 %v2785_v19, %v2588_v29  ;;  %v4079_v9 = vrot.slane %v2846_v52, 2  ;;  %4088 = vst [vmem:[#allocation32_spill] sm:$0xff] %v2991_v43 }
  0xae   : > { %v4092_v43 = vrot.slane %v2871_v8, 2 }
  0xaf   : > { %v1260_v29 = vsel %vm805_vm3, %v1258_v13, %v4079_v9  ;;  %v1175_v13 = vmul.f32 %v2889_v33, %v2687_v14  ;;  %v1185_v9 = vmul.f32 %v2930_v12, %v2629_v48  ;;  %v4097_v33 = vrot.slane %v2946_v62, 2 }
  0xb0   : > { %v3093_v62 = vmul.f32 %v2898_v21, %v2644_v54 }
  0xb1   : > { %1311 = vrot.lane.b32.xlu0 %v1174_v20, %s2412_s15  ;;  %1420 = vrot.lane.b32.xlu1 %v1190_v22, %s2414_s17  ;;  %v2916_v20 = vmul.f32 %v2882_v1, %v2719_v27  ;;  %v808_v22 = vsel %vm805_vm3, %v806_v63, %v3997_v3  ;;  %v1200_v63 = vmul.f32 %v2830_v2, %v2629_v48  ;;  %v1378_v18 = vrot.slane %v1185_v9, 2  ;;  %v1141_v3 = vld [vmem:[%s3987_s6] sm:$0xff] }
  0xb2   : > { %v4091_v9 = vrot.slane %v2866_v0, 2 }
  0xb3   : > { %4078 = vst [vmem:[#allocation26_spill] sm:$0xff] %v2916_v20  ;;  %v3032_v48 = vsel %vm805_vm3, %v4097_v33, %v1378_v18  ;;  %v4099_v33 = vrot.slane %v2875_v42, 2 }
  0xb4   : > { %4098 = vst [vmem:[#allocation35_spill] sm:$0xff] %v3032_v48  ;;  %v4103_v48 = vrot.slane %v2980_v61, 2 }
  0xb5   : > { %823 = vrot.lane.b32.xlu0 %v808_v22, %s2415_s28  ;;  %861 = vrot.lane.b32.xlu1 %v721_v5, %s2406_s27  ;;  %v2955_v22 = vmul.f32 %v2882_v1, %v2727_v32  ;;  %v1485_v5 = vrot.slane %v1200_v63, 2  ;;  %v4083_v63 = vrot.slane %v2895_v31, 2 }
  0xb7   : > { %4082 = vst [vmem:[#allocation29_spill] sm:$0xff] %v2955_v22  ;;  %v2976_v58 = vsel %vm805_vm3, %v4083_v63, %v1485_v5  ;;  %v1371_v63 = vsel %vm805_vm3, %v1369_v47, %v4091_v9  ;;  %v4016_v9 = vrot.slane %v3008_v45, 2  ;;  %v3057_v47 = vmul.f32 %v2882_v1, %v2801_v36 }
  0xb8   : > { %4084 = vst [vmem:[#allocation30_spill] sm:$0xff] %v2976_v58  ;;  %v3004_v58 = vsel %vm805_vm3, %v1485_v5, %v4089_v49  ;;  %v4094_v49 = vrot.slane %v2965_v30, 2  ;;  %v4095_v5 = vrot.slane %v2916_v20, 2  ;;  %v3089_v20 = vmul.f32 %v2785_v19, %v2687_v14 }
  0xb9   : > { %1275 = vrot.lane.b32.xlu0 %v1260_v29, %s2413_s16  ;;  %1313 = vrot.lane.b32.xlu1 %v1175_v13, %s2412_s15  ;;  %v1142_v29 = vld [vmem:[%s3987_s6 + $0x8] sm:$0xff]  ;;  %4090 = vst [vmem:[#allocation33_spill] sm:$0xff] %v3004_v58  ;;  %v4093_v13 = vrot.slane %v2837_v7, 2  ;;  %v4017_v7 = vrot.slane %v3012_v50, 2 }
  0xba   : > { %v3027_v58 = vsel %vm805_vm3, %v4095_v5, %v4094_v49  ;;  %v2254_v28 = vpack.c.bf16 %v1142_v29, %v1141_v3  ;;  %v4100_v49 = vrot.slane %v2846_v52, 2  ;;  %v3053_v29 = vmul.f32 %v2833_v6, %v2644_v54  ;;  %v1146_v52 = vld [vmem:[%s3987_s6 + $0x28] sm:$0xff] }
  0xbb   : > { %v810_v51 = vsel %vm805_vm3, %v4093_v13, %v4092_v43  ;;  %4096 = vst [vmem:[#allocation34_spill] sm:$0xff] %v3027_v58  ;;  %v1143_v43 = vld [vmem:[%s3987_s6 + $0x10] sm:$0xff]  ;;  %v1144_v13 = vld [vmem:[%s3987_s6 + $0x18] sm:$0xff]  ;;  %v3085_v58 = vsel %vm805_vm3, %v4103_v48, %v4017_v7  ;;  %v4107_v7 = vrot.slane %v2907_v53, 2  ;;  %v717_v54 = vmul.f32 %v2910_v35, %v2796_v38  ;;  %v3159_v38 = vpop.permute.xlu1 %634 }
  0xbc   : > { %v1262_v5 = vsel %vm805_vm3, %v4100_v49, %v4099_v33  ;;  %v3071_v33 = vmul.f32 %v2833_v6, %v2680_v10  ;;  %v4101_v49 = vrot.slane %v2955_v22, 2  ;;  %4104 = vst [vmem:[#allocation37_spill] sm:$0xff] %v3085_v58  ;;  %2255 = vmatprep.subr.bf16.mxu1 %v2254_v28  ;;  %v4026_v22 = vrot.slane %v3057_v47, 2 }
  0xbd   : > { %1386 = vrot.lane.b32.xlu0 %v1371_v63, %s2416_s19  ;;  %825 = vrot.lane.b32.xlu1 %v810_v51, %s2415_s28  ;;  %v1145_v51 = vld [vmem:[%s3987_s6 + $0x20] sm:$0xff]  ;;  %v3067_v63 = vmul.f32 %v2785_v19, %v2666_v4  ;;  %v4108_v58 = vrot.slane %v2852_v55, 2  ;;  %v4109_v55 = vrot.slane %v2971_v17, 2 }
  0xbe   : > { %v3078_v3 = vsel %vm805_vm3, %v4101_v49, %v4016_v9  ;;  %2257 = vmatpush3.bf16.msra.mxu1 %v2254_v28  ;;  %v2258_v49 = vpack.c.bf16 %v1144_v13, %v1143_v43  ;;  %v4105_v9 = vrot.slane %v2879_v57, 2  ;;  %v2262_v61 = vpack.c.bf16 %v1146_v52, %v1145_v51  ;;  %v607_v28 = vld [vmem:[%s3986_s5] sm:$0xff]  ;;  %v610_v52 = vld [vmem:[%s3986_s5 + $0x18] sm:$0xff] }
  0xbf   : > { %4102 = vst [vmem:[#allocation36_spill] sm:$0xff] %v3078_v3  ;;  %v4106_v3 = vrot.slane %v2871_v8, 2  ;;  %v919_v19 = vsel %vm805_vm3, %v4108_v58, %v4107_v7  ;;  %v608_v8 = vld [vmem:[%s3986_s5 + $0x8] sm:$0xff]  ;;  %v4110_v58 = vrot.slane %v2875_v42, 2  ;;  %v1028_v7 = vrot.slane %v2855_v56, 2  ;;  %v1148_v42 = vld [vmem:[%s3987_s6 + $0x38] sm:$0xff] }
  0xc0   : > { %v3124_v43 = vmul.f32 %v2833_v6, %v2719_v27  ;;  %v3129_v13 = vsel %vm805_vm3, %v1378_v18, %v4026_v22  ;;  %v1029_v56 = vrot.slane %v3067_v63, 2  ;;  %2259 = vmatprep.subr.bf16.mxu1 %v2258_v49  ;;  %v821_v6 = vrot.slane %v717_v54, 2  ;;  %v609_v18 = vld [vmem:[%s3986_s5 + $0x10] sm:$0xff] }
  0xc1   : > { %v812_v48 = vsel %vm805_vm3, %v4106_v3, %v4105_v9  ;;  %1277 = vrot.lane.b32.xlu1 %v1262_v5, %s2413_s16  ;;  %v1264_v9 = vsel %vm805_vm3, %v4110_v58, %v4109_v55  ;;  %4111 = vst [vmem:[#allocation38_spill] sm:$0xff] %v3129_v13  ;;  %v1147_v5 = vld [vmem:[%s3987_s6 + $0x30] sm:$0xff]  ;;  %v1171_v51 = vmul.f32 %v2910_v35, %v2801_v36  ;;  %v4036_v55 = vrot.slane %v3089_v20, 2 }
  0xc2   : > { %827 = vrot.lane.b32.xlu0 %v812_v48, %s2415_s28  ;;  %v4031_v48 = vrot.slane %v3071_v33, 2  ;;  %2261 = vmatpush3.bf16.msra.mxu1 %v2258_v49  ;;  %v2284_v63 = vpack.c.bf16 %v608_v8, %v607_v28  ;;  %v4112_v54 = vrot.slane %v2965_v30, 2  ;;  %v2266_v3 = vpack.c.bf16 %v1148_v42, %v1147_v5  ;;  %v1149_v28 = vld [vmem:[%s3987_s6 + $0x40] sm:$0xff]  ;;  %v1150_v8 = vld [vmem:[%s3987_s6 + $0x48] sm:$0xff] }
  0xc3   : > { %2263 = vmatprep.subr.bf16.mxu1 %v2262_v61  ;;  %v1273_v13 = vrot.slane %v1171_v51, 2  ;;  %v3157_v36 = vmul.f32 %v2930_v12, %v2806_v39  ;;  %v1480_v49 = vrot.slane %v2858_v59, 2  ;;  %v2288_v5 = vpack.c.bf16 %v610_v52, %v609_v18 }
  0xc4   : > { %v3153_v22 = vsel %vm805_vm3, %v4112_v54, %v821_v6  ;;  %v4113_v42 = vrot.slane %v2776_v60, 7  ;;  %v4114_v6 = vrot.slane %v2697_v16, 7  ;;  %v4116_v59 = vrot.slane %v3053_v29, 2  ;;  %2285 = vmatprep.subr.bf16.mxu0 %v2284_v63 }
  0xc5   : > { %934 = vrot.lane.b32.xlu1 %v919_v19, %s2417_s21  ;;  %v1030_v54 = vsel %vm805_vm3, %v1028_v7, %v1029_v56  ;;  %v4118_v30 = vrot.slane %v3008_v45, 2  ;;  %v1037_v60 = vrot.slane %v3157_v36, 2  ;;  %v4119_v16 = vrot.slane %v2866_v0, 2  ;;  %2287 = vmatpush3.bf16.msra.mxu0 %v2284_v63  ;;  %v1152_v63 = vld [vmem:[%s3987_s6 + $0x58] sm:$0xff] }
  0xc6   : > { %1279 = vrot.lane.b32.xlu0 %v1264_v9, %s2413_s16  ;;  %v3176_v19 = vsel %vm4053_vm0, %v4114_v6, %v4113_v42  ;;  %v4117_v9 = vrot.slane %v2907_v53, 2  ;;  %v1482_v53 = vsel %vm805_vm3, %v1480_v49, %v4036_v55  ;;  %v4120_v7 = vrot.slane %v3093_v62, 2  ;;  %2265 = vmatpush3.bf16.msra.mxu1 %v2262_v61  ;;  %v1151_v49 = vld [vmem:[%s3987_s6 + $0x50] sm:$0xff]  ;;  %v3215_v6 = vpop.permute.xlu0 %644 }
  0xc7   : > { %4115 = vst [vmem:[#allocation39_spill] sm:$0xff] %v3176_v19  ;;  %v3187_v58 = vsel %vm805_vm3, %v4118_v30, %v1273_v13  ;;  %v1373_v18 = vsel %vm805_vm3, %v4119_v16, %v4031_v48  ;;  %v4121_v45 = vrot.slane %v2879_v57, 2  ;;  %v4032_v52 = vrot.slane %v2806_v39, 1  ;;  %2267 = vmatprep.subr.bf16.mxu1 %v2266_v3  ;;  %2289 = vmatprep.subr.bf16.mxu0 %v2288_v5  ;;  %v3247_v16 = vpop.permute.xlu1 %639 }
  0xc8   : > { %v921_v51 = vsel %vm805_vm3, %v4117_v9, %v4116_v59  ;;  %v2270_v36 = vpack.c.bf16 %v1150_v8, %v1149_v28  ;;  %v4122_v0 = vrot.slane %v2950_v11, 2  ;;  %v4033_v57 = vrot.slane %v2694_v15, 1  ;;  %v611_v28 = vld [vmem:[%s3986_s5 + $0x20] sm:$0xf] }
  0xc9   : > { %v814_v13 = vsel %vm805_vm3, %v4121_v45, %v4120_v7  ;;  %v1202_v42 = vmul.f32 %v2930_v12, %v2811_v41  ;;  %936 = vrot.lane.b32.xlu1 %v921_v51, %s2417_s21  ;;  %v4123_v61 = vrot.slane %v3124_v43, 2  ;;  %v733_v8 = vmul.f32 %v2934_v25, %v2806_v39  ;;  %2291 = vmatpush3.bf16.msra.mxu0 %v2288_v5  ;;  %v1153_v5 = vld [vmem:[%s3987_s6 + $0x60] sm:$0xff] }
  0xca   : > { %v3207_v30 = vsel %vm805_vm3, %v4122_v0, %v1037_v60  ;;  %1045 = vrot.lane.b32.xlu0 %v1030_v54, %s2418_s22  ;;  %v3232_v59 = vmul.f32 %v2882_v1, %v2709_v23  ;;  %v3236_v9 = vmul.f32 %v2898_v21, %v2680_v10  ;;  %v749_v54 = vmul.f32 %v2882_v1, %v2694_v15 }
  0xcb   : > { %v1032_v11 = vsel %vm805_vm3, %v1029_v56, %v4123_v61  ;;  %v3243_v56 = vsel %vm754_vm1, %v4032_v52, %v4033_v57  ;;  %v1489_v51 = vrot.slane %v1202_v42, 2  ;;  %v4034_v7 = vrot.slane %v2811_v41, 1  ;;  %2269 = vmatpush3.bf16.msra.mxu1 %v2266_v3  ;;  %2240 = vmatprep.subr.msk.mxu0 %vm1616_vm4, %v611_v28 }
  0xcc   : > { %v930_v45 = vrot.slane %v733_v8, 2  ;;  %v1491_v0 = vrot.slane %v3232_v59, 2  ;;  %v1187_v61 = vmul.f32 %v2934_v25, %v2811_v41  ;;  %2271 = vmatprep.subr.bf16.mxu1 %v2270_v36  ;;  %v2274_v48 = vpack.c.bf16 %v1152_v63, %v1151_v49 }
  0xcd   : > { %v4124_v42 = vrot.slane %v2959_v46, 2  ;;  %v4035_v52 = vrot.slane %v2709_v23, 1  ;;  %v1039_v57 = vrot.slane %v749_v54, 2  ;;  %1388 = vrot.lane.b32.xlu1 %v1373_v18, %s2416_s19  ;;  %v3264_v3 = vmul.f32 %v2830_v2, %v2666_v4  ;;  %v1154_v46 = vld [vmem:[%s3987_s6 + $0x68] sm:$0xf]  ;;  %v3292_v54 = vpop.permute.xlu0 %1225  ;;  %2241 = vmatpush3.msk.msra.mxu0 %vm1616_vm4, %v611_v28 }
  0xce   : > { %1497 = vrot.lane.b32.xlu0 %v1482_v53, %s2419_s20  ;;  %v4125_v49 = vrot.slane %v3012_v50, 2  ;;  %v3278_v18 = vsel %vm805_vm3, %v1489_v51, %v1491_v0  ;;  %v1382_v53 = vrot.slane %v1187_v61, 2  ;;  %v734_v50 = vmul.f32 %v2910_v35, %v2694_v15 }
  0xcf   : > { %v3257_v1 = vsel %vm805_vm3, %v4124_v42, %v1489_v51  ;;  %v3285_v8 = vsel %vm754_vm1, %v4034_v7, %v4035_v52  ;;  %v3288_v59 = vsel %vm805_vm3, %v1037_v60, %v1039_v57  ;;  %v1265_v42 = vrot.slane %v3236_v9, 2  ;;  %2273 = vmatpush3.bf16.msra.mxu1 %v2270_v36  ;;  %v3311_v36 = vpop.permute.xlu1 %649 }
  0xd0   : > { %v3275_v63 = vsel %vm805_vm3, %v4125_v49, %v930_v45  ;;  %v3297_v51 = vmul.f32 %v2930_v12, %v2666_v4  ;;  %v4126_v61 = vrot.slane %v3057_v47, 2  ;;  %v1188_v60 = vmul.f32 %v2910_v35, %v2709_v23  ;;  %2275 = vmatprep.subr.bf16.mxu1 %v2274_v48 }
  0xd1   : > { %v2278_v7 = vpack.c.bf16 %v1154_v46, %v1153_v5  ;;  %v932_v52 = vrot.slane %v734_v50, 2  ;;  %v750_v9 = vmul.f32 %v2934_v25, %v2819_v34  ;;  %v1204_v55 = vmul.f32 %v2934_v25, %v3176_v19  ;;  %829 = vrot.lane.b32.xlu1 %v814_v13, %s2415_s28 }
  0xd2   : > { %v3303_v49 = vsel %vm805_vm3, %v4126_v61, %v1382_v53  ;;  %1047 = vrot.lane.b32.xlu0 %v1032_v11, %s2418_s22  ;;  %v3317_v47 = vmul.f32 %v2830_v2, %v2687_v14  ;;  %v1384_v5 = vrot.slane %v1188_v60, 2  ;;  %v1205_v25 = vmul.f32 %v2910_v35, %v2827_v40 }
  0xd3   : > { %4127 = vst [vmem:[#allocation40_spill] sm:$0xff] %v3303_v49  ;;  %v751_v46 = vmul.f32 %v2910_v35, %v2822_v37  ;;  %v922_v13 = vrot.slane %v3264_v3, 2  ;;  %v3330_v11 = vsel %vm805_vm3, %v930_v45, %v932_v52  ;;  %v1041_v2 = vrot.slane %v750_v9, 2  ;;  %2277 = vmatpush3.bf16.msra.mxu1 %v2274_v48  ;;  %v3352_v45 = vpop.permute.xlu0 %884 }
  0xd4   : > { %v1493_v50 = vrot.slane %v1204_v55, 2  ;;  %v815_v61 = vrot.slane %v3297_v51, 2  ;;  %v3334_v4 = vsel %vm805_vm3, %v1382_v53, %v1384_v5  ;;  %v1495_v60 = vrot.slane %v1205_v25, 2  ;;  %2280 = vmatprep.subr.msk.bf16.mxu1 %vm3320_vm6, %v2278_v7 }
  0xd5   : > { %v1043_v10 = vrot.slane %v751_v46, 2  ;;  %v4130_v40 = vrot.slane %v2971_v17, 2  ;;  %v4131_v35 = vrot.slane %v2895_v31, 2  ;;  %v4132_v3 = vrot.slane %v3089_v20, 2 }
  0xd6   : > { %v3347_v48 = vsel %vm805_vm3, %v1039_v57, %v1041_v2  ;;  %v3350_v55 = vsel %vm805_vm3, %v1491_v0, %v1493_v50  ;;  %v3357_v17 = vsel %vm805_vm3, %v1493_v50, %v1495_v60  ;;  %v4136_v20 = vrot.slane %v3053_v29, 2 }
  0xd7   : > { %v1266_v49 = vsel %vm805_vm3, %v4130_v40, %v1265_v42  ;;  %v1484_v52 = vsel %vm805_vm3, %v4132_v3, %v4131_v35  ;;  %4133 = vst [vmem:[#allocation41_spill] sm:$0xff] %v3350_v55  ;;  %4134 = vst [vmem:[#allocation42_spill] sm:$0xff] %v3357_v17  ;;  %v3360_v31 = vsel %vm805_vm3, %v1041_v2, %v1043_v10  ;;  %v3362_v40 = vpop.permute.xlu1 %772  ;;  %2283 = vmatpush3.bf16.msk.msra.mxu1 %vm3320_vm6, %v2278_v7  ;;  %v3377_v10 = vpop.permute.xlu0 %1336  ;;  %vm1132_vm4 = vcmask 261120  }
  0xd8   : > { %1281 = vrot.lane.b32.xlu1 %v1266_v49, %s2413_s16  ;;  %1499 = vrot.lane.b32.xlu0 %v1484_v52, %s2419_s20  ;;  %4135 = vst [vmem:[#allocation43_spill] sm:$0xff] %v3360_v31  ;;  %v923_v57 = vsel %vm805_vm3, %v4136_v20, %v922_v13  ;;  %v4137_v0 = vrot.slane %v3093_v62, 2  ;;  %v1374_v51 = vrot.slane %v3317_v47, 2  ;;  %v1168_v49 = vmul.f32 %v2930_v12, %v2687_v14 }
  0xd9   : > { %v737_v29 = vmul.f32 %v2791_v26, %v2719_v27  ;;  %v4138_v7 = vrot.slane %v3071_v33, 2  ;;  %v3386_v47 = vmul.f32 %v2898_v21, %v2719_v27  ;;  %v4041_v12 = vrot.slane %v2819_v34, 1 }
  0xda   : > { %v816_v53 = vsel %vm805_vm3, %v4137_v0, %v815_v61  ;;  %v1267_v9 = vrot.slane %v1168_v49, 2  ;;  %v4139_v5 = vrot.slane %v2694_v15, 1  ;;  %v4040_v2 = vrot.slane %v3176_v19, 1  ;;  %v4142_v0 = vld [vmem:[#allocation18_spill] sm:$0xff]  ;;  %v4189_v19 = vld [vmem:[#allocation20_spill] sm:$0xff] }
  0xdb   : > { %v1375_v62 = vsel %vm805_vm3, %v4138_v7, %v1374_v51  ;;  %v3388_v28 = vpop.permute.xlu1 %774  ;;  %v4042_v21 = vrot.slane %v3386_v47, 2  ;;  %v3402_v46 = vpop.permute.xlu0 %886  ;;  %v1191_v60 = vmul.f32 %v2791_v26, %v2727_v32  ;;  %v768_v3 = vrot.slane %v2615_v44, 1 }
  0xdc   : > { %938 = vrot.lane.b32.xlu1 %v923_v57, %s2417_s21  ;;  %831 = vrot.lane.b32.xlu0 %v816_v53, %s2415_s28  ;;  %v3398_v33 = vsel %vm754_vm1, %v4139_v5, %v4041_v12  ;;  %v1268_v25 = vsel %vm805_vm3, %v1265_v42, %v1267_v9  ;;  %v4140_v42 = vrot.slane %v2709_v23, 1  ;;  %v722_v20 = vmul.f32 %v3159_v38, %v2719_v27  ;;  %v4146_v5 = vld [vmem:[#allocation9_spill] sm:$0xff]  ;;  %v4158_v12 = vld [vmem:[#allocation27_spill] sm:$0xff] }
  0xdd   : > { %vm1582_vm6 = vcmask 785408   ;;  %vm1591_vm0 = vcmask 883712  }
  0xde   : > { %v3417_v35 = vsel %vm754_vm1, %v4140_v42, %v4040_v2  ;;  %v1176_v42 = vmul.f32 %v3159_v38, %v2727_v32 }
  0xdf   : > { %v3408_v50 = vpop.permute.xlu1 %1227  ;;  %v3425_v52 = vpop.permute.xlu0 %1229 }
  0xe0   : > { %1390 = vrot.lane.b32.xlu1 %v1375_v62, %s2416_s19  ;;  %970 = vrot.lane.b32.xlu0 %v737_v29, %s2413_s16  ;;  %4141 = vst [vmem:[#allocation44_spill] sm:$0xff] %v3425_v52  ;;  %v4144_v29 = vld [vmem:[#allocation28_spill] sm:$0xff] }
  0xe1   : > { %v4145_v7 = vrot.slane %v4144_v29, 2 }
  0xe3   : > { %v3429_v57 = vpop.permute.xlu1 %776  ;;  %v3437_v49 = vpop.permute.xlu0 %995  ;;  %v1377_v62 = vsel %vm805_vm3, %v1374_v51, %v4145_v7  ;;  %v4150_v7 = vld [vmem:[#allocation25_spill] sm:$0xff] }
  0xe4   : > { %782 = vrot.lane.b32.xlu1 %v2734_v24, %s2409_s25  ;;  %1283 = vrot.lane.b32.xlu0 %v1268_v25, %s2413_s16  ;;  %v925_v24 = vsel %vm805_vm3, %v922_v13, %v4042_v21  ;;  %v4143_v13 = vrot.slane %v2719_v27, 1  ;;  %v1221_v25 = vrot.slane %v4146_v5, 1  ;;  %v4159_v21 = vrot.slane %v4158_v12, 2 }
  0xe6   : > { %v769_v53 = vsel %vm754_vm1, %v4143_v13, %v768_v3  ;;  %v4149_v13 = vrot.slane %v2727_v32, 1 }
  0xe7   : > { %v3454_v51 = vpop.permute.xlu0 %1447 }
  0xe8   : > { %940 = vrot.lane.b32.xlu1 %v925_v24, %s2417_s21  ;;  %1422 = vrot.lane.b32.xlu0 %v1191_v60, %s2414_s17  ;;  %v3445_v60 = vpop.permute.xlu1 %1338  ;;  %v4147_v24 = vld [vmem:[#allocation26_spill] sm:$0xff]  ;;  %v1222_v29 = vsel %vm754_vm1, %v4149_v13, %v1221_v25  ;;  %v1192_v13 = vmul.f32 %v4150_v7, %v4146_v5 }
  0xec   : > { %1235 = vrot.lane.b32.xlu1 %v4142_v0, %s2406_s27  ;;  %863 = vrot.lane.b32.xlu0 %v722_v20, %s2406_s27  ;;  %v4148_v20 = vrot.slane %v4147_v24, 2  ;;  %v3461_v2 = vpop.permute.xlu1 %778  ;;  %v4154_v24 = vld [vmem:[#allocation29_spill] sm:$0xff] }
  0xed   : > { %4151 = vst [vmem:[#allocation18_spill] sm:$0xff] %v3461_v2  ;;  %v4171_v2 = vrot.slane %v3386_v47, 2  ;;  %v4174_v47 = vld [vmem:[#allocation35_spill] sm:$0xff] }
  0xee   : > { %v818_v0 = vsel %vm805_vm3, %v815_v61, %v4148_v20  ;;  %v3465_v61 = vpop.permute.xlu0 %888  ;;  %v4155_v20 = vrot.slane %v4154_v24, 2  ;;  %v4162_v24 = vld [vmem:[#allocation21_spill] sm:$0xff] }
  0xef   : > { %4153 = vst [vmem:[#allocation28_spill] sm:$0xff] %v3465_v61 }
  0xf0   : > { %1392 = vrot.lane.b32.xlu1 %v1377_v62, %s2416_s19  ;;  %999 = vrot.lane.b32.xlu0 %v769_v53, %s2410_s26  ;;  %v738_v62 = vmul.f32 %v4150_v7, %v2615_v44 }
  0xf4   : > { %833 = vrot.lane.b32.xlu1 %v818_v0, %s2415_s28  ;;  %1315 = vrot.lane.b32.xlu0 %v1176_v42, %s2412_s15  ;;  %v1270_v42 = vsel %vm805_vm3, %v1267_v9, %v4155_v20  ;;  %v3472_v0 = vpop.permute.xlu1 %1231  ;;  %v3483_v9 = vpop.permute.xlu0 %1340  ;;  %v770_v20 = vrot.slane %v4162_v24, 1 }
  0xf5   : > { %4157 = vst [vmem:[#allocation26_spill] sm:$0xff] %v3472_v0  ;;  %4161 = vst [vmem:[#allocation29_spill] sm:$0xff] %v3483_v9 }
  0xf8   : > { %972 = vrot.lane.b32.xlu1 %v738_v62, %s2413_s16  ;;  %1451 = vrot.lane.b32.xlu0 %v1222_v29, %s4152_s12  ;;  %v4160_v62 = vrot.slane %v3124_v43, 2  ;;  %v3488_v27 = vpop.permute.xlu1 %997  ;;  %v771_v43 = vsel %vm754_vm1, %v768_v3, %v770_v20  ;;  %v3493_v12 = vpop.permute.xlu0 %890 }
  0xf9   : > { %4164 = vst [vmem:[#allocation27_spill] sm:$0xff] %v3493_v12 }
  0xfa   : > { %v1034_v32 = vsel %vm805_vm3, %v4160_v62, %v4159_v21  ;;  %v4166_v21 = vld [vmem:[#allocation22_spill] sm:$0xff] }
  0xfb   : > { %v1193_v17 = vmul.f32 %v3159_v38, %v4166_v21 }
  0xfc   : > { %1285 = vrot.lane.b32.xlu1 %v1270_v42, %s2413_s16  ;;  %892 = vrot.lane.b32.xlu0 %v769_v53, %s4156_s14  ;;  %v723_v42 = vmul.f32 %v3247_v16, %v2615_v44  ;;  %v3499_v62 = vpop.permute.xlu1 %1449  ;;  %v1177_v44 = vmul.f32 %v3247_v16, %v4146_v5 }
 0x100   : > { %1424 = vrot.lane.b32.xlu1 %v1192_v13, %s2414_s17  ;;  %1049 = vrot.lane.b32.xlu0 %v1034_v32, %s2418_s22  ;;  %v4165_v32 = vld [vmem:[#allocation30_spill] sm:$0xff]  ;;  %v4047_v13 = vrot.slane %v4166_v21, 1  ;;  %v3510_v0 = vpop.permute.xlu1 %780 }
 0x102   : > { %v1224_v3 = vsel %vm754_vm1, %v1221_v25, %v4047_v13  ;;  %v4172_v13 = vld [vmem:[#allocation33_spill] sm:$0xff] }
 0x104   : > { %865 = vrot.lane.b32.xlu1 %v723_v42, %s2406_s27  ;;  %1344 = vrot.lane.b32.xlu0 %v1222_v29, %s4163_s18  ;;  %v3505_v42 = vpop.permute.xlu0 %1342 }
 0x105   : > { %4167 = vst [vmem:[#allocation21_spill] sm:$0xff] %v3505_v42  ;;  %v4169_v42 = vld [vmem:[#allocation31_spill] sm:$0xff] }
 0x106   : > { %v4170_v31 = vrot.slane %v4169_v42, 2 }
 0x108   : > { %1001 = vrot.lane.b32.xlu1 %v771_v43, %s2410_s26  ;;  %1501 = vrot.lane.b32.xlu0 %v4165_v32, %s2419_s20  ;;  %v4168_v32 = vld [vmem:[#allocation32_spill] sm:$0xff]  ;;  %v927_v25 = vsel %vm805_vm3, %v4171_v2, %v4170_v31  ;;  %v739_v31 = vmul.f32 %v3159_v38, %v4162_v24  ;;  %vm1564_vm3 = vcmask 588800  }
 0x10c   : > { %1317 = vrot.lane.b32.xlu1 %v1177_v44, %s2412_s15  ;;  %894 = vrot.lane.b32.xlu0 %v771_v43, %s4156_s14  ;;  %v3517_v44 = vpop.permute.xlu1 %1233 }
 0x10f   : > { %v856_v12 = vpop.permute.xlu0 %855 }
 0x110   : > { %1453 = vrot.lane.b32.xlu1 %v1224_v3, %s4152_s12  ;;  %1051 = vrot.lane.b32.xlu0 %v4168_v32, %s2418_s22 }
 0x113   : > { %v1308_v5 = vpop.permute.xlu0 %1307 }
 0x114   : > { %784 = vrot.lane.b32.xlu1 %v769_v53, %s2409_s25  ;;  %1346 = vrot.lane.b32.xlu0 %v1224_v3, %s4163_s18  ;;  %v4173_v53 = vld [vmem:[#allocation34_spill] sm:$0xff] }
 0x117   : > { %v3527_v32 = vpop.permute.xlu0 %966  ;;  %v3529_v9 = vpop.permute.xlu1 %857 }
 0x118   : > { %942 = vrot.lane.b32.xlu1 %v927_v25, %s2417_s21  ;;  %1503 = vrot.lane.b32.xlu0 %v4172_v13, %s2419_s20 }
 0x11b   : > { %v3534_v7 = vpop.permute.xlu0 %1418  ;;  %v3536_v42 = vpop.permute.xlu1 %1309 }
 0x11c   : > { %1237 = vrot.lane.b32.xlu1 %v1222_v29, %s2406_s27  ;;  %835 = vrot.lane.b32.xlu0 %v4173_v53, %s2415_s28  ;;  %v4176_v29 = vld [vmem:[#allocation36_spill] sm:$0xff] }
 0x11f   : > { %v3543_v2 = vpop.permute.xlu0 %859  ;;  %v3545_v13 = vpop.permute.xlu1 %968 }
 0x120   : > { %1394 = vrot.lane.b32.xlu1 %v4174_v47, %s2416_s19  ;;  %974 = vrot.lane.b32.xlu0 %v739_v31, %s2413_s16  ;;  %4175 = vst [vmem:[#allocation30_spill] sm:$0xff] %v3543_v2  ;;  %v4178_v47 = vld [vmem:[#allocation37_spill] sm:$0xff] }
 0x123   : > { %v3550_v25 = vpop.permute.xlu0 %1311  ;;  %v3552_v53 = vpop.permute.xlu1 %1420 }
 0x124   : > { %786 = vrot.lane.b32.xlu1 %v771_v43, %s2409_s25  ;;  %1287 = vrot.lane.b32.xlu0 %v4176_v29, %s2413_s16  ;;  %4177 = vst [vmem:[#allocation22_spill] sm:$0xff] %v3550_v25  ;;  %v724_v43 = vmul.f32 %v3215_v6, %v4162_v24  ;;  %v4180_v29 = vrot.slane %v2806_v39, 1  ;;  %v4185_v24 = vld [vmem:[#allocation11_spill] sm:$0xff] }
 0x126   : > { %v881_v25 = vsel %vm754_vm1, %v770_v20, %v4180_v29 }
 0x127   : > { %v824_v31 = vpop.permute.xlu0 %823  ;;  %v3559_v52 = vpop.permute.xlu1 %861 }
 0x128   : > { %944 = vrot.lane.b32.xlu1 %v4178_v47, %s2417_s21  ;;  %1426 = vrot.lane.b32.xlu0 %v1193_v17, %s2414_s17  ;;  %4179 = vst [vmem:[#allocation32_spill] sm:$0xff] %v3559_v52  ;;  %v4182_v47 = vld [vmem:[#allocation3_spill] sm:$0xff]  ;;  %v4184_v52 = vld [vmem:[#allocation38_spill] sm:$0xff] }
 0x129   : > { %v4183_v17 = vld [vmem:[#allocation19_spill] sm:$0xff] }
 0x12a   : > { %v1155_v14 = vmul.f32 %v4183_v17, %v4182_v47 }
 0x12b   : > { %v1276_v61 = vpop.permute.xlu0 %1275  ;;  %v3568_v55 = vpop.permute.xlu1 %1313 }
 0x12c   : > { %1239 = vrot.lane.b32.xlu1 %v1224_v3, %s2406_s27  ;;  %867 = vrot.lane.b32.xlu0 %v724_v43, %s2406_s27  ;;  %4181 = vst [vmem:[#allocation31_spill] sm:$0xff] %v3568_v55  ;;  %v652_v3 = vmul.f32 %v4183_v17, %v4185_v24  ;;  %v1521_v20 = vsel %vm1087_vm7, %v1155_v14, %v3292_v54  ;;  %v4186_v14 = vrot.slane %v2811_v41, 1  ;;  %v4187_v54 = vrot.slane %v4166_v21, 1  ;;  %v4188_v24 = vld [vmem:[#allocation10_spill] sm:$0xff] }
 0x12d   : > { %v1178_v55 = vmul.f32 %v3215_v6, %v4166_v21  ;;  %v653_v37 = vmul.f32 %v4189_v19, %v4188_v24 }
 0x12e   : > { %v1070_v47 = vsel %vm1069_vm8, %v652_v3, %v3362_v40  ;;  %v1333_v17 = vsel %vm754_vm1, %v4187_v54, %v4186_v14 }
 0x12f   : > { %v1387_v43 = vpop.permute.xlu0 %1386  ;;  %v826_v29 = vpop.permute.xlu1 %825  ;;  %v1079_v2 = vsel %vm1078_vm10, %v1070_v47, %v824_v31  ;;  %v1071_v21 = vsel %vm1069_vm8, %v653_v37, %v3388_v28  ;;  %v4190_v31 = vld [vmem:[#allocation2_spill] sm:$0xff] }
 0x130   : > { %1396 = vrot.lane.b32.xlu1 %v4184_v52, %s2416_s19  ;;  %1003 = vrot.lane.b32.xlu0 %v881_v25, %s2410_s26  ;;  %v1529_v52 = vsel %vm1114_vm9, %v1521_v20, %v1276_v61  ;;  %v1080_v47 = vsel %vm1078_vm10, %v1071_v21, %v826_v29 }
 0x131   : > { %v1538_v40 = vsel %vm1537_vm11, %v1529_v52, %v1308_v5  ;;  %v1156_v5 = vmul.f32 %v4189_v19, %v4190_v31  ;;  %v1179_v31 = vmul.f32 %v3311_v36, %v2811_v41 }
 0x132   : > { %v1547_v20 = vsel %vm1546_vm12, %v1538_v40, %v3377_v10  ;;  %v1089_v10 = vsel %vm1087_vm7, %v1080_v47, %v3529_v9  ;;  %v741_v47 = vmul.f32 %v3215_v6, %v2694_v15 }
 0x133   : > { %v1278_v61 = vpop.permute.xlu1 %1277  ;;  %v1522_v37 = vsel %vm1087_vm7, %v1156_v5, %v3408_v50  ;;  %v1556_v19 = vsel %vm1555_vm15, %v1547_v20, %v1387_v43  ;;  %v1194_v43 = vmul.f32 %v3247_v16, %v2811_v41 }
 0x134   : > { %837 = vrot.lane.b32.xlu1 %v3153_v22, %s2415_s28  ;;  %1319 = vrot.lane.b32.xlu0 %v1178_v55, %s2412_s15  ;;  %v3596_v3 = vpop.permute.xlu0 %827  ;;  %v740_v22 = vmul.f32 %v3247_v16, %v2806_v39  ;;  %v1088_v55 = vsel %vm1087_vm7, %v1079_v2, %v856_v12  ;;  %v1565_v9 = vsel %vm1564_vm3, %v1556_v19, %v3534_v7 }
 0x135   : > { %v1097_v12 = vsel %vm1096_vm13, %v1088_v55, %v3352_v45  ;;  %v1530_v45 = vsel %vm1114_vm9, %v1522_v37, %v1278_v61  ;;  %v1574_v40 = vsel %vm1573_vm5, %v1565_v9, %v3454_v51  ;;  %v4192_v37 = vld [vmem:[#allocation40_spill] sm:$0xff] }
 0x137   : > { %v935_v2 = vpop.permute.xlu1 %934 }
 0x138   : > { %976 = vrot.lane.b32.xlu1 %v740_v22, %s2413_s16  ;;  %1455 = vrot.lane.b32.xlu0 %v1333_v17, %s4152_s12  ;;  %v3612_v52 = vpop.permute.xlu0 %1279  ;;  %v1106_v28 = vsel %vm1105_vm14, %v1097_v12, %v935_v2  ;;  %v4191_v2 = vld [vmem:[#allocation12_spill] sm:$0xff] }
 0x139   : > { %v1115_v29 = vsel %vm1114_vm9, %v1106_v28, %v3527_v32  ;;  %v1098_v32 = vsel %vm1096_vm13, %v1089_v10, %v3402_v46  ;;  %v725_v46 = vmul.f32 %v3311_v36, %v2806_v39 }
 0x13a   : > { %v1124_v50 = vsel %vm1123_vm2, %v1115_v29, %v3437_v49 }
 0x13b   : > { %v937_v14 = vpop.permute.xlu1 %936 }
 0x13c   : > { %1289 = vrot.lane.b32.xlu1 %v3187_v58, %s2413_s16  ;;  %896 = vrot.lane.b32.xlu0 %v881_v25, %s4156_s14  ;;  %v1046_v54 = vpop.permute.xlu0 %1045  ;;  %v1539_v25 = vsel %vm1537_vm11, %v1530_v45, %v3536_v42  ;;  %v1107_v24 = vsel %vm1105_vm14, %v1098_v32, %v937_v14  ;;  %v4193_v45 = vld [vmem:[#allocation14_spill] sm:$0xff]  ;;  %v4194_v14 = vld [vmem:[#allocation13_spill] sm:$0xff] }
 0x13d   : > { %v1133_v58 = vsel %vm1132_vm4, %v1124_v50, %v1046_v54  ;;  %v1116_v42 = vsel %vm1114_vm9, %v1107_v24, %v3545_v13  ;;  %v1548_v61 = vsel %vm1546_vm12, %v1539_v25, %v3445_v60  ;;  %v1159_v50 = vmul.f32 %v3159_v38, %v4193_v45  ;;  %v4195_v54 = vld [vmem:[#allocation5_spill] sm:$0xff]  ;;  %v4196_v24 = vld [vmem:[#allocation23_spill] sm:$0xff] }
 0x13e   : > { %2242 = vmatprep.mubr.msk.f32.mxu0 %vm1537_vm11, %v1133_v58  ;;  %v1125_v51 = vsel %vm1123_vm2, %v1116_v42, %v3488_v27  ;;  %v742_v58 = vmul.f32 %v3311_v36, %v2819_v34 }
 0x13f   : > { %v1389_v49 = vpop.permute.xlu1 %1388 }
 0x140   : > { %1428 = vrot.lane.b32.xlu1 %v1194_v43, %s2414_s17  ;;  %1053 = vrot.lane.b32.xlu0 %v3207_v30, %s2418_s22  ;;  %v1498_v7 = vpop.permute.xlu0 %1497  ;;  %v1557_v22 = vsel %vm1555_vm15, %v1548_v61, %v1389_v49  ;;  %v993_v49 = vrot.slane %v4196_v24, 1  ;;  %v4198_v61 = vld [vmem:[#allocation30_spill] sm:$0xff] }
 0x141   : > { %v1583_v30 = vsel %vm1582_vm6, %v1574_v40, %v1498_v7  ;;  %v1566_v13 = vsel %vm1564_vm3, %v1557_v22, %v3552_v53  ;;  %v4197_v40 = vld [vmem:[#allocation39_spill] sm:$0xff] }
 0x142   : > { %2220 = vmatprep.mubr.msk.f32.mxu1 %vm1591_vm0, %v1583_v30  ;;  %v1575_v21 = vsel %vm1573_vm5, %v1566_v13, %v3499_v62  ;;  %v1196_v42 = vmul.f32 %v3311_v36, %v4197_v40  ;;  %v4199_v22 = vld [vmem:[#allocation15_spill] sm:$0xff] }
 0x143   : > { %v3655_v39 = vpop.permute.xlu1 %829 }
 0x144   : > { %869 = vrot.lane.b32.xlu1 %v725_v46, %s2406_s27  ;;  %1348 = vrot.lane.b32.xlu0 %v1333_v17, %s4163_s18  ;;  %v1048_v55 = vpop.permute.xlu0 %1047 }
 0x145   : > { %v1134_v60 = vsel %vm1132_vm4, %v1125_v51, %v1048_v55  ;;  %v4202_v55 = vld [vmem:[#allocation24_spill] sm:$0xff] }
 0x146   : > { %2243 = vmatmul.mubr.msk.f32.vlgmr.msra.gmra.mrb[0].mxu0 %vm1537_vm11, %v1134_v60  ;;  %v1445_v13 = vrot.slane %v4202_v55, 1  ;;  %v4203_v60 = vld [vmem:[#allocation8_spill] sm:$0xff] }
 0x148   : > { %1005 = vrot.lane.b32.xlu1 %v3243_v56, %s2410_s26  ;;  %1505 = vrot.lane.b32.xlu0 %v3257_v1, %s2419_s20 }
 0x14a   : > { %v3667_v17 = vpop.permute.xlu1 %1281  ;;  %v1500_v27 = vpop.permute.xlu0 %1499 }
 0x14b   : > { %v1584_v53 = vsel %vm1582_vm6, %v1575_v21, %v1500_v27  ;;  %v1157_v21 = vmul.f32 %v2791_v26, %v4203_v60 }
 0x14c   : > { %1321 = vrot.lane.b32.xlu1 %v1179_v31, %s2412_s15  ;;  %946 = vrot.lane.b32.xlu0 %v3275_v63, %s2417_s21 }
 0x14d   : > { %2221 = vmatmul.mubr.msk.f32.vlgmr.msra.gmra.mrb[0].mxu1 %vm1591_vm0, %v1584_v53 }
 0x14e   : > { %v3678_v1 = vpop.permute.xlu1 %938  ;;  %v832_v5 = vpop.permute.xlu0 %831 }
 0x150   : > { %1457 = vrot.lane.b32.xlu1 %v3285_v8, %s4152_s12  ;;  %1350 = vrot.lane.b32.xlu0 %v3285_v8, %s4163_s18 }
 0x152   : > { %v3684_v62 = vpop.permute.xlu1 %1390  ;;  %v3686_v41 = vpop.permute.xlu0 %970 }
 0x154   : > { %898 = vrot.lane.b32.xlu1 %v3243_v56, %s4156_s14  ;;  %1507 = vrot.lane.b32.xlu0 %v3278_v18, %s2419_s20  ;;  %v1195_v56 = vmul.f32 %v3215_v6, %v2709_v23  ;;  %v656_v18 = vmul.f32 %v3159_v38, %v4191_v2 }
 0x156   : > { %v783_v63 = vpop.permute.xlu1 %782  ;;  %v1284_v20 = vpop.permute.xlu0 %1283  ;;  %v1074_v15 = vsel %vm1069_vm8, %v656_v18, %v3510_v0  ;;  %v657_v0 = vmul.f32 %v3247_v16, %v4194_v14 }
 0x158   : > { %1055 = vrot.lane.b32.xlu1 %v3288_v59, %s2418_s22  ;;  %978 = vrot.lane.b32.xlu0 %v741_v47, %s2413_s16  ;;  %v1083_v59 = vsel %vm1078_vm10, %v1074_v15, %v832_v5  ;;  %v1075_v43 = vsel %vm1069_vm8, %v657_v0, %v783_v63  ;;  %v4204_v5 = vld [vmem:[#allocation28_spill] sm:$0xff] }
 0x15a   : > { %v3697_v8 = vpop.permute.xlu1 %940  ;;  %v3699_v12 = vpop.permute.xlu0 %1422 }
 0x15c   : > { %1398 = vrot.lane.b32.xlu1 %v4192_v37, %s2416_s19  ;;  %1430 = vrot.lane.b32.xlu0 %v1195_v56, %s2414_s17  ;;  %v4207_v37 = vrot.slane %v4197_v40, 1 }
 0x15e   : > { %v1236_v28 = vpop.permute.xlu1 %1235  ;;  %v864_v19 = vpop.permute.xlu0 %863  ;;  %v1446_v15 = vsel %vm754_vm1, %v4207_v37, %v1445_v13 }
 0x15f   : > { %v1092_v10 = vsel %vm1087_vm7, %v1083_v59, %v864_v19 }
 0x160   : > { %948 = vrot.lane.b32.xlu1 %v3330_v11, %s2417_s21  ;;  %1007 = vrot.lane.b32.xlu0 %v3398_v33, %s2410_s26  ;;  %v1525_v11 = vsel %vm1087_vm7, %v1159_v50, %v3517_v44  ;;  %v654_v33 = vmul.f32 %v2791_v26, %v4195_v54  ;;  %v4206_v26 = vld [vmem:[#allocation42_spill] sm:$0xff]  ;;  %v4210_v50 = vld [vmem:[#allocation25_spill] sm:$0xff] }
 0x161   : > { %v1533_v9 = vsel %vm1114_vm9, %v1525_v11, %v1284_v20  ;;  %v4211_v11 = vld [vmem:[#allocation29_spill] sm:$0xff] }
 0x162   : > { %v3716_v23 = vpop.permute.xlu1 %1392  ;;  %v1000_v29 = vpop.permute.xlu0 %999 }
 0x164   : > { %1400 = vrot.lane.b32.xlu1 %v3334_v4, %s2416_s19  ;;  %1459 = vrot.lane.b32.xlu0 %v3417_v35, %s4152_s12  ;;  %v1072_v35 = vsel %vm1069_vm8, %v654_v33, %v3429_v57  ;;  %v1160_v57 = vmul.f32 %v3247_v16, %v4199_v22 }
 0x165   : > { %v1081_v44 = vsel %vm1078_vm10, %v1072_v35, %v3596_v3  ;;  %v4201_v3 = vrot.slane %v2819_v34, 1  ;;  %v4205_v34 = vld [vmem:[#allocation44_spill] sm:$0xff] }
 0x166   : > { %v834_v38 = vpop.permute.xlu1 %833  ;;  %v1316_v32 = vpop.permute.xlu0 %1315  ;;  %v1090_v30 = vsel %vm1087_vm7, %v1081_v44, %v4198_v61  ;;  %v1526_v27 = vsel %vm1087_vm7, %v1160_v57, %v1236_v28  ;;  %v1523_v47 = vsel %vm1087_vm7, %v1157_v21, %v4205_v34  ;;  %v4217_v57 = vld [vmem:[#allocation26_spill] sm:$0xff] }
 0x167   : > { %v1084_v4 = vsel %vm1078_vm10, %v1075_v43, %v834_v38  ;;  %v1542_v25 = vsel %vm1537_vm11, %v1533_v9, %v1316_v32  ;;  %v994_v51 = vsel %vm754_vm1, %v4201_v3, %v993_v49  ;;  %v1099_v16 = vsel %vm1096_vm13, %v1090_v30, %v4204_v5  ;;  %v4212_v43 = vld [vmem:[#allocation18_spill] sm:$0xff]  ;;  %v4213_v32 = vld [vmem:[#allocation43_spill] sm:$0xff]  ;;  %v4214_v49 = vld [vmem:[#allocation32_spill] sm:$0xff] }
 0x168   : > { %980 = vrot.lane.b32.xlu1 %v742_v58, %s2413_s16  ;;  %1057 = vrot.lane.b32.xlu0 %v3347_v48, %s2418_s22  ;;  %v4200_v48 = vld [vmem:[#allocation41_spill] sm:$0xff]  ;;  %v1108_v56 = vsel %vm1105_vm14, %v1099_v16, %v3678_v1  ;;  %v1531_v2 = vsel %vm1114_vm9, %v1523_v47, %v3612_v52  ;;  %v4209_v52 = vld [vmem:[#allocation4_spill] sm:$0xff]  ;;  %vm4224_vm1 = vcmask 1040384  }
 0x169   : > { %v1117_v18 = vsel %vm1114_vm9, %v1108_v56, %v3686_v41  ;;  %v655_v41 = vmul.f32 %v4210_v50, %v4209_v52 }
 0x16a   : > { %v973_v7 = vpop.permute.xlu1 %972  ;;  %v1452_v46 = vpop.permute.xlu0 %1451  ;;  %v1126_v59 = vsel %vm1123_vm2, %v1117_v18, %v1000_v29 }
 0x16b   : > { %v1073_v9 = vsel %vm1069_vm8, %v655_v41, %v4212_v43 }
 0x16c   : > { %1432 = vrot.lane.b32.xlu1 %v1196_v42, %s2414_s17  ;;  %1509 = vrot.lane.b32.xlu0 %v4200_v48, %s2419_s20  ;;  %v1082_v58 = vsel %vm1078_vm10, %v1073_v9, %v3655_v39  ;;  %v4216_v39 = vld [vmem:[#allocation27_spill] sm:$0xff] }
 0x16d   : > { %v1091_v40 = vsel %vm1087_vm7, %v1082_v58, %v4214_v49 }
 0x16e   : > { %v1286_v31 = vpop.permute.xlu1 %1285  ;;  %v893_v53 = vpop.permute.xlu0 %892  ;;  %v1100_v22 = vsel %vm1096_vm13, %v1091_v40, %v4216_v39 }
 0x16f   : > { %v1534_v63 = vsel %vm1114_vm9, %v1526_v27, %v1286_v31  ;;  %v3764_v20 = vsel %vm1096_vm13, %v1092_v10, %v893_v53  ;;  %v4208_v10 = vld [vmem:[#allocation22_spill] sm:$0xff]  ;;  %v1109_v3 = vsel %vm1105_vm14, %v1100_v22, %v3697_v8  ;;  %v4218_v31 = vld [vmem:[#allocation31_spill] sm:$0xff] }
 0x170   : > { %1009 = vrot.lane.b32.xlu1 %v994_v51, %s2410_s26  ;;  %1511 = vrot.lane.b32.xlu0 %v4206_v26, %s2419_s20  ;;  %v1540_v45 = vsel %vm1537_vm11, %v1531_v2, %v4208_v10  ;;  %v1118_v55 = vsel %vm1114_vm9, %v1109_v3, %v973_v7  ;;  %v4220_v2 = vld [vmem:[#allocation16_spill] sm:$0xff]  ;;  %s3927_s26 = scalar_lea.vmem %s3988_s7, %s2542_s23  ;;  %s2136_s23 = sshll.u32 %s2514_s24, 1 }
 0x171   : > { %v1549_v54 = vsel %vm1546_vm12, %v1540_v45, %v4211_v11  ;;  %v658_v18 = vmul.f32 %v3215_v6, %v4220_v2  ;;  %s469_s17 = scalar_lea.vmem %s3989_s8, %s2136_s23 }
 0x172   : > { %v1425_v28 = vpop.permute.xlu1 %1424  ;;  %v1050_v19 = vpop.permute.xlu0 %1049  ;;  %v1558_v38 = vsel %vm1555_vm15, %v1549_v54, %v3684_v62  ;;  %v4215_v62 = vld [vmem:[#allocation7_spill] sm:$0xff] }
 0x173   : > { %v1135_v1 = vsel %vm1132_vm4, %v1126_v59, %v1050_v19  ;;  %v1567_v35 = vsel %vm1564_vm3, %v1558_v38, %v3699_v12  ;;  %v1158_v42 = vmul.f32 %v4210_v50, %v4215_v62 }
 0x174   : > { %1461 = vrot.lane.b32.xlu1 %v1446_v15, %s4152_s12  ;;  %2245 = vmatprep.mubr.msk.f32.mxu0 %vm1537_vm11, %v1135_v1 }
 0x175   : > { %v1524_v48 = vsel %vm1087_vm7, %v1158_v42, %v4217_v57 }
 0x176   : > { %v866_v14 = vpop.permute.xlu1 %865  ;;  %v1345_v0 = vpop.permute.xlu0 %1344  ;;  %v1532_v51 = vsel %vm1114_vm9, %v1524_v48, %v3667_v17 }
 0x177   : > { %v1093_v29 = vsel %vm1087_vm7, %v1084_v4, %v866_v14  ;;  %v3792_v33 = vsel %vm1546_vm12, %v1542_v25, %v1345_v0  ;;  %v1576_v4 = vsel %vm1573_vm5, %v1567_v35, %v1452_v46  ;;  %v1541_v53 = vsel %vm1537_vm11, %v1532_v51, %v4218_v31 }
 0x178   : > { %1059 = vrot.lane.b32.xlu1 %v4213_v32, %s2418_s22 }
 0x17a   : > { %v1002_v44 = vpop.permute.xlu1 %1001  ;;  %v1502_v25 = vpop.permute.xlu0 %1501 }
 0x17b   : > { %v1585_v24 = vsel %vm1582_vm6, %v1576_v4, %v1502_v25  ;;  %v1127_v13 = vsel %vm1123_vm2, %v1118_v55, %v1002_v44 }
 0x17c   : > { %2223 = vmatprep.mubr.msk.f32.mxu1 %vm1591_vm0, %v1585_v24 }
 0x17e   : > { %v1318_v61 = vpop.permute.xlu1 %1317  ;;  %v895_v30 = vpop.permute.xlu0 %894 }
 0x17f   : > { %v3814_v12 = vsel %vm1537_vm11, %v1534_v63, %v1318_v61  ;;  %v3817_v46 = vsel %vm1096_vm13, %v1093_v29, %v895_v30  ;;  %v4219_v63 = vld [vmem:[#allocation21_spill] sm:$0xff] }
 0x180   : > { %v1550_v8 = vsel %vm1546_vm12, %v1541_v53, %v4219_v63 }
 0x181   : > { %v1559_v17 = vsel %vm1555_vm15, %v1550_v8, %v3716_v23 }
 0x182   : > { %v1454_v60 = vpop.permute.xlu1 %1453  ;;  %v1052_v21 = vpop.permute.xlu0 %1051  ;;  %v1568_v7 = vsel %vm1564_vm3, %v1559_v17, %v1425_v28  ;;  %v4221_v28 = vld [vmem:[#allocation17_spill] sm:$0xff] }
 0x183   : > { %v1136_v27 = vsel %vm1132_vm4, %v1127_v13, %v1052_v21  ;;  %v1577_v34 = vsel %vm1573_vm5, %v1568_v7, %v1454_v60  ;;  %v1161_v10 = vmul.f32 %v3215_v6, %v4221_v28 }
 0x184   : > { %2246 = vmatmul.mubr.msk.f32.gmra.mrb[2].mxu0 %vm1537_vm11, %v1136_v27 }
 0x186   : > { %v785_v5 = vpop.permute.xlu1 %784  ;;  %v1347_v16 = vpop.permute.xlu0 %1346 }
 0x187   : > { %v1076_v37 = vsel %vm1069_vm8, %v658_v18, %v785_v5  ;;  %v1552_v13 = vsel %vm1546_vm12, %v3814_v12, %v1347_v16 }
 0x18a   : > { %v943_v47 = vpop.permute.xlu1 %942  ;;  %v1504_v56 = vpop.permute.xlu0 %1503 }
 0x18b   : > { %v1586_v26 = vsel %vm1582_vm6, %v1577_v34, %v1504_v56  ;;  %v1110_v4 = vsel %vm1105_vm14, %v3764_v20, %v943_v47 }
 0x18c   : > { %2224 = vmatmul.mubr.msk.f32.gmra.mrb[2].mxu1 %vm1591_vm0, %v1586_v26 }
 0x18e   : > { %v1238_v15 = vpop.permute.xlu1 %1237  ;;  %v836_v59 = vpop.permute.xlu0 %835 }
 0x18f   : > { %v1085_v19 = vsel %vm1078_vm10, %v1076_v37, %v836_v59  ;;  %v1527_v45 = vsel %vm1087_vm7, %v1161_v10, %v1238_v15 }
 0x192   : > { %v1395_v23 = vpop.permute.xlu1 %1394  ;;  %v975_v1 = vpop.permute.xlu0 %974 }
 0x193   : > { %v1119_v44 = vsel %vm1114_vm9, %v1110_v4, %v975_v1  ;;  %v1560_v61 = vsel %vm1555_vm15, %v3792_v33, %v1395_v23 }
 0x196   : > { %v3846_v52 = vpop.permute.xlu1 %786  ;;  %v1288_v50 = vpop.permute.xlu0 %1287 }
 0x197   : > { %v1535_v41 = vsel %vm1114_vm9, %v1527_v45, %v1288_v50 }
 0x19a   : > { %v945_v14 = vpop.permute.xlu1 %944  ;;  %v1427_v0 = vpop.permute.xlu0 %1426 }
 0x19b   : > { %v1569_v30 = vsel %vm1564_vm3, %v1560_v61, %v1427_v0  ;;  %v1111_v5 = vsel %vm1105_vm14, %v3817_v46, %v945_v14 }
 0x19e   : > { %v3849_v11 = vpop.permute.xlu1 %1239  ;;  %v868_v54 = vpop.permute.xlu0 %867 }
 0x19f   : > { %v1094_v26 = vsel %vm1087_vm7, %v1085_v19, %v868_v54  ;;  %v4222_v54 = vld [vmem:[#allocation9_spill] sm:$0xff] }
 0x1a2   : > { %v1397_v29 = vpop.permute.xlu1 %1396  ;;  %v1004_v43 = vpop.permute.xlu0 %1003 }
 0x1a3   : > { %v1128_v25 = vsel %vm1123_vm2, %v1119_v44, %v1004_v43  ;;  %v1561_v60 = vsel %vm1555_vm15, %v1552_v13, %v1397_v29  ;;  %v1162_v29 = vmul.f32 %v3311_v36, %v4222_v54 }
 0x1a6   : > { %v3851_v9 = vpop.permute.xlu1 %837  ;;  %v1320_v38 = vpop.permute.xlu0 %1319 }
 0x1a7   : > { %v1544_v37 = vsel %vm1537_vm11, %v1535_v41, %v1320_v38  ;;  %v1528_v38 = vsel %vm1087_vm7, %v1162_v29, %v3849_v11 }
 0x1aa   : > { %v977_v32 = vpop.permute.xlu1 %976  ;;  %v1456_v58 = vpop.permute.xlu0 %1455 }
 0x1ab   : > { %v1578_v20 = vsel %vm1573_vm5, %v1569_v30, %v1456_v58  ;;  %v1120_v63 = vsel %vm1114_vm9, %v1111_v5, %v977_v32  ;;  %v4223_v32 = vld [vmem:[#allocation6_spill] sm:$0xff] }
 0x1ac   : > { %v659_v58 = vmul.f32 %v3311_v36, %v4223_v32 }
 0x1ae   : > { %v3853_v6 = vpop.permute.xlu1 %1289  ;;  %v897_v35 = vpop.permute.xlu0 %896 }
 0x1af   : > { %v1103_v18 = vsel %vm1096_vm13, %v1094_v26, %v897_v35  ;;  %v1536_v35 = vsel %vm1114_vm9, %v1528_v38, %v3853_v6 }
 0x1b2   : > { %v1429_v24 = vpop.permute.xlu1 %1428  ;;  %v1054_v49 = vpop.permute.xlu0 %1053 }
 0x1b3   : > { %v1137_v40 = vsel %vm1132_vm4, %v1128_v25, %v1054_v49  ;;  %v1570_v33 = vsel %vm1564_vm3, %v1561_v60, %v1429_v24  ;;  %v1077_v25 = vsel %vm1069_vm8, %v659_v58, %v3846_v52 }
 0x1b4   : > { %2248 = vmatprep.mubr.msk.f32.mxu0 %vm1537_vm11, %v1137_v40  ;;  %v1086_v49 = vsel %vm1078_vm10, %v1077_v25, %v3851_v9 }
 0x1b6   : > { %v3861_v62 = vpop.permute.xlu1 %869  ;;  %v1349_v42 = vpop.permute.xlu0 %1348 }
 0x1b7   : > { %v1553_v59 = vsel %vm1546_vm12, %v1544_v37, %v1349_v42  ;;  %v1095_v11 = vsel %vm1087_vm7, %v1086_v49, %v3861_v62 }
 0x1ba   : > { %v1006_v39 = vpop.permute.xlu1 %1005  ;;  %v1506_v22 = vpop.permute.xlu0 %1505 }
 0x1bb   : > { %v1587_v57 = vsel %vm1582_vm6, %v1578_v20, %v1506_v22  ;;  %v1129_v8 = vsel %vm1123_vm2, %v1120_v63, %v1006_v39 }
 0x1bc   : > { %2226 = vmatprep.mubr.msk.f32.mxu1 %vm1591_vm0, %v1587_v57 }
 0x1be   : > { %v1322_v48 = vpop.permute.xlu1 %1321  ;;  %v947_v3 = vpop.permute.xlu0 %946 }
 0x1bf   : > { %v1112_v15 = vsel %vm1105_vm14, %v1103_v18, %v947_v3  ;;  %v1545_v44 = vsel %vm1537_vm11, %v1536_v35, %v1322_v48 }
 0x1c2   : > { %v1458_v51 = vpop.permute.xlu1 %1457  ;;  %v1351_v55 = vpop.permute.xlu0 %1350 }
 0x1c3   : > { %v1579_v21 = vsel %vm1573_vm5, %v1570_v33, %v1458_v51  ;;  %v1554_v24 = vsel %vm1546_vm12, %v1545_v44, %v1351_v55 }
 0x1c6   : > { %v899_v27 = vpop.permute.xlu1 %898  ;;  %v1508_v31 = vpop.permute.xlu0 %1507 }
 0x1c7   : > { %v1588_v53 = vsel %vm1582_vm6, %v1579_v21, %v1508_v31  ;;  %v1104_v42 = vsel %vm1096_vm13, %v1095_v11, %v899_v27 }
 0x1c8   : > { %2227 = vmatmul.mubr.msk.f32.gmra.mrb[4].mxu1 %vm1591_vm0, %v1588_v53 }
 0x1ca   : > { %v1056_v12 = vpop.permute.xlu1 %1055  ;;  %v979_v16 = vpop.permute.xlu0 %978 }
 0x1cb   : > { %v1138_v17 = vsel %vm1132_vm4, %v1129_v8, %v1056_v12  ;;  %v1121_v23 = vsel %vm1114_vm9, %v1112_v15, %v979_v16 }
 0x1cc   : > { %2249 = vmatmul.mubr.msk.f32.gmra.mrb[4].mxu0 %vm1537_vm11, %v1138_v17 }
 0x1ce   : > { %v1399_v7 = vpop.permute.xlu1 %1398  ;;  %v1431_v34 = vpop.permute.xlu0 %1430 }
 0x1cf   : > { %v1562_v1 = vsel %vm1555_vm15, %v1553_v59, %v1399_v7 }
 0x1d0   : > { %v1571_v50 = vsel %vm1564_vm3, %v1562_v1, %v1431_v34 }
 0x1d2   : > { %v949_v47 = vpop.permute.xlu1 %948  ;;  %v1008_v56 = vpop.permute.xlu0 %1007 }
 0x1d3   : > { %v1130_v28 = vsel %vm1123_vm2, %v1121_v23, %v1008_v56  ;;  %v1113_v52 = vsel %vm1105_vm14, %v1104_v42, %v949_v47 }
 0x1d6   : > { %v1401_v2 = vpop.permute.xlu1 %1400  ;;  %v1460_v46 = vpop.permute.xlu0 %1459 }
 0x1d7   : > { %v1580_v41 = vsel %vm1573_vm5, %v1571_v50, %v1460_v46  ;;  %v1563_v40 = vsel %vm1555_vm15, %v1554_v24, %v1401_v2 }
 0x1da   : > { %v981_v10 = vpop.permute.xlu1 %980  ;;  %v1058_v45 = vpop.permute.xlu0 %1057 }
 0x1db   : > { %v1139_v19 = vsel %vm1132_vm4, %v1130_v28, %v1058_v45  ;;  %v1122_v9 = vsel %vm1114_vm9, %v1113_v52, %v981_v10 }
 0x1dc   : > { %2251 = vmatprep.mubr.msk.f32.mxu0 %vm1537_vm11, %v1139_v19 }
 0x1de   : > { %v1433_v14 = vpop.permute.xlu1 %1432  ;;  %v1510_v0 = vpop.permute.xlu0 %1509 }
 0x1df   : > { %v1589_v43 = vsel %vm1582_vm6, %v1580_v41, %v1510_v0  ;;  %v1572_v36 = vsel %vm1564_vm3, %v1563_v40, %v1433_v14 }
 0x1e0   : > { %2229 = vmatprep.mubr.msk.f32.mxu1 %vm1591_vm0, %v1589_v43 }
 0x1e2   : > { %v1010_v4 = vpop.permute.xlu1 %1009  ;;  %v1512_v61 = vpop.permute.xlu0 %1511 }
 0x1e3   : > { %v1131_v39 = vsel %vm1123_vm2, %v1122_v9, %v1010_v4 }
 0x1e6   : > { %v1462_v6 = vpop.permute.xlu1 %1461 }
 0x1e7   : > { %v1581_v30 = vsel %vm1573_vm5, %v1572_v36, %v1462_v6 }
 0x1e8   : > { %v1590_v20 = vsel %vm1582_vm6, %v1581_v30, %v1512_v61 }
 0x1e9   : > { %2230 = vmatmul.mubr.msk.f32.gmra.mrb[6].mxu1 %vm1591_vm0, %v1590_v20  ;;  %vm1916_vm0 = vcmask 123904  }
 0x1ea   : > { %v1060_v62 = vpop.permute.xlu1 %1059 }
 0x1eb   : > { %v1140_v22 = vsel %vm1132_vm4, %v1131_v39, %v1060_v62 }
 0x1ec   : > { %2252 = vmatmul.mubr.msk.f32.gmra.mrb[6].mxu0 %vm1537_vm11, %v1140_v22 }
 0x219   : > { %v2244_v57 = vpop.f32.mrb[0].mxu0 }
 0x21a   : > { %v1818_v48 = vpop.f32.mrb[1].mxu0 }
 0x220   : > { %v2222_v3 = vpop.f32.mrb[0].mxu1 }
 0x221   : > { %v1824_v51 = vadd.f32 %v2244_v57, %v2222_v3  ;;  %v1686_v55 = vpop.f32.mrb[1].mxu1 }
 0x222   : > { %v1819_v13 = vadd.f32 %v1818_v48, %v1686_v55 }
 0x223   : > { %1858 = vst.msk [vmem:[%s3927_s26 + $0x8] sm:$0xff] %vm1096_vm13, %v1824_v51  ;;  %v1866_v60 = vsel %vm1096_vm13, %v1824_v51, 0.0  ;;  %v1887_v33 = vmul.f32 %v1824_v51, %v1824_v51 }
 0x224   : > { %1857 = vst.msk [vmem:[%s3927_s26] sm:$0xff] %vm1096_vm13, %v1819_v13  ;;  %v1865_v21 = vsel %vm1096_vm13, %v1819_v13, 0.0  ;;  %v1886_v27 = vmul.f32 %v1819_v13, %v1819_v13 }
 0x225   : > { %v1895_v31 = vsel %vm1096_vm13, %v1887_v33, 0.0  ;;  %v1867_v53 = vadd.f32 %v1866_v60, %v1865_v21 }
 0x226   : > { %v1894_v5 = vsel %vm1096_vm13, %v1886_v27, 0.0 }
 0x227   : > { %v1896_v63 = vadd.f32 %v1895_v31, %v1894_v5 }
 0x257   : > { %v2247_v8 = vpop.f32.mrb[2].mxu0 }
 0x258   : > { %v1828_v12 = vpop.f32.mrb[3].mxu0 }
 0x25f   : > { %v2225_v16 = vpop.f32.mrb[2].mxu1 }
 0x260   : > { %v1834_v17 = vadd.f32 %v2247_v8, %v2225_v16  ;;  %v1696_v7 = vpop.f32.mrb[3].mxu1 }
 0x261   : > { %v1829_v34 = vadd.f32 %v1828_v12, %v1696_v7 }
 0x262   : > { %1860 = vst.msk [vmem:[%s3927_s26 + $0x18] sm:$0xff] %vm1096_vm13, %v1834_v17  ;;  %v1889_v47 = vmul.f32 %v1834_v17, %v1834_v17  ;;  %v1870_v46 = vsel %vm1096_vm13, %v1834_v17, 0.0 }
 0x263   : > { %1859 = vst.msk [vmem:[%s3927_s26 + $0x10] sm:$0xff] %vm1096_vm13, %v1829_v34  ;;  %v1868_v56 = vsel %vm1096_vm13, %v1829_v34, 0.0  ;;  %v1888_v26 = vmul.f32 %v1829_v34, %v1829_v34 }
 0x264   : > { %v1869_v2 = vadd.f32 %v1868_v56, %v1867_v53  ;;  %v1899_v59 = vsel %vm1096_vm13, %v1889_v47, 0.0 }
 0x265   : > { %v1897_v18 = vsel %vm1096_vm13, %v1888_v26, 0.0 }
 0x266   : > { %v1898_v37 = vadd.f32 %v1897_v18, %v1896_v63  ;;  %v1871_v15 = vadd.f32 %v1870_v46, %v1869_v2 }
 0x268   : > { %v1900_v23 = vadd.f32 %v1899_v59, %v1898_v37 }
 0x29b   : > { %v2228_v1 = vpop.f32.mrb[4].mxu1 }
 0x29c   : > { %v1706_v28 = vpop.f32.mrb[5].mxu1 }
 0x29f   : > { %v2250_v10 = vpop.f32.mrb[4].mxu0 }
 0x2a0   : > { %v1844_v45 = vadd.f32 %v2250_v10, %v2228_v1  ;;  %v1838_v19 = vpop.f32.mrb[5].mxu0 }
 0x2a1   : > { %v1839_v50 = vadd.f32 %v1838_v19, %v1706_v28 }
 0x2a2   : > { %1862 = vst.msk [vmem:[%s3927_s26 + $0x28] sm:$0xff] %vm1096_vm13, %v1844_v45  ;;  %v1891_v41 = vmul.f32 %v1844_v45, %v1844_v45  ;;  %v1874_v29 = vsel %vm1096_vm13, %v1844_v45, 0.0 }
 0x2a3   : > { %1861 = vst.msk [vmem:[%s3927_s26 + $0x20] sm:$0xff] %vm1096_vm13, %v1839_v50  ;;  %v1872_v14 = vsel %vm1096_vm13, %v1839_v50, 0.0  ;;  %v1890_v0 = vmul.f32 %v1839_v50, %v1839_v50 }
 0x2a4   : > { %v1873_v54 = vadd.f32 %v1872_v14, %v1871_v15  ;;  %v1903_v58 = vsel %vm1096_vm13, %v1891_v41, 0.0 }
 0x2a5   : > { %v1901_v43 = vsel %vm1096_vm13, %v1890_v0, 0.0 }
 0x2a6   : > { %v1902_v38 = vadd.f32 %v1901_v43, %v1900_v23  ;;  %v1875_v32 = vadd.f32 %v1874_v29, %v1873_v54 }
 0x2a8   : > { %v1904_v35 = vadd.f32 %v1903_v58, %v1902_v38 }
 0x2bc   : > { %v2231_v4 = vpop.f32.mrb[6].mxu1 }
 0x2bd   : > { %v1716_v44 = vpop.f32.mrb[7].mxu1 }
 0x2bf   : > { %v2253_v25 = vpop.f32.mrb[6].mxu0 }
 0x2c0   : > { %v1854_v24 = vadd.f32 %v2253_v25, %v2231_v4  ;;  %v1848_v49 = vpop.f32.mrb[7].mxu0 }
 0x2c1   : > { %v1849_v40 = vadd.f32 %v1848_v49, %v1716_v44 }
 0x2c2   : > { %1864 = vst.msk [vmem:[%s3927_s26 + $0x38] sm:$0xff] %vm1096_vm13, %v1854_v24  ;;  %v1893_v11 = vmul.f32 %v1854_v24, %v1854_v24  ;;  %v1878_v61 = vsel %vm1096_vm13, %v1854_v24, 0.0 }
 0x2c3   : > { %1863 = vst.msk [vmem:[%s3927_s26 + $0x30] sm:$0xff] %vm1096_vm13, %v1849_v40  ;;  %v1876_v36 = vsel %vm1096_vm13, %v1849_v40, 0.0  ;;  %v1892_v6 = vmul.f32 %v1849_v40, %v1849_v40 }
 0x2c4   : > { %v1877_v42 = vadd.f32 %v1876_v36, %v1875_v32  ;;  %v1907_v9 = vsel %vm1096_vm13, %v1893_v11, 0.0 }
 0x2c5   : > { %v1905_v30 = vsel %vm1096_vm13, %v1892_v6, 0.0 }
 0x2c6   : > { %v1879_v52 = vadd.f32 %v1878_v61, %v1877_v42  ;;  %v1906_v20 = vadd.f32 %v1905_v30, %v1904_v35 }
 0x2c8   : > { %v1880_v39 = vrot.slane %v1879_v52, 4  ;;  %v1908_v62 = vadd.f32 %v1907_v9, %v1906_v20 }
 0x2ca   : > { %v1881_v22 = vadd.f32 %v1880_v39, %v1879_v52  ;;  %v1909_v57 = vrot.slane %v1908_v62, 4 }
 0x2cc   : > { %v1882_v48 = vrot.slane %v1881_v22, 2  ;;  %v1910_v3 = vadd.f32 %v1909_v57, %v1908_v62 }
 0x2ce   : > { %v1883_v51 = vadd.f32 %v1882_v48, %v1881_v22  ;;  %v1911_v55 = vrot.slane %v1910_v3, 2 }
 0x2d0   : > { %v1884_v13 = vrot.slane %v1883_v51, 1  ;;  %v1912_v60 = vadd.f32 %v1911_v55, %v1910_v3 }
 0x2d2   : > { %v1913_v33 = vrot.slane %v1912_v60, 1  ;;  %v1885_v21 = vadd.f32 %v1884_v13, %v1883_v51 }
 0x2d4   : > { %v1914_v27 = vadd.f32 %v1913_v33, %v1912_v60 }
 0x2d6   : > { %v1915_v31 = vsel %vm4224_vm1, %v1885_v21, %v1914_v27 }
 0x2d7   : > { %1917 = vst.msk [vmem:[%s469_s17] sm:$0x3] %vm1916_vm0, %v1915_v31 }
 0x2d8 PF: > { %s19_s9 = sadd.s32 1, %s2402_s9   ;;  %s4225_s27 = smov %s2394_s29 }
 0x2d9   : > { %p16_p8 = scmp.ge.s32.totalorder %s19_s9, 10   ;;  %s4226_s28 = smov %s2398_s30 }
 0x2da   : > { %s4227_s29 = smov %s4230_s10  ;;  %s4228_s30 = smov %s4234_s11 }
 0x2db   :  { %18 = sbr.rel (!%p16_p8) target bundleno = 3 (0x3), region = 99 }

// kernel: upsample_gn_forward.4
= control target key start
LH: loop header
LB: loop body
LE: loop exit
PB: predicated region body
PF: predicated region fallthrough
CT: control target
= control target key end

     0   :  { %s1779_s24 = smov 0   ;;  %s1781_s25 = smov 0   ;;  %s2561_s0 = inlined_call_operand.vmem [shape: f32[64,2], index: 0, kind: input, shape index: {}]   ;;  %s2562_s1 = inlined_call_operand.vmem [shape: f32[2,256,16], index: 1, kind: input, shape index: {}]   ;;  %s2563_s2 = inlined_call_operand.vmem [shape: f32[2,4,32,16], index: 2, kind: input, shape index: {}]   ;;  %s2564_s3 = inlined_call_operand.vmem [shape: f32[2,1,16], index: 3, kind: input, shape index: {}]   ;;  %s2565_s4 = inlined_call_operand.vmem [shape: f32[2,1,16], index: 4, kind: input, shape index: {}]   ;;  %s2566_s5 = inlined_call_operand.vmem [shape: f32[144,16], index: 5, kind: input, shape index: {}]   ;;  %s2567_s6 = inlined_call_operand.vmem [shape: f32[2,256,16], index: 6, kind: output, shape index: {0}]   ;;  %s2568_s7 = inlined_call_operand.vmem [shape: f32[2,4,2,16], index: 7, kind: output, shape index: {1}]  }
   0x1   :  { %s1783_s26 = smov 0   ;;  %s1785_s27 = smov 0  }
   0x2   :  { %s1787_s28 = smov 0  }
   0x3 LB: > { %s27_s29 = sadd.s32 1, %s1719_s26  ;;  %s30_s30 = sadd.s32 1, %s1723_s27  ;;  %s1727_s28 = sphi %s1787_s28, %s18_s28   ;;  %s1723_s27 = sphi %s1785_s27, %s2579_s27   ;;  %s1719_s26 = sphi %s1783_s26, %s2578_s26   ;;  %s1715_s25 = sphi %s1781_s25, %s2577_s25   ;;  %s1711_s24 = sphi %s1779_s24, %s2576_s24  }
   0x4   : > { %p28_p0 = scmp.ge.s32.totalorder %s27_s29, 4  ;;  %p1436_p1 = scmp.ge.s32.totalorder %s1727_s28, 1 }
   0x5   : > { %p295_p2 = scmp.lt.s32.totalorder %s1727_s28, 9 }
   0x6   : > { %s2581_s29 = smov (%p28_p0, %s27_s29), 0  ;;  %s2583_s30 = smov (!%p28_p0, %s30_s30), %s1723_s27 }
   0x7   : > { %p296_p3 = pnand %p1436_p1, %p295_p2  ;;  %p32_p4 = scmp.ge.s32.totalorder %s2583_s30, 2 }
   0x8   : > { %v1814_v0 = vld [vmem:[%s2561_s0 + $0x10] sm:$0xff] (!%p296_p3)  ;;  %v570_v1 = vld [vmem:[%s2561_s0] sm:$0xff] (!%p296_p3)  ;;  %s1437_s12 = sshll.u32 (!%p296_p3), %s1711_s24, 3  ;;  %v1729_v2 = vmov (!%p296_p3), 1   ;;  %p359_p5 = scmp.lt.s32.totalorder (!%p296_p3), %s1715_s25, 1  ;;  %v1827_v3 = vld [vmem:[%s2561_s0 + $0x8] sm:$0xff] (!%p296_p3) }
   0x9   : > { %s2585_s30 = smov (%p32_p4, %s2583_s30), 0  ;;  %299 = sbr.rel (%p296_p3) target bundleno = 556 (0x22c), region = 44 }
   0xa   : > { %1556 = vset.pattern.permute.xlu1 (!%p296_p3), %v1729_v2  ;;  %1555 = vset.pattern.permute.xlu0 (!%p296_p3), %v1729_v2  ;;  %p361_p6 = scmp.lt.s32.totalorder (!%p296_p3), %s1437_s12, 31  ;;  %p370_p7 = scmp.lt.s32.totalorder (!%p296_p3), %s1711_s24, 3  ;;  %v1730_v4 = vmov (!%p296_p3), 0   ;;  %v1844_v5 = vld [vmem:[%s2561_s0 + $0x18] sm:$0xff] (!%p296_p3)  ;;  %v1851_v6 = vld [vmem:[%s2561_s0 + $0x20] sm:$0xff] (!%p296_p3)  ;;  %v1881_v17 = vld [vmem:[%s2561_s0 + $0x28] sm:$0xff] (!%p296_p3) }
   0xb   : > { %633 = vperm.xlu1 (!%p296_p3), %1556, %v1814_v0   ;;  %627 = vperm.xlu0 (!%p296_p3), %1555, %v570_v1   ;;  %p487_p8 = scmp.gt.s32.totalorder (!%p296_p3), %s1711_s24, 0  ;;  %vm501_vm0 = vcmask (!%p296_p3), 1040384   ;;  %v1900_v30 = vld [vmem:[%s2561_s0 + $0x30] sm:$0xff] (!%p296_p3)  ;;  %vm720_vm4 = vcmask (!%p296_p3), 1046528   ;;  %v577_v62 = vld [vmem:[%s2561_s0 + $0x38] sm:$0xff] (!%p296_p3)  ;;  %s1731_s20 = smov (!%p296_p3), 64  }
   0xc   : > { %vm650_vm14 = vcmask (!%p296_p3), 1041408   ;;  %vm771_vm15 = vcmask (!%p296_p3), 1045504  }
   0xf   : > { %1557 = vset.pattern.permute.xlu1 (!%p296_p3), %v1730_v4  ;;  %630 = vperm.xlu0 (!%p296_p3), %1555, %v1827_v3  }
  0x10   : > { %s2587_s25 = smov (!%p359_p5, %s1715_s25), 1  ;;  %s2589_s12 = smov (!%p361_p6, %s1437_s12), 31  ;;  %580 = vperm.xlu1 %1557, %v570_v1  }
  0x11   : > { %s1438_s15 = sshll.u32 %s2587_s25, 5  ;;  %s379_s19 = scalar_lea.vmem %s2564_s3, %s2587_s25 }
  0x12   : > { %s1835_s16 = sadd.s32 %s1438_s15, %s2589_s12  ;;  %s1441_s23 = sshll.u32 %s2587_s25, 4  ;;  %v1862_v7 = vld [vmem:[%s379_s19] ss:$0 sm:$0xff] }
  0x13   : > { %s1439_s22 = sshll.u32 %s1835_s16, 3  ;;  %s382_s15 = scalar_lea.vmem %s2565_s4, %s2587_s25  ;;  %636 = vperm.xlu0 %1555, %v1844_v5  }
  0x14   : > { %s366_s12 = scalar_lea.vmem %s2562_s1, %s1439_s22  ;;  %1558 = vset.pattern.permute.xlu1 %v1729_v2  ;;  %v1884_v18 = vld [vmem:[%s382_s15] ss:$0 sm:$0xff]  ;;  %s1738_s15 = smov 80  }
  0x15   : > { %s1867_s17 = scalar_select %p370_p7, %s1711_s24, 3  ;;  %v403_v8 = vld [vmem:[%s366_s12] sm:$0xff]  ;;  %v404_v9 = vld [vmem:[%s366_s12 + $0x8] sm:$0xff]  ;;  %v405_v10 = vld [vmem:[%s366_s12 + $0x10] sm:$0xff]  ;;  %639 = vperm.xlu1 %1558, %v1851_v6  }
  0x16   : > { %v417_v11 = vmul.f32 %v1862_v7, %v403_v8  ;;  %v418_v12 = vmul.f32 %v1862_v7, %v404_v9  ;;  %v419_v13 = vmul.f32 %v1862_v7, %v405_v10  ;;  %s1875_s18 = scalar_select %p487_p8, 1, 0  ;;  %v406_v14 = vld [vmem:[%s366_s12 + $0x18] sm:$0xff]  ;;  %v407_v15 = vld [vmem:[%s366_s12 + $0x20] sm:$0xff]  ;;  %v408_v16 = vld [vmem:[%s366_s12 + $0x28] sm:$0xff] }
  0x17   : > { %s1440_s21 = sshll.u32 %s1867_s17, 2  ;;  %v420_v19 = vmul.f32 %v1862_v7, %v406_v14  ;;  %v421_v20 = vmul.f32 %v1862_v7, %v407_v15  ;;  %v422_v21 = vmul.f32 %v1862_v7, %v408_v16  ;;  %v409_v22 = vld [vmem:[%s366_s12 + $0x30] sm:$0xff]  ;;  %v410_v26 = vld [vmem:[%s366_s12 + $0x38] sm:$0xff]  ;;  %642 = vperm.xlu0 %1555, %v1881_v17   ;;  %s1446_s16 = sshll.u32 %s2587_s25, 2 }
  0x18   : > { %s374_s8 = sadd.s32 %s1441_s23, %s1440_s21  ;;  %v431_v23 = vadd.f32 %v1884_v18, %v417_v11  ;;  %v432_v24 = vadd.f32 %v1884_v18, %v418_v12  ;;  %v433_v25 = vadd.f32 %v1884_v18, %v419_v13  ;;  %v423_v29 = vmul.f32 %v1862_v7, %v409_v22  ;;  %s489_s14 = scvt.s32.f32 %s1875_s18 }
  0x19   : > { %s1442_s9 = sshll.u32 %s374_s8, 3  ;;  %v434_v27 = vadd.f32 %v1884_v18, %v420_v19  ;;  %v435_v28 = vadd.f32 %v1884_v18, %v421_v20  ;;  %v436_v36 = vadd.f32 %v1884_v18, %v422_v21  ;;  %v424_v37 = vmul.f32 %v1862_v7, %v410_v26  ;;  %1559 = vset.pattern.permute.xlu1 %v1730_v4  ;;  %s1732_s21 = smov 16  }
  0x1a   : > { %s1905_s12 = scalar_lea.vmem %s2563_s2, %s1442_s9  ;;  %vm439_vm1 = vcmp.gt.f32.partialorder %v431_v23, 0.0  ;;  %vm440_vm2 = vcmp.gt.f32.partialorder %v432_v24, 0.0  ;;  %vm441_vm3 = vcmp.gt.f32.partialorder %v433_v25, 0.0  ;;  %v447_v31 = vmul.f32 0.01, %v431_v23  ;;  %585 = vperm.xlu1 %1559, %v1827_v3   ;;  %s1733_s8 = smov 112  }
  0x1b   : > { %v448_v32 = vmul.f32 0.01, %v432_v24  ;;  %v449_v33 = vmul.f32 0.01, %v433_v25  ;;  %v464_v34 = vld [vmem:[%s1905_s12 + $0x8] sm:$0xff]  ;;  %v463_v35 = vld [vmem:[%s1905_s12] sm:$0xff]  ;;  %645 = vperm.xlu0 %1555, %v1900_v30   ;;  %v490_v49 = vstv %s489_s14  ;;  %v437_v1 = vadd.f32 %v1884_v18, %v423_v29 }
  0x1c   : > { %v455_v38 = vsel %vm439_vm1, %v431_v23, %v447_v31  ;;  %v468_v39 = vmul.f32 %v1862_v7, %v464_v34  ;;  %v467_v40 = vmul.f32 %v1862_v7, %v463_v35  ;;  %vm442_vm5 = vcmp.gt.f32.partialorder %v434_v27, 0.0  ;;  %s1965_s19 = scalar_select %p370_p7, 1, 0  ;;  %v465_v31 = vld [vmem:[%s1905_s12 + $0x10] sm:$0xff]  ;;  %v466_v35 = vld [vmem:[%s1905_s12 + $0x18] sm:$0xff] }
  0x1d   : > { %v456_v41 = vsel %vm440_vm2, %v432_v24, %v448_v32  ;;  %v457_v42 = vsel %vm441_vm3, %v433_v25, %v449_v33  ;;  %v516_v43 = vrot.slane %v455_v38, 7  ;;  %v450_v44 = vmul.f32 0.01, %v434_v27  ;;  %s1735_s18 = smov 96  }
  0x1e   : > { %v472_v45 = vadd.f32 %v1884_v18, %v468_v39  ;;  %v517_v46 = vrot.slane %v456_v41, 7  ;;  %v519_v47 = vrot.slane %v457_v42, 7  ;;  %v471_v48 = vadd.f32 %v1884_v18, %v467_v40  ;;  %590 = vperm.xlu1 %1559, %v1814_v0   ;;  %s495_s24 = scvt.s32.f32 %s1965_s19  ;;  %s1736_s19 = smov 48  }
  0x1f   : > { %v458_v50 = vsel %vm442_vm5, %v434_v27, %v450_v44  ;;  %vm443_vm6 = vcmp.gt.f32.partialorder %v435_v28, 0.0  ;;  %v451_v51 = vmul.f32 0.01, %v435_v28  ;;  %1560 = vset.pattern.permute.xlu0 %v1730_v4  ;;  %v452_v61 = vmul.f32 0.01, %v436_v36 }
  0x20   : > { %vm476_vm7 = vcmp.gt.f32.partialorder %v472_v45, 0.0  ;;  %v480_v52 = vmul.f32 0.01, %v472_v45  ;;  %v1922_v53 = vsel %vm501_vm0, %v516_v43, %v517_v46  ;;  %v1925_v54 = vsel %vm501_vm0, %v517_v46, %v519_v47  ;;  %600 = vperm.xlu0 %1560, %v1851_v6  }
  0x21   : > { %v726_v55 = vrot.slane %v1922_v53, 1  ;;  %v728_v56 = vrot.slane %v1925_v54, 1  ;;  %vm475_vm8 = vcmp.gt.f32.partialorder %v471_v48, 0.0  ;;  %v479_v57 = vmul.f32 0.01, %v471_v48 }
  0x22   : > { %v484_v58 = vsel %vm476_vm7, %v472_v45, %v480_v52  ;;  %v521_v59 = vrot.slane %v458_v50, 7  ;;  %v459_v60 = vsel %vm443_vm6, %v435_v28, %v451_v51  ;;  %vm444_vm9 = vcmp.gt.f32.partialorder %v436_v36, 0.0  ;;  %1561 = vset.pattern.permute.xlu1 %v1729_v2 }
  0x23   : > { %v492_v63 = vmul.f32 %v490_v49, %v484_v58  ;;  %v483_v0 = vsel %vm475_vm8, %v471_v48, %v479_v57  ;;  %v523_v9 = vrot.slane %v459_v60, 7  ;;  %v438_v11 = vadd.f32 %v1884_v18, %v424_v37  ;;  %648 = vperm.xlu1 %1561, %v577_v62  }
  0x24   : > { %v491_v3 = vmul.f32 %v490_v49, %v483_v0  ;;  %v1937_v8 = vsel %vm501_vm0, %v519_v47, %v521_v59  ;;  %v1942_v6 = vsel %vm720_vm4, %v726_v55, %v728_v56  ;;  %v460_v13 = vsel %vm444_vm9, %v436_v36, %v452_v61  ;;  %605 = vperm.xlu0 %1560, %v1881_v17  }
  0x25   : > { %v503_v10 = vrot.slane %v492_v63, 7  ;;  %v730_v15 = vrot.slane %v1937_v8, 1  ;;  %vm445_vm10 = vcmp.gt.f32.partialorder %v437_v1, 0.0  ;;  %v453_v16 = vmul.f32 0.01, %v437_v1 }
  0x26   : > { %v502_v12 = vrot.slane %v491_v3, 7  ;;  %v1957_v22 = vsel %vm501_vm0, %v521_v59, %v523_v9  ;;  %v525_v24 = vrot.slane %v460_v13, 7  ;;  %vm446_vm11 = vcmp.gt.f32.partialorder %v438_v11, 0.0  ;;  %v552_v13 = vld [vmem:[%s2566_s5] sm:$0xff] }
  0x27   : > { %v1946_v14 = vsel %vm501_vm0, %v503_v10, %v516_v43  ;;  %1562 = vset.pattern.permute.xlu1 %v1730_v4  ;;  %v454_v26 = vmul.f32 0.01, %v438_v11  ;;  %v461_v27 = vsel %vm445_vm10, %v437_v1, %v453_v16  ;;  %v732_v29 = vrot.slane %v1957_v22, 1 }
  0x28   : > { %v724_v19 = vrot.slane %v1946_v14, 1  ;;  %v1951_v20 = vsel %vm501_vm0, %v502_v12, %v503_v10  ;;  %v1954_v21 = vsel %vm501_vm0, 0.0, %v502_v12  ;;  %595 = vperm.xlu1 %1562, %v1844_v5   ;;  %615 = vperm.xlu0 %1560, %v577_v62   ;;  %v731_v33 = vsel %vm720_vm4, %v728_v56, %v730_v15 }
  0x29   : > { %v721_v17 = vrot.slane %v1954_v21, 1  ;;  %v722_v23 = vrot.slane %v1951_v20, 1  ;;  %v462_v34 = vsel %vm446_vm11, %v438_v11, %v454_v26  ;;  %v1976_v36 = vsel %vm501_vm0, %v523_v9, %v525_v24 }
  0x2a   : > { %v727_v25 = vsel %vm720_vm4, %v724_v19, %v726_v55  ;;  %v527_v37 = vrot.slane %v461_v27, 7  ;;  %v529_v38 = vrot.slane %v462_v34, 7  ;;  %v469_v5 = vmul.f32 %v1862_v7, %v465_v31 }
  0x2b   : > { %v1568_v28 = vpack.i.bf16 %v1942_v6, %v727_v25  ;;  %v723_v32 = vsel %vm720_vm4, %v721_v17, %v722_v23  ;;  %v725_v4 = vsel %vm720_vm4, %v722_v23, %v724_v19  ;;  %v1578_v40 = vpack.i.bf16 %v731_v33, %v727_v25 }
  0x2c   : > { %610 = vperm.xlu1 %1562, %v1900_v30   ;;  %v1563_v39 = vpack.i.bf16 %v725_v4, %v723_v32  ;;  %v470_v41 = vmul.f32 %v1862_v7, %v466_v35  ;;  %v733_v42 = vsel %vm720_vm4, %v730_v15, %v732_v29  ;;  %v734_v43 = vrot.slane %v1976_v36, 1  ;;  %1688 = vset.pattern.permute.xlu0 %v1729_v2  ;;  %v553_v15 = vld [vmem:[%s2566_s5 + $0x8] sm:$0xff]  ;;  %v554_v32 = vld [vmem:[%s2566_s5 + $0x10] sm:$0xff]  ;;  %v555_v4 = vld [vmem:[%s2566_s5 + $0x18] sm:$0xff] }
  0x2d   : > { %1569 = vrot.lane.b32.xlu0 %v1568_v28, %s1731_s20  ;;  %v473_v44 = vadd.f32 %v1884_v18, %v469_v5  ;;  %v1988_v45 = vsel %vm501_vm0, %v525_v24, %v527_v37  ;;  %v1991_v30 = vsel %vm501_vm0, %v527_v37, %v529_v38  ;;  %v496_v48 = vstv %s495_s24 }
  0x2e   : > { %v474_v46 = vadd.f32 %v1884_v18, %v470_v41  ;;  %v1573_v7 = vpack.i.bf16 %v733_v42, %v731_v33  ;;  %v1588_v49 = vpack.i.bf16 %v733_v42, %v1942_v6  ;;  %v735_v50 = vsel %vm720_vm4, %v732_v29, %v734_v43 }
  0x2f   : > { %vm477_vm12 = vcmp.gt.f32.partialorder %v473_v44, 0.0  ;;  %v481_v47 = vmul.f32 0.01, %v473_v44  ;;  %v736_v51 = vrot.slane %v1988_v45, 1  ;;  %v846_v52 = vrot.slane %v1991_v30, 1 }
  0x30   : > { %1564 = vrot.lane.b32.xlu1 %v1563_v39, %s1732_s21  ;;  %vm478_vm13 = vcmp.gt.f32.partialorder %v474_v46, 0.0  ;;  %v482_v2 = vmul.f32 0.01, %v474_v46  ;;  %v1583_v59 = vpack.i.bf16 %v735_v50, %v731_v33  ;;  %v1734_v16 = vmov 0.0|0.0  }
  0x31   : > { %1579 = vrot.lane.b32.xlu0 %v1578_v40, %s1732_s21  ;;  %v485_v18 = vsel %vm477_vm12, %v473_v44, %v481_v47  ;;  %v2001_v57 = vsel %vm720_vm4, %v734_v43, %v736_v51  ;;  %v2009_v62 = vsel %vm720_vm4, %v736_v51, %v846_v52  ;;  %1460 = vmatprep.subr.bf16.mxu0 %v1734_v16  ;;  %vm1011_vm1 = vcmask 130048  }
  0x32   : > { %v497_v55 = vmul.f32 %v496_v48, %v485_v18  ;;  %v486_v56 = vsel %vm478_vm13, %v474_v46, %v482_v2  ;;  %v1598_v61 = vpack.i.bf16 %v2001_v57, %v733_v42  ;;  %v1593_v9 = vpack.i.bf16 %v2009_v62, %v735_v50  ;;  %1487 = vmatprep.subr.bf16.mxu1 %v1734_v16 }
  0x33   : > { %v2003_v58 = vmul.f32 %v496_v48, %v486_v56  ;;  %v1603_v12 = vpack.i.bf16 %v2001_v57, %v735_v50  ;;  %v1461_v19 = vpack.c.bf16 %v553_v15, %v552_v13  ;;  %v1464_v35 = vpack.c.bf16 %v555_v4, %v554_v32 }
  0x34   : > { %1574 = vrot.lane.b32.xlu1 %v1573_v7, %s1733_s8  ;;  %v542_v60 = vrot.slane %v497_v55, 7  ;;  %vm1020_vm2 = vcmask 261120   ;;  %vm1029_vm3 = vcmask 392192   ;;  %vm1047_vm5 = vcmask 654336  }
  0x35   : > { %1589 = vrot.lane.b32.xlu0 %v1588_v49, %s1732_s21  ;;  %v543_v63 = vrot.slane %v2003_v58, 7  ;;  %1462 = vmatpush1.bf16.msra.mxu0 %v1461_v19  ;;  %vm1056_vm6 = vcmask 785408   ;;  %vm1065_vm7 = vcmask 916480   ;;  %vm1254_vm8 = vcmask 123904  }
  0x36   : > { %v2013_v0 = vsel %vm501_vm0, %v529_v38, %v542_v60  ;;  %1496 = vmatpush1.bf16.msra.mxu1 %v1461_v19  ;;  %1463 = vmatprep.subr.bf16.mxu0 %v1734_v16 }
  0x37   : > { %v2018_v1 = vsel %vm501_vm0, %v542_v60, %v543_v63  ;;  %v2569_v3 = vrot.slane %v2013_v0, 1  ;;  %1488 = vmatprep.subr.bf16.mxu1 %v1734_v16 }
  0x38   : > { %1584 = vrot.lane.b32.xlu1 %v1583_v59, %s1731_s20 }
  0x39   : > { %1599 = vrot.lane.b32.xlu0 %v1598_v61, %s1731_s20  ;;  %v2027_v10 = vsel %vm720_vm4, %v846_v52, %v2569_v3  ;;  %1465 = vmatpush1.bf16.msra.mxu0 %v1464_v35 }
  0x3a   : > { %v1653_v11 = vpack.i.bf16 %v2027_v10, %v2009_v62  ;;  %1497 = vmatpush1.bf16.msra.mxu1 %v1464_v35  ;;  %1466 = vmatprep.subr.bf16.mxu0 %v1734_v16 }
  0x3b   : > { %1489 = vmatprep.subr.bf16.mxu1 %v1734_v16 }
  0x3c   : > { %1594 = vrot.lane.b32.xlu1 %v1593_v9, %s1733_s8 }
  0x40   : > { %1604 = vrot.lane.b32.xlu1 %v1603_v12, %s1732_s21 }
  0x8a   : > { %v2046_v17 = vpop.permute.xlu1 %633  ;;  %v628_v23 = vpop.permute.xlu0 %627 }
  0x8b   : > { %v651_v24 = vrot.slane %v628_v23, 6  ;;  %v654_v19 = vrot.slane %v2046_v17, 6 }
  0x8d   : > { %v709_v28 = vmul.f32 %v651_v24, %v1925_v54  ;;  %v675_v32 = vmul.f32 %v651_v24, %v1954_v21 }
  0x8e   : > { %v631_v25 = vpop.permute.xlu0 %630 }
  0x8f   : > { %v652_v26 = vrot.slane %v631_v25, 6  ;;  %v2048_v27 = vpop.permute.xlu1 %580  ;;  %v994_v34 = vrot.slane %v709_v28, 2 }
  0x90   : > { %v684_v47 = vmul.f32 %v2048_v27, %v1946_v14  ;;  %v701_v7 = vmul.f32 %v2048_v27, %v1925_v54 }
  0x91   : > { %v2052_v29 = vsel %vm650_vm14, %v651_v24, %v652_v26  ;;  %v655_v4 = vsel %vm650_vm14, %v652_v26, %v654_v19 }
  0x92   : > { %v637_v31 = vpop.permute.xlu0 %636  ;;  %v2062_v33 = vmul.f32 %v2052_v29, %v1937_v8 }
  0x93   : > { %v656_v39 = vrot.slane %v637_v31, 6 }
  0x94   : > { %v640_v37 = vpop.permute.xlu1 %639  ;;  %v995_v5 = vrot.slane %v2062_v33, 2 }
  0x95   : > { %v658_v38 = vrot.slane %v640_v37, 6  ;;  %v2128_v17 = vsel %vm650_vm14, %v654_v19, %v656_v39 }
  0x96   : > { %v643_v40 = vpop.permute.xlu0 %642  ;;  %v996_v42 = vsel %vm771_vm15, %v994_v34, %v995_v5  ;;  %v2123_v34 = vmul.f32 %v651_v24, %v1946_v14  ;;  %v772_v24 = vrot.slane %v675_v32, 2  ;;  %v695_v33 = vmul.f32 %v2128_v17, %v1937_v8 }
  0x97   : > { %v660_v41 = vrot.slane %v643_v40, 6  ;;  %v2071_v43 = vsel %vm650_vm14, %v656_v39, %v658_v38  ;;  %1450 = vmatprep.mubr.msk.f32.mxu0 %vm1011_vm1, %v996_v42  ;;  %v2135_v40 = vmul.f32 %v655_v4, %v1946_v14  ;;  %v2146_v39 = vsel %vm501_vm0, %v543_v63, 0.0 }
  0x98   : > { %v2089_v50 = vmul.f32 %v2071_v43, %v1988_v45 }
  0x99   : > { %v2075_v44 = vsel %vm650_vm14, %v658_v38, %v660_v41  ;;  %v2077_v46 = vpop.permute.xlu1 %585  ;;  %v676_v38 = vmul.f32 %v2052_v29, %v1951_v20  ;;  %v2570_v19 = vrot.slane %v2135_v40, 2 }
  0x9a   : > { %v646_v48 = vpop.permute.xlu0 %645  ;;  %v685_v49 = vmul.f32 %v2077_v46, %v1922_v53  ;;  %v702_v2 = vmul.f32 %v2077_v46, %v1937_v8  ;;  %v2093_v51 = vmul.f32 %v2075_v44, %v1991_v30  ;;  %v1001_v59 = vrot.slane %v2089_v50, 2 }
  0x9b   : > { %v662_v35 = vrot.slane %v646_v48, 6  ;;  %v556_v48 = vld [vmem:[%s2566_s5 + $0x20] sm:$0xff] }
  0x9c   : > { %v1613_v18 = vpack.i.bf16 %v702_v2, %v701_v7  ;;  %v1608_v55 = vpack.i.bf16 %v685_v49, %v684_v47  ;;  %v1003_v60 = vrot.slane %v2093_v51, 2  ;;  %v557_v7 = vld [vmem:[%s2566_s5 + $0x28] sm:$0xff]  ;;  %v883_v49 = vrot.slane %v2123_v34, 2  ;;  %v564_v51 = vld [vmem:[%s2566_s5 + $0x60] sm:$0xff] }
  0x9d   : > { %v2095_v52 = vpop.permute.xlu1 %590  ;;  %v711_v2 = vmul.f32 %v655_v4, %v1957_v22  ;;  %v663_v58 = vsel %vm650_vm14, %v660_v41, %v662_v35  ;;  %v559_v41 = vld [vmem:[%s2566_s5 + $0x38] sm:$0xff] }
  0x9e   : > { %1614 = vrot.lane.b32.xlu0 %v1613_v18, %s1735_s18  ;;  %1609 = vrot.lane.b32.xlu1 %v1608_v55, %s1736_s19  ;;  %v686_v61 = vmul.f32 %v2095_v52, %v1925_v54  ;;  %v703_v9 = vmul.f32 %v2095_v52, %v1957_v22  ;;  %v1004_v15 = vsel %vm771_vm15, %v1001_v59, %v1003_v60 }
  0x9f   : > { %v2099_v56 = vpop.permute.xlu0 %600  ;;  %1454 = vmatprep.mubr.msk.f32.mxu1 %vm1011_vm1, %v1004_v15  ;;  %v2158_v18 = vmul.f32 %v2128_v17, %v1976_v36  ;;  %v693_v55 = vmul.f32 %v2052_v29, %v1922_v53  ;;  %v2178_v15 = vmul.f32 %v655_v4, %v1925_v54  ;;  %v773_v29 = vrot.slane %v676_v38, 2 }
  0xa0   : > { %v688_v12 = vmul.f32 %v2099_v56, %v1957_v22  ;;  %v705_v13 = vmul.f32 %v2099_v56, %v1988_v45  ;;  %v997_v4 = vrot.slane %v711_v2, 2  ;;  %v560_v2 = vld [vmem:[%s2566_s5 + $0x40] sm:$0xff] }
  0xa1   : > { %v999_v38 = vrot.slane %v2158_v18, 2  ;;  %v561_v18 = vld [vmem:[%s2566_s5 + $0x48] sm:$0xff] }
  0xa2   : > { %v649_v23 = vpop.permute.xlu1 %648  ;;  %v1618_v28 = vpack.i.bf16 %v688_v12, %v686_v61  ;;  %v1623_v31 = vpack.i.bf16 %v705_v13, %v703_v9  ;;  %v558_v13 = vld [vmem:[%s2566_s5 + $0x30] sm:$0xff] }
  0xa3   : > { %v2118_v25 = vpop.permute.xlu0 %605  ;;  %v2130_v37 = vrot.slane %v649_v23, 6 }
  0xa4   : > { %1619 = vrot.lane.b32.xlu0 %v1618_v28, %s1736_s19  ;;  %1624 = vrot.lane.b32.xlu1 %v1623_v31, %s1735_s18  ;;  %v689_v42 = vmul.f32 %v2118_v25, %v1976_v36  ;;  %v1467_v28 = vpack.c.bf16 %v557_v7, %v556_v48  ;;  %v715_v31 = vmul.f32 %v663_v58, %v2013_v0  ;;  %v884_v48 = vrot.slane %v693_v55, 2 }
  0xa5   : > { %v2167_v61 = vsel %vm650_vm14, %v662_v35, %v2130_v37  ;;  %v706_v32 = vmul.f32 %v2118_v25, %v1991_v30  ;;  %v2197_v7 = vmul.f32 %v663_v58, %v1957_v22  ;;  %v680_v55 = vmul.f32 %v2075_v44, %v1937_v8 }
  0xa6   : > { %1468 = vmatpush1.bf16.msra.mxu0 %v1467_v28  ;;  %1498 = vmatpush1.bf16.msra.mxu1 %v1467_v28  ;;  %v679_v28 = vmul.f32 %v2071_v43, %v1925_v54 }
  0xa7   : > { %v2137_v26 = vpop.permute.xlu1 %595  ;;  %v2161_v63 = vpop.permute.xlu0 %615  ;;  %1469 = vmatprep.subr.bf16.mxu0 %v1734_v16  ;;  %1490 = vmatprep.subr.bf16.mxu1 %v1734_v16 }
  0xa8   : > { %v687_v47 = vmul.f32 %v2137_v26, %v1937_v8  ;;  %v704_v9 = vmul.f32 %v2137_v26, %v1976_v36  ;;  %v691_v34 = vmul.f32 %v2161_v63, %v1991_v30 }
  0xaa   : > { %v1628_v12 = vpack.i.bf16 %v689_v42, %v687_v47  ;;  %v2194_v42 = vmul.f32 %v2167_v61, %v2018_v1  ;;  %v1470_v47 = vpack.c.bf16 %v559_v41, %v558_v13  ;;  %v1633_v3 = vpack.i.bf16 %v706_v32, %v704_v9 }
  0xab   : > { %v2181_v23 = vpop.permute.xlu1 %610  ;;  %v774_v9 = vsel %vm771_vm15, %v772_v24, %v773_v29  ;;  %v776_v13 = vsel %vm771_vm15, %v773_v29, %v2570_v19  ;;  %v678_v41 = vmul.f32 %v2128_v17, %v1922_v53  ;;  %v1005_v32 = vrot.slane %v715_v31, 2  ;;  %v562_v29 = vld [vmem:[%s2566_s5 + $0x50] sm:$0xff] }
  0xac   : > { %v690_v35 = vmul.f32 %v2181_v23, %v1988_v45  ;;  %1629 = vrot.lane.b32.xlu0 %v1628_v12, %s1736_s19  ;;  %v886_v12 = vrot.slane %v2178_v15, 2  ;;  %1471 = vmatpush1.bf16.msra.mxu0 %v1470_v47  ;;  %v1473_v24 = vpack.c.bf16 %v561_v18, %v560_v2  ;;  %v1007_v31 = vrot.slane %v2194_v42, 2 }
  0xad   : > { %1499 = vmatpush1.bf16.msra.mxu1 %v1470_v47  ;;  %v697_v47 = vmul.f32 %v2075_v44, %v1976_v36  ;;  %v2240_v2 = vmul.f32 %v663_v58, %v1988_v45  ;;  %v1643_v19 = vpack.i.bf16 %v776_v13, %v774_v9  ;;  %1472 = vmatprep.subr.bf16.mxu0 %v1734_v16  ;;  %v777_v44 = vrot.slane %v678_v41, 2 }
  0xae   : > { %v1638_v6 = vpack.i.bf16 %v691_v34, %v690_v35  ;;  %v717_v34 = vmul.f32 %v2130_v37, %v2146_v39  ;;  %v563_v35 = vld [vmem:[%s2566_s5 + $0x58] sm:$0xff]  ;;  %v887_v42 = vsel %vm771_vm15, %v884_v48, %v886_v12  ;;  %1491 = vmatprep.subr.bf16.mxu1 %v1734_v16  ;;  %v696_v58 = vmul.f32 %v2071_v43, %v1957_v22 }
  0xaf   : > { %v779_v18 = vrot.slane %v679_v28, 2  ;;  %v1476_v17 = vpack.c.bf16 %v563_v35, %v562_v29  ;;  %v2266_v43 = vsel %vm771_vm15, %v1003_v60, %v1005_v32  ;;  %v894_v62 = vrot.slane %v2240_v2, 2 }
  0xb0   : > { %1634 = vrot.lane.b32.xlu0 %v1633_v3, %s1735_s18  ;;  %1639 = vrot.lane.b32.xlu1 %v1638_v6, %s1736_s19  ;;  %v2231_v3 = vsel %vm771_vm15, %v995_v5, %v997_v4  ;;  %v2234_v6 = vsel %vm771_vm15, %v997_v4, %v999_v38  ;;  %v781_v5 = vrot.slane %v680_v55, 2  ;;  %v885_v4 = vsel %vm771_vm15, %v883_v49, %v884_v48  ;;  %s1737_s19 = smov 32  }
  0xb1   : > { %1474 = vmatpush1.bf16.msra.mxu0 %v1473_v24  ;;  %1500 = vmatpush1.bf16.msra.mxu1 %v1473_v24  ;;  %v2261_v49 = vsel %vm771_vm15, %v999_v38, %v1001_v59  ;;  %v1009_v48 = vrot.slane %v717_v34, 2  ;;  %v892_v55 = vrot.slane %v697_v47, 2  ;;  %v2571_v9 = vrot.slane %v2197_v7, 2  ;;  %v565_v59 = vld [vmem:[%s2566_s5 + $0x68] sm:$0xff] }
  0xb2   : > { %1475 = vmatprep.subr.bf16.mxu0 %v1734_v16  ;;  %1492 = vmatprep.subr.bf16.mxu1 %v1734_v16  ;;  %v683_v60 = vmul.f32 %v2130_v37, %v1988_v45  ;;  %v782_v38 = vsel %vm771_vm15, %v779_v18, %v781_v5  ;;  %v682_v13 = vmul.f32 %v2167_v61, %v1976_v36  ;;  %v888_v28 = vrot.slane %v695_v33, 2 }
  0xb3   : > { %v784_v50 = vsel %vm771_vm15, %v781_v5, %v2571_v9  ;;  %v2289_v41 = vsel %vm771_vm15, %v1007_v31, %v1009_v48  ;;  %v890_v34 = vrot.slane %v696_v58, 2  ;;  %v780_v45 = vsel %vm771_vm15, %v777_v44, %v779_v18 }
  0xb4   : > { %1644 = vrot.lane.b32.xlu0 %v1643_v19, %s1737_s19  ;;  %1654 = vrot.lane.b32.xlu1 %v1653_v11, %s1731_s20  ;;  %v2269_v19 = vsel %vm771_vm15, %v1005_v32, %v1007_v31  ;;  %v1658_v11 = vpack.i.bf16 %v887_v42, %v885_v4  ;;  %v2572_v32 = vpack.i.bf16 %v2027_v10, %v2001_v57  ;;  %v2573_v24 = vrot.slane %v2135_v40, 2  ;;  %v566_v57 = vld [vmem:[%s2566_s5 + $0x70] sm:$0xff]  ;;  %v567_v10 = vld [vmem:[%s2566_s5 + $0x78] sm:$0xff] }
  0xb5   : > { %1477 = vmatpush1.bf16.msra.mxu0 %v1476_v17  ;;  %v1479_v35 = vpack.c.bf16 %v565_v59, %v564_v51  ;;  %1501 = vmatpush1.bf16.msra.mxu1 %v1476_v17  ;;  %v1673_v31 = vpack.i.bf16 %v784_v50, %v780_v45  ;;  %v895_v2 = vsel %vm771_vm15, %v892_v55, %v894_v62  ;;  %v787_v40 = vrot.slane %v683_v60, 2 }
  0xb6   : > { %v778_v29 = vsel %vm771_vm15, %v2573_v24, %v777_v44  ;;  %1478 = vmatprep.subr.bf16.mxu0 %v1734_v16  ;;  %1493 = vmatprep.subr.bf16.mxu1 %v1734_v16  ;;  %v893_v18 = vsel %vm771_vm15, %v890_v34, %v892_v55  ;;  %v699_v33 = vmul.f32 %v2167_v61, %v1991_v30  ;;  %v785_v5 = vrot.slane %v682_v13, 2  ;;  %v568_v30 = vld [vmem:[%s2566_s5 + $0x80] sm:$0xff]  ;;  %v569_v61 = vld [vmem:[%s2566_s5 + $0x88] sm:$0xff] }
  0xb7   : > { %v1663_v47 = vpack.i.bf16 %v782_v38, %v778_v29  ;;  %v891_v4 = vsel %vm771_vm15, %v888_v28, %v890_v34  ;;  %v889_v42 = vsel %vm771_vm15, %v886_v12, %v888_v28  ;;  %v1482_v44 = vpack.c.bf16 %v567_v10, %v566_v57 }
  0xb8   : > { %1649 = vrot.lane.b32.xlu0 %v2572_v32, %s1733_s8  ;;  %1659 = vrot.lane.b32.xlu1 %v1658_v11, %s1738_s15  ;;  %v1678_v58 = vpack.i.bf16 %v895_v2, %v891_v4  ;;  %v1668_v17 = vpack.i.bf16 %v893_v18, %v889_v42  ;;  %v896_v15 = vrot.slane %v699_v33, 2  ;;  %v2574_v12 = vmov %v2571_v9  ;;  %v2355_v32 = vpop.permute.xlu0 %1569 }
  0xb9   : > { %1480 = vmatpush1.bf16.msra.mxu0 %v1479_v35  ;;  %1502 = vmatpush1.bf16.msra.mxu1 %v1479_v35  ;;  %v786_v48 = vsel %vm771_vm15, %v2574_v12, %v785_v5  ;;  %v788_v55 = vsel %vm771_vm15, %v785_v5, %v787_v40  ;;  %v957_v11 = vrot.slane %v2018_v1, 1  ;;  %v1485_v9 = vpack.c.bf16 %v569_v61, %v568_v30 }
  0xba   : > { %1481 = vmatprep.subr.bf16.mxu0 %v1734_v16  ;;  %1494 = vmatprep.subr.bf16.mxu1 %v1734_v16  ;;  %v1683_v50 = vpack.i.bf16 %v788_v55, %v786_v48  ;;  %v897_v7 = vsel %vm771_vm15, %v894_v62, %v896_v15  ;;  %v700_v51 = vmul.f32 %v2130_v37, %v2013_v0  ;;  %v2575_v59 = vrot.slane %v2013_v0, 1 }
  0xbb   : > { %v707_v38 = vmul.f32 %v2181_v23, %v2013_v0  ;;  %v708_v37 = vmul.f32 %v2161_v63, %v2018_v1  ;;  %v1565_v0 = vpop.permute.xlu1 %1564  ;;  %v618_v40 = vmul.f32 %v2048_v27, %v1954_v21  ;;  %v619_v18 = vmul.f32 %v2077_v46, %v1951_v20 }
  0xbc   : > { %1674 = vrot.lane.b32.xlu0 %v1673_v31, %s1737_s19  ;;  %1664 = vrot.lane.b32.xlu1 %v1663_v47, %s1737_s19  ;;  %v958_v60 = vsel %vm720_vm4, %v2575_v59, %v957_v11  ;;  %v898_v13 = vrot.slane %v700_v51, 2  ;;  %v1580_v45 = vpop.permute.xlu0 %1579  ;;  %v1567_v33 = vunpack.i.h.bf16 %v1565_v0  ;;  %v1566_v5 = vunpack.i.l.bf16 %v1565_v0 }
  0xbd   : > { %1483 = vmatpush1.bf16.msra.mxu0 %v1482_v44  ;;  %1503 = vmatpush1.bf16.msra.mxu1 %v1482_v44  ;;  %v1582_v4 = vunpack.i.h.bf16 %v1580_v45  ;;  %v1581_v42 = vunpack.i.l.bf16 %v1580_v45  ;;  %v620_v44 = vmul.f32 %v2095_v52, %v1946_v14  ;;  %v621_v21 = vmul.f32 %v2137_v26, %v1922_v53 }
  0xbe   : > { %1484 = vmatprep.subr.bf16.mxu0 %v1734_v16  ;;  %1495 = vmatprep.subr.bf16.mxu1 %v1734_v16  ;;  %v959_v16 = vrot.slane %v2146_v39, 1  ;;  %v899_v62 = vsel %vm771_vm15, %v896_v15, %v898_v13  ;;  %v625_v20 = vmul.f32 %v2161_v63, %v1976_v36  ;;  %v624_v14 = vmul.f32 %v2181_v23, %v1957_v22 }
  0xbf   : > { %v2357_v34 = vpop.permute.xlu1 %1574  ;;  %v1013_v52 = vsel %vm1011_vm1, %v619_v18, %v1567_v33  ;;  %v1012_v53 = vsel %vm1011_vm1, %v618_v40, %v1566_v5 }
  0xc0   : > { %1679 = vrot.lane.b32.xlu0 %v1678_v58, %s1738_s15  ;;  %1669 = vrot.lane.b32.xlu1 %v1668_v17, %s1738_s15  ;;  %v960_v28 = vsel %vm720_vm4, %v957_v11, %v959_v16  ;;  %v1590_v24 = vpop.permute.xlu0 %1589  ;;  %v622_v58 = vmul.f32 %v2099_v56, %v1925_v54  ;;  %v623_v17 = vmul.f32 %v2118_v25, %v1937_v8  ;;  %v1572_v54 = vunpack.i.h.bf16 %v2355_v32 }
  0xc1   : > { %1486 = vmatpush1.bf16.msra.mxu0 %v1485_v9  ;;  %1504 = vmatpush1.bf16.msra.mxu1 %v1485_v9  ;;  %v1592_v27 = vunpack.i.h.bf16 %v1590_v24  ;;  %v1591_v46 = vunpack.i.l.bf16 %v1590_v24  ;;  %v1571_v8 = vunpack.i.l.bf16 %v2355_v32  ;;  %v1014_v56 = vsel %vm1011_vm1, %v620_v44, %v1581_v42 }
  0xc2   : > { %v1016_v36 = vsel %vm1011_vm1, %v622_v58, %v1582_v4  ;;  %vm1038_vm4 = vcmask 523264   ;;  %v1577_v25 = vunpack.i.h.bf16 %v2357_v34  ;;  %v1576_v22 = vunpack.i.l.bf16 %v2357_v34 }
  0xc3   : > { %v2359_v39 = vpop.permute.xlu1 %1584  ;;  %v1017_v26 = vsel %vm1011_vm1, %v623_v17, %v1592_v27  ;;  %v1015_v63 = vsel %vm1011_vm1, %v621_v21, %v1591_v46 }
  0xc4   : > { %912 = vrot.lane.b32.xlu0 %v897_v7, %s1738_s15  ;;  %1684 = vrot.lane.b32.xlu1 %v1683_v50, %s1737_s19  ;;  %v2363_v29 = vpop.permute.xlu0 %1599  ;;  %v1587_v9 = vunpack.i.h.bf16 %v2359_v39  ;;  %v1586_v50 = vunpack.i.l.bf16 %v2359_v39  ;;  %s2506_s19 = scalar_lea.vmem %s2567_s6, %s1439_s22  ;;  %s398_s22 = sadd.s32 %s1446_s16, %s1867_s17 }
  0xc5   : > { %v1602_v59 = vunpack.i.h.bf16 %v2363_v29  ;;  %s1447_s12 = sshll.u32 %s398_s22, 1 }
  0xc6   : > { %s400_s24 = scalar_lea.vmem %s2568_s7, %s1447_s12 }
  0xc7   : > { %v2361_v1 = vpop.permute.xlu1 %1594 }
  0xc8   : > { %973 = vrot.lane.b32.xlu0 %v958_v60, %s1733_s8  ;;  %944 = vrot.lane.b32.xlu1 %v707_v38, %s1735_s18  ;;  %v1601_v60 = vunpack.i.l.bf16 %v2363_v29  ;;  %v1597_v16 = vunpack.i.h.bf16 %v2361_v1 }
  0xcb   : > { %v1605_v35 = vpop.permute.xlu1 %1604 }
  0xcc   : > { %946 = vrot.lane.b32.xlu0 %v708_v37, %s1735_s18  ;;  %914 = vrot.lane.b32.xlu1 %v899_v62, %s1738_s15  ;;  %v1607_v12 = vunpack.i.h.bf16 %v1605_v35  ;;  %v1606_v48 = vunpack.i.l.bf16 %v1605_v35  ;;  %v1596_v37 = vunpack.i.l.bf16 %v2361_v1 }
  0xce   : > { %v2418_v34 = vsel %vm1011_vm1, %v625_v20, %v1607_v12  ;;  %v2421_v45 = vsel %vm1011_vm1, %v624_v14, %v1606_v48 }
  0xd0   : > { %975 = vrot.lane.b32.xlu1 %v960_v28, %s1733_s8 }
 0x110   : > { %v2365_v31 = vpop.permute.xlu0 %1614  ;;  %v1610_v47 = vpop.permute.xlu1 %1609 }
 0x111   : > { %v1612_v7 = vunpack.i.h.bf16 %v1610_v47  ;;  %v1611_v51 = vunpack.i.l.bf16 %v1610_v47  ;;  %v1617_v29 = vunpack.i.h.bf16 %v2365_v31  ;;  %v1616_v35 = vunpack.i.l.bf16 %v2365_v31 }
 0x116   : > { %v2367_v2 = vpop.permute.xlu0 %1619  ;;  %v2369_v57 = vpop.permute.xlu1 %1624 }
 0x117   : > { %v1622_v18 = vunpack.i.h.bf16 %v2367_v2  ;;  %v1621_v33 = vunpack.i.l.bf16 %v2367_v2  ;;  %v1627_v42 = vunpack.i.h.bf16 %v2369_v57  ;;  %v1626_v44 = vunpack.i.l.bf16 %v2369_v57 }
 0x11e   : > { %v2371_v10 = vpop.permute.xlu0 %1629 }
 0x11f   : > { %v1632_v2 = vunpack.i.h.bf16 %v2371_v10 }
 0x122   : > { %v2387_v30 = vpop.permute.xlu0 %1634  ;;  %v2389_v61 = vpop.permute.xlu1 %1639 }
 0x126   : > { %v1645_v23 = vpop.permute.xlu0 %1644  ;;  %v2403_v15 = vpop.permute.xlu1 %1654 }
 0x127   : > { %v1647_v55 = vunpack.i.h.bf16 %v1645_v23  ;;  %v1646_v11 = vunpack.i.l.bf16 %v1645_v23 }
 0x129   : > { %v1022_v38 = vsel %vm1020_vm2, %v1013_v52, %v1647_v55  ;;  %v1021_v13 = vsel %vm1020_vm2, %v1012_v53, %v1646_v11 }
 0x12a   : > { %v1030_v62 = vsel %vm1029_vm3, %v1021_v13, %v1611_v51  ;;  %v1031_v28 = vsel %vm1029_vm3, %v1022_v38, %v1612_v7  ;;  %v2415_v0 = vpop.permute.xlu0 %1649  ;;  %v1660_v32 = vpop.permute.xlu1 %1659 }
 0x12b   : > { %v1662_v39 = vunpack.i.h.bf16 %v1660_v32  ;;  %v1661_v24 = vunpack.i.l.bf16 %v1660_v32  ;;  %v1039_v47 = vsel %vm1038_vm4, %v1030_v62, %v1571_v8  ;;  %v1040_v40 = vsel %vm1038_vm4, %v1031_v28, %v1572_v54 }
 0x12c   : > { %v1631_v54 = vunpack.i.l.bf16 %v2371_v10  ;;  %v1637_v62 = vunpack.i.h.bf16 %v2387_v30 }
 0x12d   : > { %v1048_v5 = vsel %vm1047_vm5, %v1039_v47, %v1661_v24  ;;  %v1049_v4 = vsel %vm1047_vm5, %v1040_v40, %v1662_v39  ;;  %v1636_v39 = vunpack.i.l.bf16 %v2387_v30  ;;  %v1641_v40 = vunpack.i.l.bf16 %v2389_v61 }
 0x12e   : > { %v1675_v58 = vpop.permute.xlu0 %1674  ;;  %v1665_v17 = vpop.permute.xlu1 %1664  ;;  %v1057_v31 = vsel %vm1056_vm6, %v1048_v5, %v1616_v35  ;;  %v1058_v21 = vsel %vm1056_vm6, %v1049_v4, %v1617_v29  ;;  %v1652_v5 = vunpack.i.h.bf16 %v2415_v0 }
 0x12f   : > { %v1677_v20 = vunpack.i.h.bf16 %v1675_v58  ;;  %v1676_v27 = vunpack.i.l.bf16 %v1675_v58  ;;  %v1667_v46 = vunpack.i.h.bf16 %v1665_v17  ;;  %v1666_v14 = vunpack.i.l.bf16 %v1665_v17 }
 0x130   : > { %v1066_v8 = vsel %vm1065_vm7, %v1057_v31, %v1576_v22  ;;  %v1067_v52 = vsel %vm1065_vm7, %v1058_v21, %v1577_v25  ;;  %v1657_v17 = vunpack.i.h.bf16 %v2403_v15 }
 0x131   : > { %v1026_v57 = vsel %vm1020_vm2, %v1017_v26, %v1677_v20  ;;  %v1024_v53 = vsel %vm1020_vm2, %v1015_v63, %v1676_v27  ;;  %v1025_v23 = vsel %vm1020_vm2, %v1016_v36, %v1667_v46  ;;  %v1023_v12 = vsel %vm1020_vm2, %v1014_v56, %v1666_v14  ;;  %1155 = vmatmul.mubr.f32.vlgmr.msra.gmra.mrb[0].mxu0 %v1066_v8 }
 0x132   : > { %v1035_v48 = vsel %vm1029_vm3, %v1026_v57, %v1632_v2  ;;  %v1033_v55 = vsel %vm1029_vm3, %v1024_v53, %v1631_v54  ;;  %v1034_v11 = vsel %vm1029_vm3, %v1025_v23, %v1622_v18  ;;  %v1032_v10 = vsel %vm1029_vm3, %v1023_v12, %v1621_v33  ;;  %1451 = vmatprep.mubr.msk.f32.mxu0 %vm1011_vm1, %v2231_v3  ;;  %v1680_v25 = vpop.permute.xlu0 %1679  ;;  %v1670_v22 = vpop.permute.xlu1 %1669 }
 0x133   : > { %v1682_v26 = vunpack.i.h.bf16 %v1680_v25  ;;  %v1681_v63 = vunpack.i.l.bf16 %v1680_v25  ;;  %v1672_v7 = vunpack.i.h.bf16 %v1670_v22  ;;  %v1671_v36 = vunpack.i.l.bf16 %v1670_v22 }
 0x134   : > { %v1041_v56 = vsel %vm1038_vm4, %v1032_v10, %v1586_v50  ;;  %v1043_v51 = vsel %vm1038_vm4, %v1034_v11, %v1587_v9  ;;  %v1042_v38 = vsel %vm1038_vm4, %v1033_v55, %v1601_v60  ;;  %v1044_v13 = vsel %vm1038_vm4, %v1035_v48, %v1602_v59 }
 0x135   : > { %1160 = vmatmul.mubr.f32.gmra.mrb[2].mxu0 %v1067_v52  ;;  %v1050_v28 = vsel %vm1047_vm5, %v1041_v56, %v1671_v36  ;;  %v1052_v3 = vsel %vm1047_vm5, %v1043_v51, %v1672_v7  ;;  %v1053_v32 = vsel %vm1047_vm5, %v1044_v13, %v1682_v26  ;;  %v1051_v24 = vsel %vm1047_vm5, %v1042_v38, %v1681_v63 }
 0x136   : > { %1452 = vmatprep.mubr.msk.f32.mxu0 %vm1011_vm1, %v2234_v6  ;;  %v913_v50 = vpop.permute.xlu0 %912  ;;  %v1685_v9 = vpop.permute.xlu1 %1684  ;;  %v1059_v60 = vsel %vm1056_vm6, %v1050_v28, %v1626_v44  ;;  %v1061_v59 = vsel %vm1056_vm6, %v1052_v3, %v1627_v42  ;;  %v1642_v6 = vunpack.i.h.bf16 %v2389_v61  ;;  %v1656_v18 = vunpack.i.l.bf16 %v2403_v15 }
 0x137   : > { %v1687_v29 = vunpack.i.h.bf16 %v1685_v9  ;;  %v1686_v35 = vunpack.i.l.bf16 %v1685_v9  ;;  %v1068_v47 = vsel %vm1065_vm7, %v1059_v60, %v1596_v37  ;;  %v1070_v30 = vsel %vm1065_vm7, %v1061_v59, %v1597_v16 }
 0x138   : > { %1175 = vmatmul.mubr.f32.vlgmr.msra.gmra.mrb[0].mxu1 %v1070_v30  ;;  %v1062_v33 = vsel %vm1056_vm6, %v1053_v32, %v1637_v62  ;;  %v1060_v1 = vsel %vm1056_vm6, %v1051_v24, %v1636_v39  ;;  %v1651_v61 = vunpack.i.l.bf16 %v2415_v0 }
 0x139   : > { %v1028_v4 = vsel %vm1020_vm2, %v2418_v34, %v1687_v29  ;;  %v1027_v37 = vsel %vm1020_vm2, %v2421_v45, %v1686_v35  ;;  %1165 = vmatmul.mubr.f32.gmra.mrb[4].mxu0 %v1068_v47  ;;  %1455 = vmatprep.mubr.msk.f32.mxu1 %vm1011_vm1, %v2266_v43  ;;  %v1071_v58 = vsel %vm1065_vm7, %v1062_v33, %v1652_v5 }
 0x13a   : > { %1453 = vmatprep.mubr.msk.f32.mxu0 %vm1011_vm1, %v2261_v49  ;;  %v974_v16 = vpop.permute.xlu0 %973  ;;  %v945_v42 = vpop.permute.xlu1 %944  ;;  %v1036_v44 = vsel %vm1029_vm3, %v1027_v37, %v1641_v40  ;;  %v1037_v45 = vsel %vm1029_vm3, %v1028_v4, %v1642_v6  ;;  %v1069_v31 = vsel %vm1065_vm7, %v1060_v1, %v1651_v61 }
 0x13b   : > { %v1045_v34 = vsel %vm1038_vm4, %v1036_v44, %v1656_v18  ;;  %v1046_v21 = vsel %vm1038_vm4, %v1037_v45, %v1657_v17 }
 0x13c   : > { %v1054_v43 = vsel %vm1047_vm5, %v1045_v34, %v913_v50  ;;  %1180 = vmatmul.mubr.f32.gmra.mrb[2].mxu1 %v1071_v58 }
 0x13d   : > { %v1063_v49 = vsel %vm1056_vm6, %v1054_v43, %v945_v42  ;;  %1170 = vmatmul.mubr.f32.gmra.mrb[6].mxu0 %v1069_v31  ;;  %1456 = vmatprep.mubr.msk.f32.mxu1 %vm1011_vm1, %v2269_v19 }
 0x13e   : > { %v915_v0 = vpop.permute.xlu1 %914  ;;  %v1072_v20 = vsel %vm1065_vm7, %v1063_v49, %v974_v16  ;;  %v947_v27 = vpop.permute.xlu0 %946 }
 0x13f   : > { %v1055_v15 = vsel %vm1047_vm5, %v1046_v21, %v915_v0 }
 0x140   : > { %1185 = vmatmul.mubr.f32.gmra.mrb[4].mxu1 %v1072_v20  ;;  %v1064_v14 = vsel %vm1056_vm6, %v1055_v15, %v947_v27 }
 0x141   : > { %1457 = vmatprep.mubr.msk.f32.mxu1 %vm1011_vm1, %v2289_v41 }
 0x142   : > { %v976_v46 = vpop.permute.xlu1 %975 }
 0x143   : > { %v1073_v2 = vsel %vm1065_vm7, %v1064_v14, %v976_v46 }
 0x144   : > { %1190 = vmatmul.mubr.f32.gmra.mrb[6].mxu1 %v1073_v2 }
 0x204   : > { %v1156_v19 = vpop.f32.mrb[0].mxu0 }
 0x205   : > { %1195 = vst.msk [vmem:[%s2506_s19] sm:$0xff] %vm1011_vm1, %v1156_v19  ;;  %v1158_v54 = vpop.f32.mrb[1].mxu0  ;;  %v1224_v41 = vmul.f32 %v1156_v19, %v1156_v19  ;;  %v1203_v52 = vsel %vm1011_vm1, %v1156_v19, 0.0 }
 0x207   : > { %v1232_v48 = vsel %vm1011_vm1, %v1224_v41, 0.0 }
 0x208   : > { %v1161_v8 = vpop.f32.mrb[2].mxu0 }
 0x209   : > { %1196 = vst.msk [vmem:[%s2506_s19 + $0x8] sm:$0xff] %vm1011_vm1, %v1161_v8  ;;  %v1204_v57 = vsel %vm1011_vm1, %v1161_v8, 0.0  ;;  %v1225_v53 = vmul.f32 %v1161_v8, %v1161_v8  ;;  %v1163_v23 = vpop.f32.mrb[3].mxu0 }
 0x20a   : > { %v1205_v12 = vadd.f32 %v1204_v57, %v1203_v52 }
 0x20b   : > { %v1233_v55 = vsel %vm1011_vm1, %v1225_v53, 0.0  ;;  %v1176_v11 = vpop.f32.mrb[0].mxu1 }
 0x20c   : > { %v1234_v10 = vadd.f32 %v1233_v55, %v1232_v48  ;;  %v1166_v25 = vpop.f32.mrb[4].mxu0  ;;  %1199 = vst.msk [vmem:[%s2506_s19 + $0x20] sm:$0xff] %vm1011_vm1, %v1176_v11  ;;  %v1178_v22 = vpop.f32.mrb[1].mxu1  ;;  %v1228_v28 = vmul.f32 %v1176_v11, %v1176_v11  ;;  %v1210_v9 = vsel %vm1011_vm1, %v1176_v11, 0.0 }
 0x20d   : > { %1197 = vst.msk [vmem:[%s2506_s19 + $0x10] sm:$0xff] %vm1011_vm1, %v1166_v25  ;;  %v1206_v26 = vsel %vm1011_vm1, %v1166_v25, 0.0  ;;  %v1226_v63 = vmul.f32 %v1166_v25, %v1166_v25  ;;  %v1168_v7 = vpop.f32.mrb[5].mxu0 }
 0x20e   : > { %v1207_v36 = vadd.f32 %v1206_v26, %v1205_v12  ;;  %v1239_v30 = vsel %vm1011_vm1, %v1228_v28, 0.0 }
 0x20f   : > { %v1235_v56 = vsel %vm1011_vm1, %v1226_v63, 0.0  ;;  %v1181_v51 = vpop.f32.mrb[2].mxu1 }
 0x210   : > { %v1236_v38 = vadd.f32 %v1235_v56, %v1234_v10  ;;  %v1171_v13 = vpop.f32.mrb[6].mxu0  ;;  %1200 = vst.msk [vmem:[%s2506_s19 + $0x28] sm:$0xff] %vm1011_vm1, %v1181_v51  ;;  %v1183_v62 = vpop.f32.mrb[3].mxu1  ;;  %v1229_v59 = vmul.f32 %v1181_v51, %v1181_v51  ;;  %v1212_v6 = vsel %vm1011_vm1, %v1181_v51, 0.0 }
 0x211   : > { %1198 = vst.msk [vmem:[%s2506_s19 + $0x18] sm:$0xff] %vm1011_vm1, %v1171_v13  ;;  %v1208_v3 = vsel %vm1011_vm1, %v1171_v13, 0.0  ;;  %v1227_v32 = vmul.f32 %v1171_v13, %v1171_v13  ;;  %v1173_v39 = vpop.f32.mrb[7].mxu0 }
 0x212   : > { %v1209_v50 = vadd.f32 %v1208_v3, %v1207_v36  ;;  %v1241_v5 = vsel %vm1011_vm1, %v1229_v59, 0.0 }
 0x213   : > { %v1237_v60 = vsel %vm1011_vm1, %v1227_v32, 0.0  ;;  %v1186_v24 = vpop.f32.mrb[4].mxu1 }
 0x214   : > { %v1238_v29 = vadd.f32 %v1237_v60, %v1236_v38  ;;  %v1211_v35 = vadd.f32 %v1210_v9, %v1209_v50  ;;  %1201 = vst.msk [vmem:[%s2506_s19 + $0x30] sm:$0xff] %vm1011_vm1, %v1186_v24  ;;  %v1188_v47 = vpop.f32.mrb[5].mxu1  ;;  %v1230_v40 = vmul.f32 %v1186_v24, %v1186_v24  ;;  %v1214_v4 = vsel %vm1011_vm1, %v1186_v24, 0.0 }
 0x216   : > { %v1213_v18 = vadd.f32 %v1212_v6, %v1211_v35  ;;  %v1240_v33 = vadd.f32 %v1239_v30, %v1238_v29  ;;  %v1243_v34 = vsel %vm1011_vm1, %v1230_v40, 0.0 }
 0x217   : > { %v1191_v37 = vpop.f32.mrb[6].mxu1 }
 0x218   : > { %v1242_v1 = vadd.f32 %v1241_v5, %v1240_v33  ;;  %v1215_v61 = vadd.f32 %v1214_v4, %v1213_v18  ;;  %1202 = vst.msk [vmem:[%s2506_s19 + $0x38] sm:$0xff] %vm1011_vm1, %v1191_v37  ;;  %v1216_v16 = vsel %vm1011_vm1, %v1191_v37, 0.0  ;;  %v1231_v42 = vmul.f32 %v1191_v37, %v1191_v37  ;;  %v1193_v44 = vpop.f32.mrb[7].mxu1 }
 0x21a   : > { %v1244_v58 = vadd.f32 %v1243_v34, %v1242_v1  ;;  %v1217_v45 = vadd.f32 %v1216_v16, %v1215_v61  ;;  %v1245_v17 = vsel %vm1011_vm1, %v1231_v42, 0.0 }
 0x21c   : > { %v1218_v43 = vrot.slane %v1217_v45, 4  ;;  %v1246_v31 = vadd.f32 %v1245_v17, %v1244_v58 }
 0x21e   : > { %v1219_v49 = vadd.f32 %v1218_v43, %v1217_v45  ;;  %v1247_v0 = vrot.slane %v1246_v31, 4 }
 0x220   : > { %v1220_v21 = vrot.slane %v1219_v49, 2  ;;  %v1248_v20 = vadd.f32 %v1247_v0, %v1246_v31 }
 0x222   : > { %v1221_v27 = vadd.f32 %v1220_v21, %v1219_v49  ;;  %v1249_v15 = vrot.slane %v1248_v20, 2 }
 0x224   : > { %v1222_v46 = vrot.slane %v1221_v27, 1  ;;  %v1250_v14 = vadd.f32 %v1249_v15, %v1248_v20 }
 0x226   : > { %v1251_v2 = vrot.slane %v1250_v14, 1  ;;  %v1223_v19 = vadd.f32 %v1222_v46, %v1221_v27 }
 0x228   : > { %v1252_v54 = vadd.f32 %v1251_v2, %v1250_v14 }
 0x22a   : > { %v1253_v41 = vsel %vm501_vm0, %v1223_v19, %v1252_v54 }
 0x22b   : > { %1255 = vst.msk [vmem:[%s400_s24] sm:$0x3] %vm1254_vm8, %v1253_v41 }
 0x22c PF: > { %s18_s28 = sadd.s32 1, %s1727_s28   ;;  %s2576_s24 = smov %s1719_s26 }
 0x22d   : > { %p15_p9 = scmp.ge.s32.totalorder %s18_s28, 10   ;;  %s2577_s25 = smov %s1723_s27 }
 0x22e   : > { %s2578_s26 = smov %s2581_s29  ;;  %s2579_s27 = smov %s2585_s30 }
 0x22f   :  { %17 = sbr.rel (!%p15_p9) target bundleno = 3 (0x3), region = 95 }

</bundles_post_ra>
